<compile_context>
chip_gen: v7x
topology: tpu7x:2x2x1
jax: 0.10.0
libtpu: 0.0.40
codegen_flags: <defaults>
</compile_context>

<pallas_src>
import jax
import jax.numpy as jnp
import numpy as np
from jax.experimental import pallas as pl
from jax.experimental.pallas import tpu as pltpu


def _round_up(x, m):
    return (x + m - 1) // m * m


def _laplacian_fusion_kernel(
    x_ref,        # VMEM (1, H+2, W+2, 2C)  padded [low|high] NHWC
    w_ref,        # VMEM (9*S, 2C)  folded conv weights -> [sum | sub]
    b_ref,        # VMEM (1, 2C)    folded conv bias    -> [sum | sub]
    w1_ref,       # VMEM (2C, 2C)   block-diag(se_sum.fc1, se_sub.fc1)
    b1_ref,       # VMEM (1, 2C)
    w2_ref,       # VMEM (2C, 2C)   block-diag(se_sum.fc2, se_sub.fc2)
    b2_ref,       # VMEM (1, 2C)
    ab_ref,       # VMEM (1, 2C)    [alpha]*C ++ [beta]*C
    out_ref,      # VMEM (1, H*W, C)
    col_ref,      # VMEM scratch (H*W, 9*S)  im2col LHS
):
    _, HW, C = out_ref.shape
    _, Hp, Wp, C2 = x_ref.shape
    H, W = Hp - 2, Wp - 2
    S = col_ref.shape[1] // 9            # lane-aligned per-tap column stride

    # Pad lanes (only exist when 2C is not a lane multiple) must be finite
    # zeros; the matching weight rows are zero so they contribute nothing.
    # (Re-zeroed every step: scratch is per-core and the batch axis may be
    #  split across cores on multi-TC chips.)
    if S != C2:
        col_ref[...] = jnp.zeros_like(col_ref)

    # Build the im2col LHS once: 9 lane-aligned stores, native dtype.
    xp = x_ref[0]                                            # (H+2, W+2, 2C)
    for dy in range(3):
        for dx in range(3):
            tap = dy * 3 + dx
            col_ref[:, tap * S:tap * S + C2] = (
                xp[dy:dy + H, dx:dx + W, :].reshape(HW, C2))

    patches = col_ref[...]                                   # (HW, 9*S)

    # One wide-K MXU matmul -> [sum_context | sub_context] in one tensor.
    conv = jnp.dot(patches, w_ref[...],
                   preferred_element_type=jnp.float32) + b_ref[...]  # (HW, 2C)

    # Fused SE for both branches: joint GAP + block-diagonal 1x1 "fc" matmuls.
    gap = jnp.mean(conv, axis=0, keepdims=True)              # (1, 2C)
    h = jnp.maximum(jnp.dot(gap, w1_ref[...],
                            preferred_element_type=jnp.float32) + b1_ref[...],
                    0.0)                                      # ReLU
    z = jnp.dot(h, w2_ref[...],
                preferred_element_type=jnp.float32) + b2_ref[...]
    # Fold alpha/beta and the "+ identity" into the gate.
    gate = ab_ref[...] * (1.0 + jax.nn.sigmoid(z))            # (1, 2C)

    scaled = conv * gate                                      # (HW, 2C)
    out_ref[0] = (scaled[:, :C] + scaled[:, C:]).astype(out_ref.dtype)


def laplacian_fusion(low_nchw, high_nchw, params):
    """Wrapper. Inputs are PyTorch-style NCHW; output is NCHW as well."""
    N, C, H, W = low_nchw.shape
    C2 = 2 * C
    S = _round_up(C2, 128)               # lane-aligned per-tap im2col stride

    # ---- glue: concat low/high on channels, NCHW->NHWC, zero pad spatial ----
    x = jnp.concatenate([low_nchw, high_nchw], axis=1)       # (N, 2C, H, W)
    x = jnp.transpose(x, (0, 2, 3, 1))                       # -> NHWC
    x = jnp.pad(x, ((0, 0), (1, 1), (1, 1), (0, 0)))         # (N, H+2, W+2, 2C)

    # Conv weights: OIHW -> (kh, kw, Cin, Cout); stack [low ; +/-high] on Cin;
    # concatenate sum|sub on Cout; zero-pad Cin to the lane stride S; flatten.
    def hwio(w):
        return jnp.transpose(w, (2, 3, 1, 0))                # (3, 3, C, C)

    wl = hwio(params["w_low"])
    wh = hwio(params["w_high"])
    w_sum = jnp.concatenate([wl, wh], axis=2)                # (3, 3, 2C, C)
    w_sub = jnp.concatenate([wl, -wh], axis=2)
    w_cat = jnp.concatenate([w_sum, w_sub], axis=3)          # (3, 3, 2C, 2C)
    w_cat = jnp.pad(w_cat, ((0, 0), (0, 0), (0, S - C2), (0, 0)))
    w_cat = w_cat.reshape(9 * S, C2)

    b_cat = jnp.concatenate([params["b_low"] + params["b_high"],
                             params["b_low"] - params["b_high"]]).reshape(1, C2)

    # SE 1x1 conv weights: (O, I, 1, 1) -> (I, O); pack both branches as a
    # block-diagonal so one matmul handles sum & sub gates at once.
    def se_w(w):
        return jnp.transpose(w[:, :, 0, 0], (1, 0))

    def blkdiag(a, b):
        z = jnp.zeros((C, C), a.dtype)
        return jnp.concatenate(
            [jnp.concatenate([a, z], axis=1),
             jnp.concatenate([z, b], axis=1)], axis=0)       # (2C, 2C)

    w1_blk = blkdiag(se_w(params["se_sum_w1"]), se_w(params["se_sub_w1"]))
    w2_blk = blkdiag(se_w(params["se_sum_w2"]), se_w(params["se_sub_w2"]))
    b1_cat = jnp.concatenate([params["se_sum_b1"],
                              params["se_sub_b1"]]).reshape(1, C2)
    b2_cat = jnp.concatenate([params["se_sum_b2"],
                              params["se_sub_b2"]]).reshape(1, C2)

    alpha = jnp.asarray(params["alpha"], jnp.float32)
    beta = jnp.asarray(params["beta"], jnp.float32)
    ab = jnp.concatenate([jnp.full((C,), alpha, jnp.float32),
                          jnp.full((C,), beta, jnp.float32)]).reshape(1, C2)

    full = lambda *shape: pl.BlockSpec(shape, lambda n: (0,) * len(shape))

    # TODO(synk): for v7x-sized images add a halo'd spatial grid axis with a
    #             two-pass SE (partial GAP accumulation, then gate/scale pass);
    #             whole-image per batch step is used here since it fits VMEM.
    out_flat = pl.pallas_call(
        _laplacian_fusion_kernel,
        out_shape=jax.ShapeDtypeStruct((N, H * W, C), low_nchw.dtype),
        grid_spec=pltpu.PrefetchScalarGridSpec(
            num_scalar_prefetch=0,
            grid=(N,),
            in_specs=[
                pl.BlockSpec((1, H + 2, W + 2, C2), lambda n: (n, 0, 0, 0)),
                full(9 * S, C2), full(1, C2),                 # folded conv
                full(C2, C2), full(1, C2),                    # SE fc1 (blkdiag)
                full(C2, C2), full(1, C2),                    # SE fc2 (blkdiag)
                full(1, C2),                                  # alpha/beta lanes
            ],
            out_specs=pl.BlockSpec((1, H * W, C), lambda n: (n, 0, 0)),
            scratch_shapes=[pltpu.VMEM((H * W, 9 * S), low_nchw.dtype)],
        ),
        compiler_params=pltpu.CompilerParams(
            dimension_semantics=("parallel",)),
    )(x, w_cat, b_cat, w1_blk, b1_cat, w2_blk, b2_cat, ab)

    out_nhwc = out_flat.reshape(N, H, W, C)
    return jnp.transpose(out_nhwc, (0, 3, 1, 2))              # NHWC -> NCHW


# ------------------------- pure-JAX reference (NCHW) -------------------------
def _reference(low, high, p):
    def conv(x, w, b):
        y = jax.lax.conv_general_dilated(
            x, w, window_strides=(1, 1), padding=((1, 1), (1, 1)),
            dimension_numbers=("NCHW", "OIHW", "NCHW"))
        return y + b[None, :, None, None]

    def se(x, w1, b1, w2, b2):
        gap = jnp.mean(x, axis=(2, 3))                                   # (N, C)
        h = jax.nn.relu(jnp.einsum("nc,oc->no", gap, w1[:, :, 0, 0]) + b1)
        g = jax.nn.sigmoid(jnp.einsum("nc,oc->no", h, w2[:, :, 0, 0]) + b2)
        return x * g[:, :, None, None]

    lf = conv(low, p["w_low"], p["b_low"])
    hf = conv(high, p["w_high"], p["b_high"])
    sum_c = lf + hf
    sub_c = lf - hf
    sum_c = se(sum_c, p["se_sum_w1"], p["se_sum_b1"],
               p["se_sum_w2"], p["se_sum_b2"]) + sum_c
    sub_c = se(sub_c, p["se_sub_w1"], p["se_sub_b1"],
               p["se_sub_w2"], p["se_sub_b2"]) + sub_c
    return p["alpha"] * sum_c + p["beta"] * sub_c


if __name__ == "__main__":
    N, C, H, W = 2, 4, 16, 16
    key = jax.random.PRNGKey(0)
    keys = jax.random.split(key, 16)

    params = {
        "w_low": 0.1 * jax.random.normal(keys[0], (C, C, 3, 3), jnp.float32),
        "b_low": 0.1 * jax.random.normal(keys[1], (C,), jnp.float32),
        "w_high": 0.1 * jax.random.normal(keys[2], (C, C, 3, 3), jnp.float32),
        "b_high": 0.1 * jax.random.normal(keys[3], (C,), jnp.float32),
        "se_sum_w1": 0.1 * jax.random.normal(keys[4], (C, C, 1, 1), jnp.float32),
        "se_sum_b1": 0.1 * jax.random.normal(keys[5], (C,), jnp.float32),
        "se_sum_w2": 0.1 * jax.random.normal(keys[6], (C, C, 1, 1), jnp.float32),
        "se_sum_b2": 0.1 * jax.random.normal(keys[7], (C,), jnp.float32),
        "se_sub_w1": 0.1 * jax.random.normal(keys[8], (C, C, 1, 1), jnp.float32),
        "se_sub_b1": 0.1 * jax.random.normal(keys[9], (C,), jnp.float32),
        "se_sub_w2": 0.1 * jax.random.normal(keys[10], (C, C, 1, 1), jnp.float32),
        "se_sub_b2": 0.1 * jax.random.normal(keys[11], (C,), jnp.float32),
        "alpha": jnp.float32(0.5),
        "beta": jnp.float32(0.5),
    }

    low = jax.random.normal(keys[12], (N, C, H, W), jnp.float32)
    high = jax.random.normal(keys[13], (N, C, H, W), jnp.float32)

    out = laplacian_fusion(low, high, params)
    out = jax.block_until_ready(out)

    ref = _reference(low, high, params)
    np.testing.assert_allclose(np.asarray(out), np.asarray(ref),
                               rtol=1e-4, atol=1e-4)
    print("KERNEL_OK")
</pallas_src>

<mosaic_0001>
module attributes {stable_mosaic.version = 11 : i64} {
  func.func @_laplacian_fusion_kernel(%arg0: i32, %arg1: memref<1x18x18x8xf32, #tpu.memory_space<vmem>>, %arg2: memref<1152x8xf32, #tpu.memory_space<vmem>>, %arg3: memref<1x8xf32, #tpu.memory_space<vmem>>, %arg4: memref<8x8xf32, #tpu.memory_space<vmem>>, %arg5: memref<1x8xf32, #tpu.memory_space<vmem>>, %arg6: memref<8x8xf32, #tpu.memory_space<vmem>>, %arg7: memref<1x8xf32, #tpu.memory_space<vmem>>, %arg8: memref<1x8xf32, #tpu.memory_space<vmem>>, %arg9: memref<1x256x4xf32, #tpu.memory_space<vmem>>, %arg10: memref<256x1152xf32, #tpu.memory_space<vmem>>) attributes {dimension_semantics = [#tpu.dimension_semantics<parallel>], iteration_bounds = array<i64: 2>, scalar_prefetch = 0 : i64, scratch_operands = 1 : i64, tpu.core_type = #tpu.core_type<tc>, window_params = [{transform_indices = @transform_0, window_bounds = array<i64: 1, 18, 18, 8>}, {pipeline_mode = #tpu.pipeline_mode<synchronous>, transform_indices = @transform_1, window_bounds = array<i64: 1152, 8>}, {pipeline_mode = #tpu.pipeline_mode<synchronous>, transform_indices = @transform_2, window_bounds = array<i64: 1, 8>}, {pipeline_mode = #tpu.pipeline_mode<synchronous>, transform_indices = @transform_3, window_bounds = array<i64: 8, 8>}, {pipeline_mode = #tpu.pipeline_mode<synchronous>, transform_indices = @transform_4, window_bounds = array<i64: 1, 8>}, {pipeline_mode = #tpu.pipeline_mode<synchronous>, transform_indices = @transform_5, window_bounds = array<i64: 8, 8>}, {pipeline_mode = #tpu.pipeline_mode<synchronous>, transform_indices = @transform_6, window_bounds = array<i64: 1, 8>}, {pipeline_mode = #tpu.pipeline_mode<synchronous>, transform_indices = @transform_7, window_bounds = array<i64: 1, 8>}, {transform_indices = @transform_8, window_bounds = array<i64: 1, 256, 4>}]} {
    %cst = arith.constant 0.000000e+00 : f32
    %0 = vector.broadcast %cst : f32 to vector<256x1152xf32>
    %c0 = arith.constant 0 : index
    %c0_0 = arith.constant 0 : index
    %1 = vector.load %arg10[%c0, %c0_0] : memref<256x1152xf32, #tpu.memory_space<vmem>>, vector<256x1152xf32>
    tpu.vector_store %arg10[%c0, %c0_0], %0 {strides = array<i32>} : memref<256x1152xf32, #tpu.memory_space<vmem>>, vector<256x1152xf32>,
    %c0_1 = arith.constant 0 : index
    %c0_2 = arith.constant 0 : index
    %c0_3 = arith.constant 0 : index
    %c0_4 = arith.constant 0 : index
    %2 = vector.load %arg1[%c0_1, %c0_2, %c0_3, %c0_4] : memref<1x18x18x8xf32, #tpu.memory_space<vmem>>, vector<1x18x18x8xf32>
    %3 = vector.shape_cast %2 : vector<1x18x18x8xf32> to vector<18x18x8xf32>
    %4 = vector.extract_strided_slice %3 {offsets = [0, 0, 0], sizes = [16, 16, 8], strides = [1, 1, 1]} : vector<18x18x8xf32> to vector<16x16x8xf32>
    %5 = vector.shape_cast %4 : vector<16x16x8xf32> to vector<256x8xf32>
    %c0_5 = arith.constant 0 : index
    %c0_6 = arith.constant 0 : index
    %6 = vector.load %arg10[%c0_5, %c0_6] : memref<256x1152xf32, #tpu.memory_space<vmem>>, vector<256x8xf32>
    tpu.vector_store %arg10[%c0_5, %c0_6], %5 {strides = array<i32>} : memref<256x1152xf32, #tpu.memory_space<vmem>>, vector<256x8xf32>,
    %7 = vector.extract_strided_slice %3 {offsets = [0, 1, 0], sizes = [16, 16, 8], strides = [1, 1, 1]} : vector<18x18x8xf32> to vector<16x16x8xf32>
    %8 = vector.shape_cast %7 : vector<16x16x8xf32> to vector<256x8xf32>
    %c0_7 = arith.constant 0 : index
    %c128 = arith.constant 128 : index
    %9 = vector.load %arg10[%c0_7, %c128] : memref<256x1152xf32, #tpu.memory_space<vmem>>, vector<256x8xf32>
    tpu.vector_store %arg10[%c0_7, %c128], %8 {strides = array<i32>} : memref<256x1152xf32, #tpu.memory_space<vmem>>, vector<256x8xf32>,
    %10 = vector.extract_strided_slice %3 {offsets = [0, 2, 0], sizes = [16, 16, 8], strides = [1, 1, 1]} : vector<18x18x8xf32> to vector<16x16x8xf32>
    %11 = vector.shape_cast %10 : vector<16x16x8xf32> to vector<256x8xf32>
    %c0_8 = arith.constant 0 : index
    %c256 = arith.constant 256 : index
    %12 = vector.load %arg10[%c0_8, %c256] : memref<256x1152xf32, #tpu.memory_space<vmem>>, vector<256x8xf32>
    tpu.vector_store %arg10[%c0_8, %c256], %11 {strides = array<i32>} : memref<256x1152xf32, #tpu.memory_space<vmem>>, vector<256x8xf32>,
    %13 = vector.extract_strided_slice %3 {offsets = [1, 0, 0], sizes = [16, 16, 8], strides = [1, 1, 1]} : vector<18x18x8xf32> to vector<16x16x8xf32>
    %14 = vector.shape_cast %13 : vector<16x16x8xf32> to vector<256x8xf32>
    %c0_9 = arith.constant 0 : index
    %c384 = arith.constant 384 : index
    %15 = vector.load %arg10[%c0_9, %c384] : memref<256x1152xf32, #tpu.memory_space<vmem>>, vector<256x8xf32>
    tpu.vector_store %arg10[%c0_9, %c384], %14 {strides = array<i32>} : memref<256x1152xf32, #tpu.memory_space<vmem>>, vector<256x8xf32>,
    %16 = vector.extract_strided_slice %3 {offsets = [1, 1, 0], sizes = [16, 16, 8], strides = [1, 1, 1]} : vector<18x18x8xf32> to vector<16x16x8xf32>
    %17 = vector.shape_cast %16 : vector<16x16x8xf32> to vector<256x8xf32>
    %c0_10 = arith.constant 0 : index
    %c512 = arith.constant 512 : index
    %18 = vector.load %arg10[%c0_10, %c512] : memref<256x1152xf32, #tpu.memory_space<vmem>>, vector<256x8xf32>
    tpu.vector_store %arg10[%c0_10, %c512], %17 {strides = array<i32>} : memref<256x1152xf32, #tpu.memory_space<vmem>>, vector<256x8xf32>,
    %19 = vector.extract_strided_slice %3 {offsets = [1, 2, 0], sizes = [16, 16, 8], strides = [1, 1, 1]} : vector<18x18x8xf32> to vector<16x16x8xf32>
    %20 = vector.shape_cast %19 : vector<16x16x8xf32> to vector<256x8xf32>
    %c0_11 = arith.constant 0 : index
    %c640 = arith.constant 640 : index
    %21 = vector.load %arg10[%c0_11, %c640] : memref<256x1152xf32, #tpu.memory_space<vmem>>, vector<256x8xf32>
    tpu.vector_store %arg10[%c0_11, %c640], %20 {strides = array<i32>} : memref<256x1152xf32, #tpu.memory_space<vmem>>, vector<256x8xf32>,
    %22 = vector.extract_strided_slice %3 {offsets = [2, 0, 0], sizes = [16, 16, 8], strides = [1, 1, 1]} : vector<18x18x8xf32> to vector<16x16x8xf32>
    %23 = vector.shape_cast %22 : vector<16x16x8xf32> to vector<256x8xf32>
    %c0_12 = arith.constant 0 : index
    %c768 = arith.constant 768 : index
    %24 = vector.load %arg10[%c0_12, %c768] : memref<256x1152xf32, #tpu.memory_space<vmem>>, vector<256x8xf32>
    tpu.vector_store %arg10[%c0_12, %c768], %23 {strides = array<i32>} : memref<256x1152xf32, #tpu.memory_space<vmem>>, vector<256x8xf32>,
    %25 = vector.extract_strided_slice %3 {offsets = [2, 1, 0], sizes = [16, 16, 8], strides = [1, 1, 1]} : vector<18x18x8xf32> to vector<16x16x8xf32>
    %26 = vector.shape_cast %25 : vector<16x16x8xf32> to vector<256x8xf32>
    %c0_13 = arith.constant 0 : index
    %c896 = arith.constant 896 : index
    %27 = vector.load %arg10[%c0_13, %c896] : memref<256x1152xf32, #tpu.memory_space<vmem>>, vector<256x8xf32>
    tpu.vector_store %arg10[%c0_13, %c896], %26 {strides = array<i32>} : memref<256x1152xf32, #tpu.memory_space<vmem>>, vector<256x8xf32>,
    %28 = vector.extract_strided_slice %3 {offsets = [2, 2, 0], sizes = [16, 16, 8], strides = [1, 1, 1]} : vector<18x18x8xf32> to vector<16x16x8xf32>
    %29 = vector.shape_cast %28 : vector<16x16x8xf32> to vector<256x8xf32>
    %c0_14 = arith.constant 0 : index
    %c1024 = arith.constant 1024 : index
    %30 = vector.load %arg10[%c0_14, %c1024] : memref<256x1152xf32, #tpu.memory_space<vmem>>, vector<256x8xf32>
    tpu.vector_store %arg10[%c0_14, %c1024], %29 {strides = array<i32>} : memref<256x1152xf32, #tpu.memory_space<vmem>>, vector<256x8xf32>,
    %c0_15 = arith.constant 0 : index
    %c0_16 = arith.constant 0 : index
    %31 = vector.load %arg10[%c0_15, %c0_16] : memref<256x1152xf32, #tpu.memory_space<vmem>>, vector<256x1152xf32>
    %c0_17 = arith.constant 0 : index
    %c0_18 = arith.constant 0 : index
    %32 = vector.load %arg2[%c0_17, %c0_18] : memref<1152x8xf32, #tpu.memory_space<vmem>>, vector<1152x8xf32>
    %cst_19 = arith.constant dense<0.000000e+00> : vector<256x8xf32>
    %33 = tpu.matmul %31, %32, %cst_19 {dimension_numbers = #tpu.dot_dimension_numbers<[1], [0], [0], [1], [0, 0, 1, 1], [], []>} : vector<256x1152xf32>, vector<1152x8xf32>, vector<256x8xf32> -> vector<256x8xf32>
    %c0_20 = arith.constant 0 : index
    %c0_21 = arith.constant 0 : index
    %34 = vector.load %arg3[%c0_20, %c0_21] : memref<1x8xf32, #tpu.memory_space<vmem>>, vector<1x8xf32>
    %35 = vector.broadcast %34 : vector<1x8xf32> to vector<256x8xf32>
    %36 = arith.addf %33, %35 : vector<256x8xf32>
    %cst_22 = arith.constant dense<0.000000e+00> : vector<8xf32>
    %37 = vector.multi_reduction <add>, %36, %cst_22 [0] : vector<256x8xf32> to vector<8xf32>
    %38 = vector.shape_cast %37 : vector<8xf32> to vector<1x8xf32>
    %cst_23 = arith.constant 2.560000e+02 : f32
    %39 = vector.broadcast %cst_23 : f32 to vector<1x8xf32>
    %40 = arith.divf %38, %39 : vector<1x8xf32>
    %c0_24 = arith.constant 0 : index
    %c0_25 = arith.constant 0 : index
    %41 = vector.load %arg4[%c0_24, %c0_25] : memref<8x8xf32, #tpu.memory_space<vmem>>, vector<8x8xf32>
    %cst_26 = arith.constant dense<0.000000e+00> : vector<1x8xf32>
    %42 = tpu.matmul %40, %41, %cst_26 {dimension_numbers = #tpu.dot_dimension_numbers<[1], [0], [0], [1], [0, 0, 1, 1], [], []>} : vector<1x8xf32>, vector<8x8xf32>, vector<1x8xf32> -> vector<1x8xf32>
    %c0_27 = arith.constant 0 : index
    %c0_28 = arith.constant 0 : index
    %43 = vector.load %arg5[%c0_27, %c0_28] : memref<1x8xf32, #tpu.memory_space<vmem>>, vector<1x8xf32>
    %44 = arith.addf %42, %43 : vector<1x8xf32>
    %cst_29 = arith.constant 0.000000e+00 : f32
    %45 = vector.broadcast %cst_29 : f32 to vector<1x8xf32>
    %46 = arith.maximumf %44, %45 : vector<1x8xf32>
    %c0_30 = arith.constant 0 : index
    %c0_31 = arith.constant 0 : index
    %47 = vector.load %arg6[%c0_30, %c0_31] : memref<8x8xf32, #tpu.memory_space<vmem>>, vector<8x8xf32>
    %cst_32 = arith.constant dense<0.000000e+00> : vector<1x8xf32>
    %48 = tpu.matmul %46, %47, %cst_32 {dimension_numbers = #tpu.dot_dimension_numbers<[1], [0], [0], [1], [0, 0, 1, 1], [], []>} : vector<1x8xf32>, vector<8x8xf32>, vector<1x8xf32> -> vector<1x8xf32>
    %c0_33 = arith.constant 0 : index
    %c0_34 = arith.constant 0 : index
    %49 = vector.load %arg7[%c0_33, %c0_34] : memref<1x8xf32, #tpu.memory_space<vmem>>, vector<1x8xf32>
    %50 = arith.addf %48, %49 : vector<1x8xf32>
    %c0_35 = arith.constant 0 : index
    %c0_36 = arith.constant 0 : index
    %51 = vector.load %arg8[%c0_35, %c0_36] : memref<1x8xf32, #tpu.memory_space<vmem>>, vector<1x8xf32>
    %52 = arith.negf %50 : vector<1x8xf32>
    %53 = math.exp %52 : vector<1x8xf32>
    %cst_37 = arith.constant 1.000000e+00 : f32
    %54 = vector.broadcast %cst_37 : f32 to vector<1x8xf32>
    %55 = arith.addf %54, %53 : vector<1x8xf32>
    %56 = arith.divf %54, %55 : vector<1x8xf32>
    %cst_38 = arith.constant 1.000000e+00 : f32
    %57 = vector.broadcast %cst_38 : f32 to vector<1x8xf32>
    %58 = arith.addf %57, %56 : vector<1x8xf32>
    %59 = arith.mulf %51, %58 : vector<1x8xf32>
    %60 = vector.broadcast %59 : vector<1x8xf32> to vector<256x8xf32>
    %61 = arith.mulf %36, %60 : vector<256x8xf32>
    %62 = vector.extract_strided_slice %61 {offsets = [0, 0], sizes = [256, 4], strides = [1, 1]} : vector<256x8xf32> to vector<256x4xf32>
    %63 = vector.extract_strided_slice %61 {offsets = [0, 4], sizes = [256, 4], strides = [1, 1]} : vector<256x8xf32> to vector<256x4xf32>
    %64 = arith.addf %62, %63 : vector<256x4xf32>
    %c0_39 = arith.constant 0 : index
    %c0_40 = arith.constant 0 : index
    %c0_41 = arith.constant 0 : index
    %65 = vector.load %arg9[%c0_39, %c0_40, %c0_41] : memref<1x256x4xf32, #tpu.memory_space<vmem>>, vector<1x256x4xf32>
    %66 = vector.shape_cast %65 : vector<1x256x4xf32> to vector<256x4xf32>
    %67 = vector.shape_cast %64 : vector<256x4xf32> to vector<1x256x4xf32>
    tpu.vector_store %arg9[%c0_39, %c0_40, %c0_41], %67 {strides = array<i32>} : memref<1x256x4xf32, #tpu.memory_space<vmem>>, vector<1x256x4xf32>,
    return
  }
  func.func @transform_0(%arg0: i32) -> (i32, i32, i32, i32) {
    %c0_i32 = arith.constant 0 : i32
    %c0_i32_0 = arith.constant 0 : i32
    %c0_i32_1 = arith.constant 0 : i32
    %c0_i32_2 = arith.constant 0 : i32
    return %arg0, %c0_i32, %c0_i32_0, %c0_i32_1 : i32, i32, i32, i32
  }
  func.func @transform_1(%arg0: i32) -> (i32, i32) {
    %c0_i32 = arith.constant 0 : i32
    %c0_i32_0 = arith.constant 0 : i32
    %c0_i32_1 = arith.constant 0 : i32
    return %c0_i32, %c0_i32_0 : i32, i32
  }
  func.func @transform_2(%arg0: i32) -> (i32, i32) {
    %c0_i32 = arith.constant 0 : i32
    %c0_i32_0 = arith.constant 0 : i32
    %c0_i32_1 = arith.constant 0 : i32
    return %c0_i32, %c0_i32_0 : i32, i32
  }
  func.func @transform_3(%arg0: i32) -> (i32, i32) {
    %c0_i32 = arith.constant 0 : i32
    %c0_i32_0 = arith.constant 0 : i32
    %c0_i32_1 = arith.constant 0 : i32
    return %c0_i32, %c0_i32_0 : i32, i32
  }
  func.func @transform_4(%arg0: i32) -> (i32, i32) {
    %c0_i32 = arith.constant 0 : i32
    %c0_i32_0 = arith.constant 0 : i32
    %c0_i32_1 = arith.constant 0 : i32
    return %c0_i32, %c0_i32_0 : i32, i32
  }
  func.func @transform_5(%arg0: i32) -> (i32, i32) {
    %c0_i32 = arith.constant 0 : i32
    %c0_i32_0 = arith.constant 0 : i32
    %c0_i32_1 = arith.constant 0 : i32
    return %c0_i32, %c0_i32_0 : i32, i32
  }
  func.func @transform_6(%arg0: i32) -> (i32, i32) {
    %c0_i32 = arith.constant 0 : i32
    %c0_i32_0 = arith.constant 0 : i32
    %c0_i32_1 = arith.constant 0 : i32
    return %c0_i32, %c0_i32_0 : i32, i32
  }
  func.func @transform_7(%arg0: i32) -> (i32, i32) {
    %c0_i32 = arith.constant 0 : i32
    %c0_i32_0 = arith.constant 0 : i32
    %c0_i32_1 = arith.constant 0 : i32
    return %c0_i32, %c0_i32_0 : i32, i32
  }
  func.func @transform_8(%arg0: i32) -> (i32, i32, i32) {
    %c0_i32 = arith.constant 0 : i32
    %c0_i32_0 = arith.constant 0 : i32
    %c0_i32_1 = arith.constant 0 : i32
    return %arg0, %c0_i32, %c0_i32_0 : i32, i32, i32
  }
}

</mosaic_0001>

<bundles_post_ra>
// kernel: tpu_custom_call.1
= control target key start
LH: loop header
LB: loop body
LE: loop exit
PB: predicated region body
PF: predicated region fallthrough
CT: control target
= control target key end

     0   :  { %s3982_s27 = smov 0   ;;  %s6413_s0 = inlined_call_operand.vmem [shape: f32[2,18,18,8], index: 0, kind: input, shape index: {}]   ;;  %s6414_s1 = inlined_call_operand.vmem [shape: f32[1152,8], index: 1, kind: input, shape index: {}]   ;;  %s6415_s2 = inlined_call_operand.vmem [shape: f32[1,8], index: 2, kind: input, shape index: {}]   ;;  %s6416_s3 = inlined_call_operand.vmem [shape: f32[8,8], index: 3, kind: input, shape index: {}]   ;;  %s6417_s4 = inlined_call_operand.vmem [shape: f32[1,8], index: 4, kind: input, shape index: {}]   ;;  %s6418_s5 = inlined_call_operand.vmem [shape: f32[8,8], index: 5, kind: input, shape index: {}]   ;;  %s6419_s6 = inlined_call_operand.vmem [shape: f32[1,8], index: 6, kind: input, shape index: {}]   ;;  %s6420_s7 = inlined_call_operand.vmem [shape: f32[1,8], index: 7, kind: input, shape index: {}]   ;;  %s6421_s8 = inlined_call_operand.vmem [shape: f32[2,256,4], index: 8, kind: output, shape index: {}]  }
   0x1 LB: > { %s3326_s28 = sadd.s32 4294967295, %s3931_s27   ;;  %p3330_p0 = scmp.ge.s32.totalorder %s3931_s27, 1  ;;  %s3931_s27 = sphi %s3982_s27, %s18_s27  }
   0x2   : > { %p262_p1 = scmp.lt.s32.totalorder %s3931_s27, 3 }
   0x4   : > { %p263_p2 = pnand %p3330_p0, %p262_p1 }
   0x5   : > { %v3993_v0 = vld [vmem:[%s6414_s1] sm:$0xff] (!%p263_p2)  ;;  %v3998_v1 = vld [vmem:[%s6414_s1 + $0x8] sm:$0xff] (!%p263_p2)  ;;  %v3933_v3 = vmov (!%p263_p2), 0.0|0.0   ;;  %v4017_v6 = vld [vmem:[%s6414_s1 + $0x10] sm:$0xff] (!%p263_p2)  ;;  %v3934_v8 = vmov (!%p263_p2), 0.0   ;;  %p296_p3 = scmp.lt.s32.totalorder (!%p263_p2), %s3326_s28, 1 }
   0x6   : > { %266 = sbr.rel (%p263_p2) target bundleno = 1442 (0x5a2), region = 52  ;;  %v4003_v2 = vld [vmem:[%s6414_s1 + $0x100] sm:$0xff] (!%p263_p2)  ;;  %3483 = vmatprep.subr.bf16.mxu1 (!%p263_p2), %v3933_v3  ;;  %3531 = vmatprep.subr.bf16.mxu0 (!%p263_p2), %v3933_v3  ;;  %v3484_v4 = vpack.c.bf16 (!%p263_p2), %v3998_v1, %v3993_v0  ;;  %v4012_v5 = vld [vmem:[%s6414_s1 + $0x108] sm:$0xff] (!%p263_p2)  ;;  %v4022_v7 = vld [vmem:[%s6414_s1 + $0x18] sm:$0xff] (!%p263_p2)  ;;  %307 = vst [vmem:[#allocation2 + $0x8] sm:$0xff] (!%p263_p2), %v3934_v8  ;;  %vm648_vm0 = vcmask (!%p263_p2), 64512  }
   0x7   : > { %306 = vst [vmem:[#allocation2] sm:$0xff] (!%p263_p2), %v3934_v8  ;;  %308 = vst [vmem:[#allocation2 + $0x10] sm:$0xff] (!%p263_p2), %v3934_v8  ;;  %v3532_v9 = vpack.c.bf16 (!%p263_p2), %v4012_v5, %v4003_v2  ;;  %v1567_v10 = vld [vmem:[%s6414_s1 + $0x110] sm:$0xff] (!%p263_p2)  ;;  %v1568_v11 = vld [vmem:[%s6414_s1 + $0x118] sm:$0xff] (!%p263_p2)  ;;  %v3487_v12 = vpack.c.bf16 (!%p263_p2), %v4022_v7, %v4017_v6  ;;  %vm729_vm1 = vcmask (!%p263_p2), 1046528   ;;  %vm874_vm2 = vcmask (!%p263_p2), 1045504  }
   0x8   : > { %309 = vst [vmem:[#allocation2 + $0x18] sm:$0xff] (!%p263_p2), %v3934_v8  ;;  %310 = vst [vmem:[#allocation2 + $0x20] sm:$0xff] (!%p263_p2), %v3934_v8  ;;  %3485 = vmatpush1.bf16.msra.mxu1 (!%p263_p2), %v3484_v4  ;;  %v3535_v13 = vpack.c.bf16 (!%p263_p2), %v1568_v11, %v1567_v10  ;;  %v1537_v14 = vld [vmem:[%s6414_s1 + $0x20] sm:$0xff] (!%p263_p2)  ;;  %v1538_v15 = vld [vmem:[%s6414_s1 + $0x28] sm:$0xff] (!%p263_p2)  ;;  %vm3935_vm3 = vmmov (!%p263_p2), 0   ;;  %vm3238_vm4 = vcmask (!%p263_p2), 31744  }
   0x9   : > { %311 = vst [vmem:[#allocation2 + $0x28] sm:$0xff] (!%p263_p2), %v3934_v8  ;;  %312 = vst [vmem:[#allocation2 + $0x30] sm:$0xff] (!%p263_p2), %v3934_v8  ;;  %3533 = vmatpush1.bf16.msra.mxu0 (!%p263_p2), %v3532_v9  ;;  %3486 = vmatprep.subr.bf16.mxu1 (!%p263_p2), %v3933_v3  ;;  %v1569_v16 = vld [vmem:[%s6414_s1 + $0x120] sm:$0xff] (!%p263_p2)  ;;  %v1570_v17 = vld [vmem:[%s6414_s1 + $0x128] sm:$0xff] (!%p263_p2)  ;;  %v3490_v18 = vpack.c.bf16 (!%p263_p2), %v1538_v15, %v1537_v14 }
   0xa   : > { %313 = vst [vmem:[#allocation2 + $0x38] sm:$0xff] (!%p263_p2), %v3934_v8  ;;  %314 = vst [vmem:[#allocation2 + $0x40] sm:$0xff] (!%p263_p2), %v3934_v8  ;;  %3534 = vmatprep.subr.bf16.mxu0 (!%p263_p2), %v3933_v3  ;;  %v3538_v19 = vpack.c.bf16 (!%p263_p2), %v1570_v17, %v1569_v16  ;;  %v1539_v20 = vld [vmem:[%s6414_s1 + $0x30] sm:$0xff] (!%p263_p2)  ;;  %v1540_v21 = vld [vmem:[%s6414_s1 + $0x38] sm:$0xff] (!%p263_p2) }
   0xb   : > { %315 = vst [vmem:[#allocation2 + $0x48] sm:$0xff] (!%p263_p2), %v3934_v8  ;;  %316 = vst [vmem:[#allocation2 + $0x50] sm:$0xff] (!%p263_p2), %v3934_v8  ;;  %v1571_v22 = vld [vmem:[%s6414_s1 + $0x130] sm:$0xff] (!%p263_p2)  ;;  %v1572_v23 = vld [vmem:[%s6414_s1 + $0x138] sm:$0xff] (!%p263_p2)  ;;  %v3493_v24 = vpack.c.bf16 (!%p263_p2), %v1540_v21, %v1539_v20 }
   0xc   : > { %317 = vst [vmem:[#allocation2 + $0x58] sm:$0xff] (!%p263_p2), %v3934_v8  ;;  %318 = vst [vmem:[#allocation2 + $0x60] sm:$0xff] (!%p263_p2), %v3934_v8  ;;  %3488 = vmatpush1.bf16.msra.mxu1 (!%p263_p2), %v3487_v12  ;;  %v3541_v25 = vpack.c.bf16 (!%p263_p2), %v1572_v23, %v1571_v22  ;;  %v1541_v26 = vld [vmem:[%s6414_s1 + $0x40] sm:$0xff] (!%p263_p2)  ;;  %v1542_v27 = vld [vmem:[%s6414_s1 + $0x48] sm:$0xff] (!%p263_p2) }
   0xd   : > { %319 = vst [vmem:[#allocation2 + $0x68] sm:$0xff] %v3934_v8  ;;  %320 = vst [vmem:[#allocation2 + $0x70] sm:$0xff] %v3934_v8  ;;  %3536 = vmatpush1.bf16.msra.mxu0 %v3535_v13  ;;  %3489 = vmatprep.subr.bf16.mxu1 %v3933_v3  ;;  %s6423_s28 = smov (!%p296_p3, %s3326_s28), 1  ;;  %v1573_v28 = vld [vmem:[%s6414_s1 + $0x140] sm:$0xff]  ;;  %v1574_v29 = vld [vmem:[%s6414_s1 + $0x148] sm:$0xff]  ;;  %v3496_v30 = vpack.c.bf16 %v1542_v27, %v1541_v26 }
   0xe   : > { %321 = vst [vmem:[#allocation2 + $0x78] sm:$0xff] %v3934_v8  ;;  %322 = vst [vmem:[#allocation2 + $0x80] sm:$0xff] %v3934_v8  ;;  %3537 = vmatprep.subr.bf16.mxu0 %v3933_v3  ;;  %s3908_s29 = smul.u32 432, %s6423_s28  ;;  %v3544_v31 = vpack.c.bf16 %v1574_v29, %v1573_v28  ;;  %v1543_v32 = vld [vmem:[%s6414_s1 + $0x50] sm:$0xff]  ;;  %v1544_v33 = vld [vmem:[%s6414_s1 + $0x58] sm:$0xff]  ;;  %s3340_s21 = sshll.u32 %s6423_s28, 8 }
   0xf   : > { %323 = vst [vmem:[#allocation2 + $0x88] sm:$0xff] %v3934_v8  ;;  %324 = vst [vmem:[#allocation2 + $0x90] sm:$0xff] %v3934_v8  ;;  %v1575_v34 = vld [vmem:[%s6414_s1 + $0x150] sm:$0xff]  ;;  %v1576_v35 = vld [vmem:[%s6414_s1 + $0x158] sm:$0xff]  ;;  %v3499_v38 = vpack.c.bf16 %v1544_v33, %v1543_v32  ;;  %s6312_s25 = scalar_lea.vmem %s6421_s8, %s3340_s21 }
  0x10   : > { %325 = vst [vmem:[#allocation2 + $0x98] sm:$0xff] %v3934_v8  ;;  %326 = vst [vmem:[#allocation2 + $0xa0] sm:$0xff] %v3934_v8  ;;  %3491 = vmatpush1.bf16.msra.mxu1 %v3490_v18  ;;  %v4391_v36 = vld [vmem:[%s6414_s1 + $0x60] sm:$0xff]  ;;  %v4396_v37 = vld [vmem:[%s6414_s1 + $0x68] sm:$0xff]  ;;  %s4401_s22 = scalar_lea.vmem %s6413_s0, %s3908_s29  ;;  %v3547_v41 = vpack.c.bf16 %v1576_v35, %v1575_v34 }
  0x11   : > { %327 = vst [vmem:[#allocation2 + $0xa8] sm:$0xff] %v3934_v8  ;;  %328 = vst [vmem:[#allocation2 + $0xb0] sm:$0xff] %v3934_v8  ;;  %3539 = vmatpush1.bf16.msra.mxu0 %v3538_v19  ;;  %3492 = vmatprep.subr.bf16.mxu1 %v3933_v3  ;;  %v4406_v39 = vld [vmem:[%s6414_s1 + $0x160] sm:$0xff]  ;;  %v4411_v40 = vld [vmem:[%s6414_s1 + $0x168] sm:$0xff]  ;;  %v3502_v44 = vpack.c.bf16 %v4396_v37, %v4391_v36 }
  0x12   : > { %329 = vst [vmem:[#allocation2 + $0xb8] sm:$0xff] %v3934_v8  ;;  %330 = vst [vmem:[#allocation2 + $0xc0] sm:$0xff] %v3934_v8  ;;  %3540 = vmatprep.subr.bf16.mxu0 %v3933_v3  ;;  %v4417_v42 = vld [vmem:[%s6414_s1 + $0x70] sm:$0xff]  ;;  %v4422_v43 = vld [vmem:[%s6414_s1 + $0x78] sm:$0xff]  ;;  %v3550_v47 = vpack.c.bf16 %v4411_v40, %v4406_v39 }
  0x13   : > { %331 = vst [vmem:[#allocation2 + $0xc8] sm:$0xff] %v3934_v8  ;;  %332 = vst [vmem:[#allocation2 + $0xd0] sm:$0xff] %v3934_v8  ;;  %v594_v45 = vld [vmem:[%s4401_s22] sm:$0xff]  ;;  %v595_v46 = vld [vmem:[%s4401_s22 + $0x8] sm:$0xff]  ;;  %v3505_v54 = vpack.c.bf16 %v4422_v43, %v4417_v42 }
  0x14   : > { %333 = vst [vmem:[#allocation2 + $0xd8] sm:$0xff] %v3934_v8  ;;  %334 = vst [vmem:[#allocation2 + $0xe0] sm:$0xff] %v3934_v8  ;;  %3494 = vmatpush1.bf16.msra.mxu1 %v3493_v24  ;;  %v4434_v48 = vld [vmem:[%s6414_s1 + $0x170] sm:$0xff]  ;;  %v4439_v49 = vld [vmem:[%s6414_s1 + $0x178] sm:$0xff]  ;;  %v730_v50 = vrot.slane %v594_v45, 1  ;;  %v731_v51 = vrot.slane %v595_v46, 1 }
  0x15   : > { %335 = vst [vmem:[#allocation2 + $0xe8] sm:$0xff] %v3934_v8  ;;  %336 = vst [vmem:[#allocation2 + $0xf0] sm:$0xff] %v3934_v8  ;;  %3542 = vmatpush1.bf16.msra.mxu0 %v3541_v25  ;;  %3495 = vmatprep.subr.bf16.mxu1 %v3933_v3  ;;  %v597_v52 = vld [vmem:[%s4401_s22 + $0x18] sm:$0xff]  ;;  %v875_v53 = vrot.slane %v594_v45, 2  ;;  %v876_v57 = vrot.slane %v595_v46, 2  ;;  %v4450_v59 = vld [vmem:[%s4401_s22 + $0x20] sm:$0xff]  ;;  %v3553_v4 = vpack.c.bf16 %v4439_v49, %v4434_v48 }
  0x16   : > { %337 = vst [vmem:[#allocation2 + $0xf8] sm:$0xff] %v3934_v8  ;;  %338 = vst [vmem:[#allocation2 + $0x100] sm:$0xff] %v3934_v8  ;;  %3543 = vmatprep.subr.bf16.mxu0 %v3933_v3  ;;  %v735_v55 = vrot.slane %v597_v52, 1  ;;  %v880_v56 = vrot.slane %v597_v52, 2  ;;  %v596_v58 = vld [vmem:[%s4401_s22 + $0x10] sm:$0x3]  ;;  %v732_v62 = vsel %vm729_vm1, %v730_v50, %v731_v51 }
  0x17   : > { %339 = vst [vmem:[#allocation2 + $0x108] sm:$0xff] %v3934_v8  ;;  %340 = vst [vmem:[#allocation2 + $0x110] sm:$0xff] %v3934_v8  ;;  %v4456_v60 = vld [vmem:[%s6414_s1 + $0x80] sm:$0xff]  ;;  %v4461_v61 = vld [vmem:[%s6414_s1 + $0x88] sm:$0xff]  ;;  %v733_v63 = vrot.slane %v596_v58, 1  ;;  %v878_v0 = vrot.slane %v596_v58, 2  ;;  %v877_v5 = vsel %vm874_vm2, %v875_v53, %v876_v57 }
  0x18   : > { %341 = vst [vmem:[#allocation2 + $0x118] sm:$0xff] %v3934_v8  ;;  %342 = vst [vmem:[#allocation2 + $0x120] sm:$0xff] %v3934_v8  ;;  %3497 = vmatpush1.bf16.msra.mxu1 %v3496_v30  ;;  %v736_v1 = vrot.slane %v4450_v59, 1  ;;  %v4470_v2 = vld [vmem:[%s4401_s22 + $0x30] sm:$0xff]  ;;  %v881_v6 = vrot.slane %v4450_v59, 2  ;;  %v4486_v9 = vld [vmem:[%s4401_s22 + $0x38] sm:$0xff]  ;;  %v3508_v24 = vpack.c.bf16 %v4461_v61, %v4456_v60 }
  0x19   : > { %343 = vst [vmem:[#allocation2 + $0x128] sm:$0xff] %v3934_v8  ;;  %344 = vst [vmem:[#allocation2 + $0x130] sm:$0xff] %v3934_v8  ;;  %3545 = vmatpush1.bf16.msra.mxu0 %v3544_v31  ;;  %3498 = vmatprep.subr.bf16.mxu1 %v3933_v3  ;;  %v599_v7 = vld [vmem:[%s4401_s22 + $0x28] sm:$0x3]  ;;  %v740_v10 = vrot.slane %v4470_v2, 1  ;;  %v734_v12 = vsel %vm729_vm1, %v731_v51, %v733_v63  ;;  %v879_v13 = vsel %vm874_vm2, %v876_v57, %v878_v0  ;;  %v4514_v17 = vld [vmem:[%s6414_s1 + $0x180] sm:$0xff] }
  0x1a   : > { %345 = vst [vmem:[#allocation2 + $0x138] sm:$0xff] %v3934_v8  ;;  %346 = vst [vmem:[#allocation2 + $0x140] sm:$0xff] %v3934_v8  ;;  %3546 = vmatprep.subr.bf16.mxu0 %v3933_v3  ;;  %v4490_v11 = vld [vmem:[%s4401_s22 + $0x48] sm:$0xff]  ;;  %v737_v14 = vsel %vm729_vm1, %v735_v55, %v736_v1  ;;  %v738_v15 = vrot.slane %v599_v7, 1  ;;  %v4509_v16 = vld [vmem:[%s4401_s22 + $0x40] sm:$0x3]  ;;  %v882_v18 = vsel %vm874_vm2, %v880_v56, %v881_v6 }
  0x1b   : > { %347 = vst [vmem:[#allocation2 + $0x148] sm:$0xff] %v3934_v8  ;;  %348 = vst [vmem:[#allocation2 + $0x150] sm:$0xff] %v3934_v8  ;;  %v883_v19 = vrot.slane %v599_v7, 2  ;;  %v741_v20 = vrot.slane %v4486_v9, 1  ;;  %v885_v21 = vrot.slane %v4470_v2, 2  ;;  %v4524_v22 = vld [vmem:[%s4401_s22 + $0x50] sm:$0xff] }
  0x1c   : > { %349 = vst [vmem:[#allocation2 + $0x158] sm:$0xff] %v3934_v8  ;;  %350 = vst [vmem:[#allocation2 + $0x160] sm:$0xff] %v3934_v8  ;;  %3500 = vmatpush1.bf16.msra.mxu1 %v3499_v38  ;;  %v4527_v23 = vld [vmem:[%s4401_s22 + $0x60] sm:$0xff]  ;;  %v4538_v25 = vld [vmem:[%s6414_s1 + $0x188] sm:$0xff]  ;;  %v739_v26 = vsel %vm729_vm1, %v736_v1, %v738_v15  ;;  %v886_v27 = vrot.slane %v4486_v9, 2  ;;  %v743_v28 = vrot.slane %v4509_v16, 1 }
  0x1d   : > { %351 = vst [vmem:[#allocation2 + $0x168] sm:$0xff] %v3934_v8  ;;  %352 = vst [vmem:[#allocation2 + $0x170] sm:$0xff] %v3934_v8  ;;  %3548 = vmatpush1.bf16.msra.mxu0 %v3547_v41  ;;  %3501 = vmatprep.subr.bf16.mxu1 %v3933_v3  ;;  %v4558_v29 = vld [vmem:[%s4401_s22 + $0x58] sm:$0x3]  ;;  %v4561_v30 = vld [vmem:[%s4401_s22 + $0x68] sm:$0xff]  ;;  %v884_v31 = vsel %vm874_vm2, %v881_v6, %v883_v19  ;;  %v742_v32 = vsel %vm729_vm1, %v740_v10, %v741_v20  ;;  %v888_v33 = vrot.slane %v4509_v16, 2 }
  0x1e   : > { %353 = vst [vmem:[#allocation2 + $0x178] sm:$0xff] %v3934_v8  ;;  %354 = vst [vmem:[#allocation2 + $0x180] sm:$0xff] %v3934_v8  ;;  %3549 = vmatprep.subr.bf16.mxu0 %v3933_v3  ;;  %v745_v34 = vrot.slane %v4490_v11, 1  ;;  %v4577_v35 = vld [vmem:[%s4401_s22 + $0x78] sm:$0xff]  ;;  %v887_v37 = vsel %vm874_vm2, %v885_v21, %v886_v27  ;;  %v744_v38 = vsel %vm729_vm1, %v741_v20, %v743_v28  ;;  %v746_v39 = vrot.slane %v4524_v22, 1  ;;  %v1553_v61 = vld [vmem:[%s6414_s1 + $0xa0] sm:$0xff] }
  0x1f   : > { %355 = vst [vmem:[#allocation2 + $0x188] sm:$0xff] %v3934_v8  ;;  %356 = vst [vmem:[#allocation2 + $0x190] sm:$0xff] %v3934_v8  ;;  %v890_v40 = vrot.slane %v4490_v11, 2  ;;  %v3556_v41 = vpack.c.bf16 %v4538_v25, %v4514_v17  ;;  %v891_v42 = vrot.slane %v4524_v22, 2  ;;  %v748_v43 = vrot.slane %v4558_v29, 1  ;;  %v1584_v53 = vld [vmem:[%s6414_s1 + $0x198] sm:$0xff] }
  0x20   : > { %357 = vst [vmem:[#allocation2 + $0x198] sm:$0xff] %v3934_v8  ;;  %358 = vst [vmem:[#allocation2 + $0x1a0] sm:$0xff] %v3934_v8  ;;  %3503 = vmatpush1.bf16.msra.mxu1 %v3502_v44  ;;  %v889_v44 = vsel %vm874_vm2, %v886_v27, %v888_v33  ;;  %v747_v48 = vsel %vm729_vm1, %v745_v34, %v746_v39  ;;  %v893_v49 = vrot.slane %v4558_v29, 2  ;;  %v750_v50 = vrot.slane %v4527_v23, 1  ;;  %v1554_v0 = vld [vmem:[%s6414_s1 + $0xa8] sm:$0xff]  ;;  %v1585_v1 = vld [vmem:[%s6414_s1 + $0x1a0] sm:$0xff] }
  0x21   : > { %359 = vst [vmem:[#allocation2 + $0x1a8] sm:$0xff] %v3934_v8  ;;  %360 = vst [vmem:[#allocation2 + $0x1b0] sm:$0xff] %v3934_v8  ;;  %3551 = vmatpush1.bf16.msra.mxu0 %v3550_v47  ;;  %3504 = vmatprep.subr.bf16.mxu1 %v3933_v3  ;;  %v751_v51 = vrot.slane %v4561_v30, 1  ;;  %v749_v55 = vsel %vm729_vm1, %v746_v39, %v748_v43  ;;  %v895_v56 = vrot.slane %v4527_v23, 2  ;;  %v896_v57 = vrot.slane %v4561_v30, 2  ;;  %v4684_v6 = vld [vmem:[%s6414_s1 + $0xb8] sm:$0xff] }
  0x22   : > { %361 = vst [vmem:[#allocation2 + $0x1b8] sm:$0xff] %v3934_v8  ;;  %362 = vst [vmem:[#allocation2 + $0x1c0] sm:$0xff] %v3934_v8  ;;  %3552 = vmatprep.subr.bf16.mxu0 %v3933_v3  ;;  %v894_v58 = vsel %vm874_vm2, %v891_v42, %v893_v49  ;;  %v755_v7 = vrot.slane %v4577_v35, 1  ;;  %v608_v10 = vld [vmem:[%s4401_s22 + $0x70] sm:$0x3]  ;;  %v4720_v21 = vld [vmem:[%s6414_s1 + $0xc0] sm:$0xff] }
  0x23   : > { %363 = vst [vmem:[#allocation2 + $0x1c8] sm:$0xff] %v3934_v8  ;;  %364 = vst [vmem:[#allocation2 + $0x1d0] sm:$0xff] %v3934_v8  ;;  %v897_v63 = vsel %vm874_vm2, %v895_v56, %v896_v57  ;;  %v753_v15 = vrot.slane %v608_v10, 1  ;;  %v898_v16 = vrot.slane %v608_v10, 2  ;;  %v4714_v19 = vld [vmem:[%s4401_s22 + $0x90] sm:$0xff]  ;;  %v4745_v28 = vld [vmem:[%s6414_s1 + $0x1c0] sm:$0xff] }
  0x24   : > { %365 = vst [vmem:[#allocation2 + $0x1d8] sm:$0xff] %v3934_v8  ;;  %366 = vst [vmem:[#allocation2 + $0x1e0] sm:$0xff] %v3934_v8  ;;  %3506 = vmatpush1.bf16.msra.mxu1 %v3505_v54  ;;  %v892_v54 = vsel %vm874_vm2, %v890_v40, %v891_v42  ;;  %v4766_v33 = vld [vmem:[%s6414_s1 + $0x1c8] sm:$0xff]  ;;  %v4771_v34 = vld [vmem:[%s6414_s1 + $0xd0] sm:$0xff] }
  0x25   : > { %367 = vst [vmem:[#allocation2 + $0x1e8] sm:$0xff] %v3934_v8  ;;  %368 = vst [vmem:[#allocation2 + $0x1f0] sm:$0xff] %v3934_v8  ;;  %3554 = vmatpush1.bf16.msra.mxu0 %v3553_v4  ;;  %3507 = vmatprep.subr.bf16.mxu1 %v3933_v3  ;;  %v3514_v4 = vpack.c.bf16 %v1554_v0, %v1553_v61  ;;  %v4791_v40 = vld [vmem:[%s6414_s1 + $0xd8] sm:$0xff]  ;;  %v4802_v42 = vld [vmem:[%s4401_s22 + $0xb0] sm:$0xff] }
  0x26   : > { %369 = vst [vmem:[#allocation2 + $0x1f8] sm:$0xff] %v3934_v8  ;;  %370 = vst [vmem:[#allocation2 + $0x200] sm:$0xff] %v3934_v8  ;;  %3555 = vmatprep.subr.bf16.mxu0 %v3933_v3  ;;  %v4815_v49 = vld [vmem:[%s4401_s22 + $0xc0] sm:$0xff]  ;;  %v3523_v56 = vpack.c.bf16 %v4791_v40, %v4771_v34  ;;  %v1630_v40 = vld [vmem:[%s6414_s1 + $0x308] sm:$0xff] }
  0x27   : > { %371 = vst [vmem:[#allocation2 + $0x208] sm:$0xff] %v3934_v8  ;;  %372 = vst [vmem:[#allocation2 + $0x210] sm:$0xff] %v3934_v8 }
  0x28   : > { %373 = vst [vmem:[#allocation2 + $0x218] sm:$0xff] %v3934_v8  ;;  %374 = vst [vmem:[#allocation2 + $0x220] sm:$0xff] %v3934_v8  ;;  %3509 = vmatpush1.bf16.msra.mxu1 %v3508_v24  ;;  %v899_v24 = vsel %vm874_vm2, %v896_v57, %v898_v16 }
  0x29   : > { %375 = vst [vmem:[#allocation2 + $0x228] sm:$0xff] %v3934_v8  ;;  %376 = vst [vmem:[#allocation2 + $0x230] sm:$0xff] %v3934_v8  ;;  %3557 = vmatpush1.bf16.msra.mxu0 %v3556_v41  ;;  %3510 = vmatprep.subr.bf16.mxu1 %v3933_v3 }
  0x2a   : > { %377 = vst [vmem:[#allocation2 + $0x238] sm:$0xff] %v3934_v8  ;;  %378 = vst [vmem:[#allocation2 + $0x240] sm:$0xff] %v3934_v8  ;;  %3558 = vmatprep.subr.bf16.mxu0 %v3933_v3 }
  0x2b   : > { %379 = vst [vmem:[#allocation2 + $0x248] sm:$0xff] %v3934_v8  ;;  %380 = vst [vmem:[#allocation2 + $0x250] sm:$0xff] %v3934_v8 }
  0x2c   : > { %381 = vst [vmem:[#allocation2 + $0x258] sm:$0xff] %v3934_v8  ;;  %382 = vst [vmem:[#allocation2 + $0x260] sm:$0xff] %v3934_v8 }
  0x2d   : > { %383 = vst [vmem:[#allocation2 + $0x268] sm:$0xff] %v3934_v8  ;;  %384 = vst [vmem:[#allocation2 + $0x270] sm:$0xff] %v3934_v8 }
  0x2e   : > { %385 = vst [vmem:[#allocation2 + $0x278] sm:$0xff] %v3934_v8  ;;  %386 = vst [vmem:[#allocation2 + $0x280] sm:$0xff] %v3934_v8 }
  0x2f   : > { %387 = vst [vmem:[#allocation2 + $0x288] sm:$0xff] %v3934_v8  ;;  %388 = vst [vmem:[#allocation2 + $0x290] sm:$0xff] %v3934_v8 }
  0x30   : > { %389 = vst [vmem:[#allocation2 + $0x298] sm:$0xff] %v3934_v8  ;;  %390 = vst [vmem:[#allocation2 + $0x2a0] sm:$0xff] %v3934_v8 }
  0x31   : > { %391 = vst [vmem:[#allocation2 + $0x2a8] sm:$0xff] %v3934_v8  ;;  %392 = vst [vmem:[#allocation2 + $0x2b0] sm:$0xff] %v3934_v8 }
  0x32   : > { %393 = vst [vmem:[#allocation2 + $0x2b8] sm:$0xff] %v3934_v8  ;;  %394 = vst [vmem:[#allocation2 + $0x2c0] sm:$0xff] %v3934_v8 }
  0x33   : > { %395 = vst [vmem:[#allocation2 + $0x2c8] sm:$0xff] %v3934_v8  ;;  %396 = vst [vmem:[#allocation2 + $0x2d0] sm:$0xff] %v3934_v8 }
  0x34   : > { %397 = vst [vmem:[#allocation2 + $0x2d8] sm:$0xff] %v3934_v8  ;;  %398 = vst [vmem:[#allocation2 + $0x2e0] sm:$0xff] %v3934_v8 }
  0x35   : > { %399 = vst [vmem:[#allocation2 + $0x2e8] sm:$0xff] %v3934_v8  ;;  %400 = vst [vmem:[#allocation2 + $0x2f0] sm:$0xff] %v3934_v8 }
  0x36   : > { %401 = vst [vmem:[#allocation2 + $0x2f8] sm:$0xff] %v3934_v8  ;;  %402 = vst [vmem:[#allocation2 + $0x300] sm:$0xff] %v3934_v8 }
  0x37   : > { %403 = vst [vmem:[#allocation2 + $0x308] sm:$0xff] %v3934_v8  ;;  %404 = vst [vmem:[#allocation2 + $0x310] sm:$0xff] %v3934_v8 }
  0x38   : > { %405 = vst [vmem:[#allocation2 + $0x318] sm:$0xff] %v3934_v8  ;;  %406 = vst [vmem:[#allocation2 + $0x320] sm:$0xff] %v3934_v8 }
  0x39   : > { %407 = vst [vmem:[#allocation2 + $0x328] sm:$0xff] %v3934_v8  ;;  %408 = vst [vmem:[#allocation2 + $0x330] sm:$0xff] %v3934_v8 }
  0x3a   : > { %409 = vst [vmem:[#allocation2 + $0x338] sm:$0xff] %v3934_v8  ;;  %410 = vst [vmem:[#allocation2 + $0x340] sm:$0xff] %v3934_v8 }
  0x3b   : > { %411 = vst [vmem:[#allocation2 + $0x348] sm:$0xff] %v3934_v8  ;;  %412 = vst [vmem:[#allocation2 + $0x350] sm:$0xff] %v3934_v8 }
  0x3c   : > { %413 = vst [vmem:[#allocation2 + $0x358] sm:$0xff] %v3934_v8  ;;  %414 = vst [vmem:[#allocation2 + $0x360] sm:$0xff] %v3934_v8 }
  0x3d   : > { %415 = vst [vmem:[#allocation2 + $0x368] sm:$0xff] %v3934_v8  ;;  %416 = vst [vmem:[#allocation2 + $0x370] sm:$0xff] %v3934_v8 }
  0x3e   : > { %417 = vst [vmem:[#allocation2 + $0x378] sm:$0xff] %v3934_v8  ;;  %418 = vst [vmem:[#allocation2 + $0x380] sm:$0xff] %v3934_v8 }
  0x3f   : > { %419 = vst [vmem:[#allocation2 + $0x388] sm:$0xff] %v3934_v8  ;;  %420 = vst [vmem:[#allocation2 + $0x390] sm:$0xff] %v3934_v8 }
  0x40   : > { %421 = vst [vmem:[#allocation2 + $0x398] sm:$0xff] %v3934_v8  ;;  %422 = vst [vmem:[#allocation2 + $0x3a0] sm:$0xff] %v3934_v8 }
  0x41   : > { %423 = vst [vmem:[#allocation2 + $0x3a8] sm:$0xff] %v3934_v8  ;;  %424 = vst [vmem:[#allocation2 + $0x3b0] sm:$0xff] %v3934_v8 }
  0x42   : > { %425 = vst [vmem:[#allocation2 + $0x3b8] sm:$0xff] %v3934_v8  ;;  %426 = vst [vmem:[#allocation2 + $0x3c0] sm:$0xff] %v3934_v8 }
  0x43   : > { %427 = vst [vmem:[#allocation2 + $0x3c8] sm:$0xff] %v3934_v8  ;;  %428 = vst [vmem:[#allocation2 + $0x3d0] sm:$0xff] %v3934_v8 }
  0x44   : > { %429 = vst [vmem:[#allocation2 + $0x3d8] sm:$0xff] %v3934_v8  ;;  %430 = vst [vmem:[#allocation2 + $0x3e0] sm:$0xff] %v3934_v8 }
  0x45   : > { %431 = vst [vmem:[#allocation2 + $0x3e8] sm:$0xff] %v3934_v8  ;;  %432 = vst [vmem:[#allocation2 + $0x3f0] sm:$0xff] %v3934_v8 }
  0x46   : > { %433 = vst [vmem:[#allocation2 + $0x3f8] sm:$0xff] %v3934_v8  ;;  %434 = vst [vmem:[#allocation2 + $0x400] sm:$0xff] %v3934_v8 }
  0x47   : > { %435 = vst [vmem:[#allocation2 + $0x408] sm:$0xff] %v3934_v8  ;;  %436 = vst [vmem:[#allocation2 + $0x410] sm:$0xff] %v3934_v8 }
  0x48   : > { %437 = vst [vmem:[#allocation2 + $0x418] sm:$0xff] %v3934_v8  ;;  %438 = vst [vmem:[#allocation2 + $0x420] sm:$0xff] %v3934_v8 }
  0x49   : > { %439 = vst [vmem:[#allocation2 + $0x428] sm:$0xff] %v3934_v8  ;;  %440 = vst [vmem:[#allocation2 + $0x430] sm:$0xff] %v3934_v8 }
  0x4a   : > { %441 = vst [vmem:[#allocation2 + $0x438] sm:$0xff] %v3934_v8  ;;  %442 = vst [vmem:[#allocation2 + $0x440] sm:$0xff] %v3934_v8 }
  0x4b   : > { %443 = vst [vmem:[#allocation2 + $0x448] sm:$0xff] %v3934_v8  ;;  %444 = vst [vmem:[#allocation2 + $0x450] sm:$0xff] %v3934_v8 }
  0x4c   : > { %445 = vst [vmem:[#allocation2 + $0x458] sm:$0xff] %v3934_v8  ;;  %446 = vst [vmem:[#allocation2 + $0x460] sm:$0xff] %v3934_v8 }
  0x4d   : > { %447 = vst [vmem:[#allocation2 + $0x468] sm:$0xff] %v3934_v8  ;;  %448 = vst [vmem:[#allocation2 + $0x470] sm:$0xff] %v3934_v8 }
  0x4e   : > { %449 = vst [vmem:[#allocation2 + $0x478] sm:$0xff] %v3934_v8  ;;  %450 = vst [vmem:[#allocation2 + $0x480] sm:$0xff] %v3934_v8 }
  0x4f   : > { %451 = vst [vmem:[#allocation2 + $0x488] sm:$0xff] %v3934_v8  ;;  %452 = vst [vmem:[#allocation2 + $0x490] sm:$0xff] %v3934_v8 }
  0x50   : > { %453 = vst [vmem:[#allocation2 + $0x498] sm:$0xff] %v3934_v8  ;;  %454 = vst [vmem:[#allocation2 + $0x4a0] sm:$0xff] %v3934_v8 }
  0x51   : > { %455 = vst [vmem:[#allocation2 + $0x4a8] sm:$0xff] %v3934_v8  ;;  %456 = vst [vmem:[#allocation2 + $0x4b0] sm:$0xff] %v3934_v8 }
  0x52   : > { %457 = vst [vmem:[#allocation2 + $0x4b8] sm:$0xff] %v3934_v8  ;;  %458 = vst [vmem:[#allocation2 + $0x4c0] sm:$0xff] %v3934_v8 }
  0x53   : > { %459 = vst [vmem:[#allocation2 + $0x4c8] sm:$0xff] %v3934_v8  ;;  %460 = vst [vmem:[#allocation2 + $0x4d0] sm:$0xff] %v3934_v8 }
  0x54   : > { %461 = vst [vmem:[#allocation2 + $0x4d8] sm:$0xff] %v3934_v8  ;;  %462 = vst [vmem:[#allocation2 + $0x4e0] sm:$0xff] %v3934_v8 }
  0x55   : > { %463 = vst [vmem:[#allocation2 + $0x4e8] sm:$0xff] %v3934_v8  ;;  %464 = vst [vmem:[#allocation2 + $0x4f0] sm:$0xff] %v3934_v8 }
  0x56   : > { %465 = vst [vmem:[#allocation2 + $0x4f8] sm:$0xff] %v3934_v8  ;;  %466 = vst [vmem:[#allocation2 + $0x500] sm:$0xff] %v3934_v8 }
  0x57   : > { %467 = vst [vmem:[#allocation2 + $0x508] sm:$0xff] %v3934_v8  ;;  %468 = vst [vmem:[#allocation2 + $0x510] sm:$0xff] %v3934_v8 }
  0x58   : > { %469 = vst [vmem:[#allocation2 + $0x518] sm:$0xff] %v3934_v8  ;;  %470 = vst [vmem:[#allocation2 + $0x520] sm:$0xff] %v3934_v8 }
  0x59   : > { %471 = vst [vmem:[#allocation2 + $0x528] sm:$0xff] %v3934_v8  ;;  %472 = vst [vmem:[#allocation2 + $0x530] sm:$0xff] %v3934_v8 }
  0x5a   : > { %473 = vst [vmem:[#allocation2 + $0x538] sm:$0xff] %v3934_v8  ;;  %474 = vst [vmem:[#allocation2 + $0x540] sm:$0xff] %v3934_v8 }
  0x5b   : > { %475 = vst [vmem:[#allocation2 + $0x548] sm:$0xff] %v3934_v8  ;;  %476 = vst [vmem:[#allocation2 + $0x550] sm:$0xff] %v3934_v8 }
  0x5c   : > { %477 = vst [vmem:[#allocation2 + $0x558] sm:$0xff] %v3934_v8  ;;  %478 = vst [vmem:[#allocation2 + $0x560] sm:$0xff] %v3934_v8 }
  0x5d   : > { %479 = vst [vmem:[#allocation2 + $0x568] sm:$0xff] %v3934_v8  ;;  %480 = vst [vmem:[#allocation2 + $0x570] sm:$0xff] %v3934_v8 }
  0x5e   : > { %481 = vst [vmem:[#allocation2 + $0x578] sm:$0xff] %v3934_v8  ;;  %482 = vst [vmem:[#allocation2 + $0x580] sm:$0xff] %v3934_v8 }
  0x5f   : > { %483 = vst [vmem:[#allocation2 + $0x588] sm:$0xff] %v3934_v8  ;;  %484 = vst [vmem:[#allocation2 + $0x590] sm:$0xff] %v3934_v8 }
  0x60   : > { %485 = vst [vmem:[#allocation2 + $0x598] sm:$0xff] %v3934_v8  ;;  %486 = vst [vmem:[#allocation2 + $0x5a0] sm:$0xff] %v3934_v8 }
  0x61   : > { %487 = vst [vmem:[#allocation2 + $0x5a8] sm:$0xff] %v3934_v8  ;;  %488 = vst [vmem:[#allocation2 + $0x5b0] sm:$0xff] %v3934_v8 }
  0x62   : > { %489 = vst [vmem:[#allocation2 + $0x5b8] sm:$0xff] %v3934_v8  ;;  %490 = vst [vmem:[#allocation2 + $0x5c0] sm:$0xff] %v3934_v8 }
  0x63   : > { %491 = vst [vmem:[#allocation2 + $0x5c8] sm:$0xff] %v3934_v8  ;;  %492 = vst [vmem:[#allocation2 + $0x5d0] sm:$0xff] %v3934_v8 }
  0x64   : > { %493 = vst [vmem:[#allocation2 + $0x5d8] sm:$0xff] %v3934_v8  ;;  %494 = vst [vmem:[#allocation2 + $0x5e0] sm:$0xff] %v3934_v8 }
  0x65   : > { %495 = vst [vmem:[#allocation2 + $0x5e8] sm:$0xff] %v3934_v8  ;;  %496 = vst [vmem:[#allocation2 + $0x5f0] sm:$0xff] %v3934_v8 }
  0x66   : > { %497 = vst [vmem:[#allocation2 + $0x5f8] sm:$0xff] %v3934_v8  ;;  %498 = vst [vmem:[#allocation2 + $0x600] sm:$0xff] %v3934_v8 }
  0x67   : > { %499 = vst [vmem:[#allocation2 + $0x608] sm:$0xff] %v3934_v8  ;;  %500 = vst [vmem:[#allocation2 + $0x610] sm:$0xff] %v3934_v8 }
  0x68   : > { %501 = vst [vmem:[#allocation2 + $0x618] sm:$0xff] %v3934_v8  ;;  %502 = vst [vmem:[#allocation2 + $0x620] sm:$0xff] %v3934_v8 }
  0x69   : > { %503 = vst [vmem:[#allocation2 + $0x628] sm:$0xff] %v3934_v8  ;;  %504 = vst [vmem:[#allocation2 + $0x630] sm:$0xff] %v3934_v8 }
  0x6a   : > { %505 = vst [vmem:[#allocation2 + $0x638] sm:$0xff] %v3934_v8  ;;  %506 = vst [vmem:[#allocation2 + $0x640] sm:$0xff] %v3934_v8 }
  0x6b   : > { %507 = vst [vmem:[#allocation2 + $0x648] sm:$0xff] %v3934_v8  ;;  %508 = vst [vmem:[#allocation2 + $0x650] sm:$0xff] %v3934_v8 }
  0x6c   : > { %509 = vst [vmem:[#allocation2 + $0x658] sm:$0xff] %v3934_v8  ;;  %510 = vst [vmem:[#allocation2 + $0x660] sm:$0xff] %v3934_v8 }
  0x6d   : > { %511 = vst [vmem:[#allocation2 + $0x668] sm:$0xff] %v3934_v8  ;;  %512 = vst [vmem:[#allocation2 + $0x670] sm:$0xff] %v3934_v8 }
  0x6e   : > { %513 = vst [vmem:[#allocation2 + $0x678] sm:$0xff] %v3934_v8  ;;  %514 = vst [vmem:[#allocation2 + $0x680] sm:$0xff] %v3934_v8 }
  0x6f   : > { %515 = vst [vmem:[#allocation2 + $0x688] sm:$0xff] %v3934_v8  ;;  %516 = vst [vmem:[#allocation2 + $0x690] sm:$0xff] %v3934_v8 }
  0x70   : > { %517 = vst [vmem:[#allocation2 + $0x698] sm:$0xff] %v3934_v8  ;;  %518 = vst [vmem:[#allocation2 + $0x6a0] sm:$0xff] %v3934_v8 }
  0x71   : > { %519 = vst [vmem:[#allocation2 + $0x6a8] sm:$0xff] %v3934_v8  ;;  %520 = vst [vmem:[#allocation2 + $0x6b0] sm:$0xff] %v3934_v8 }
  0x72   : > { %521 = vst [vmem:[#allocation2 + $0x6b8] sm:$0xff] %v3934_v8  ;;  %522 = vst [vmem:[#allocation2 + $0x6c0] sm:$0xff] %v3934_v8 }
  0x73   : > { %523 = vst [vmem:[#allocation2 + $0x6c8] sm:$0xff] %v3934_v8  ;;  %524 = vst [vmem:[#allocation2 + $0x6d0] sm:$0xff] %v3934_v8 }
  0x74   : > { %525 = vst [vmem:[#allocation2 + $0x6d8] sm:$0xff] %v3934_v8  ;;  %526 = vst [vmem:[#allocation2 + $0x6e0] sm:$0xff] %v3934_v8 }
  0x75   : > { %527 = vst [vmem:[#allocation2 + $0x6e8] sm:$0xff] %v3934_v8  ;;  %528 = vst [vmem:[#allocation2 + $0x6f0] sm:$0xff] %v3934_v8 }
  0x76   : > { %529 = vst [vmem:[#allocation2 + $0x6f8] sm:$0xff] %v3934_v8  ;;  %530 = vst [vmem:[#allocation2 + $0x700] sm:$0xff] %v3934_v8 }
  0x77   : > { %531 = vst [vmem:[#allocation2 + $0x708] sm:$0xff] %v3934_v8  ;;  %532 = vst [vmem:[#allocation2 + $0x710] sm:$0xff] %v3934_v8 }
  0x78   : > { %533 = vst [vmem:[#allocation2 + $0x718] sm:$0xff] %v3934_v8  ;;  %534 = vst [vmem:[#allocation2 + $0x720] sm:$0xff] %v3934_v8 }
  0x79   : > { %535 = vst [vmem:[#allocation2 + $0x728] sm:$0xff] %v3934_v8  ;;  %536 = vst [vmem:[#allocation2 + $0x730] sm:$0xff] %v3934_v8 }
  0x7a   : > { %537 = vst [vmem:[#allocation2 + $0x738] sm:$0xff] %v3934_v8  ;;  %538 = vst [vmem:[#allocation2 + $0x740] sm:$0xff] %v3934_v8 }
  0x7b   : > { %539 = vst [vmem:[#allocation2 + $0x748] sm:$0xff] %v3934_v8  ;;  %540 = vst [vmem:[#allocation2 + $0x750] sm:$0xff] %v3934_v8 }
  0x7c   : > { %541 = vst [vmem:[#allocation2 + $0x758] sm:$0xff] %v3934_v8  ;;  %542 = vst [vmem:[#allocation2 + $0x760] sm:$0xff] %v3934_v8 }
  0x7d   : > { %543 = vst [vmem:[#allocation2 + $0x768] sm:$0xff] %v3934_v8  ;;  %544 = vst [vmem:[#allocation2 + $0x770] sm:$0xff] %v3934_v8 }
  0x7e   : > { %545 = vst [vmem:[#allocation2 + $0x778] sm:$0xff] %v3934_v8  ;;  %546 = vst [vmem:[#allocation2 + $0x780] sm:$0xff] %v3934_v8 }
  0x7f   : > { %547 = vst [vmem:[#allocation2 + $0x788] sm:$0xff] %v3934_v8  ;;  %548 = vst [vmem:[#allocation2 + $0x790] sm:$0xff] %v3934_v8 }
  0x80   : > { %549 = vst [vmem:[#allocation2 + $0x798] sm:$0xff] %v3934_v8  ;;  %550 = vst [vmem:[#allocation2 + $0x7a0] sm:$0xff] %v3934_v8 }
  0x81   : > { %551 = vst [vmem:[#allocation2 + $0x7a8] sm:$0xff] %v3934_v8  ;;  %552 = vst [vmem:[#allocation2 + $0x7b0] sm:$0xff] %v3934_v8 }
  0x82   : > { %553 = vst [vmem:[#allocation2 + $0x7b8] sm:$0xff] %v3934_v8  ;;  %554 = vst [vmem:[#allocation2 + $0x7c0] sm:$0xff] %v3934_v8 }
  0x83   : > { %555 = vst [vmem:[#allocation2 + $0x7c8] sm:$0xff] %v3934_v8  ;;  %556 = vst [vmem:[#allocation2 + $0x7d0] sm:$0xff] %v3934_v8 }
  0x84   : > { %557 = vst [vmem:[#allocation2 + $0x7d8] sm:$0xff] %v3934_v8  ;;  %558 = vst [vmem:[#allocation2 + $0x7e0] sm:$0xff] %v3934_v8 }
  0x85   : > { %559 = vst [vmem:[#allocation2 + $0x7e8] sm:$0xff] %v3934_v8  ;;  %560 = vst [vmem:[#allocation2 + $0x7f0] sm:$0xff] %v3934_v8 }
  0x86   : > { %561 = vst [vmem:[#allocation2 + $0x7f8] sm:$0xff] %v3934_v8  ;;  %562 = vst [vmem:[#allocation2 + $0x800] sm:$0xff] %v3934_v8 }
  0x87   : > { %563 = vst [vmem:[#allocation2 + $0x808] sm:$0xff] %v3934_v8  ;;  %564 = vst [vmem:[#allocation2 + $0x810] sm:$0xff] %v3934_v8 }
  0x88   : > { %565 = vst [vmem:[#allocation2 + $0x818] sm:$0xff] %v3934_v8  ;;  %566 = vst [vmem:[#allocation2 + $0x820] sm:$0xff] %v3934_v8 }
  0x89   : > { %567 = vst [vmem:[#allocation2 + $0x828] sm:$0xff] %v3934_v8  ;;  %568 = vst [vmem:[#allocation2 + $0x830] sm:$0xff] %v3934_v8 }
  0x8a   : > { %569 = vst [vmem:[#allocation2 + $0x838] sm:$0xff] %v3934_v8  ;;  %570 = vst [vmem:[#allocation2 + $0x840] sm:$0xff] %v3934_v8 }
  0x8b   : > { %571 = vst [vmem:[#allocation2 + $0x848] sm:$0xff] %v3934_v8  ;;  %572 = vst [vmem:[#allocation2 + $0x850] sm:$0xff] %v3934_v8 }
  0x8c   : > { %573 = vst [vmem:[#allocation2 + $0x858] sm:$0xff] %v3934_v8  ;;  %574 = vst [vmem:[#allocation2 + $0x860] sm:$0xff] %v3934_v8 }
  0x8d   : > { %575 = vst [vmem:[#allocation2 + $0x868] sm:$0xff] %v3934_v8  ;;  %576 = vst [vmem:[#allocation2 + $0x870] sm:$0xff] %v3934_v8 }
  0x8e   : > { %577 = vst [vmem:[#allocation2 + $0x878] sm:$0xff] %v3934_v8  ;;  %578 = vst [vmem:[#allocation2 + $0x880] sm:$0xff] %v3934_v8 }
  0x8f   : > { %579 = vst [vmem:[#allocation2 + $0x888] sm:$0xff] %v3934_v8  ;;  %580 = vst [vmem:[#allocation2 + $0x890] sm:$0xff] %v3934_v8 }
  0x90   : > { %581 = vst [vmem:[#allocation2 + $0x898] sm:$0xff] %v3934_v8  ;;  %582 = vst [vmem:[#allocation2 + $0x8a0] sm:$0xff] %v3934_v8 }
  0x91   : > { %583 = vst [vmem:[#allocation2 + $0x8a8] sm:$0xff] %v3934_v8  ;;  %584 = vst [vmem:[#allocation2 + $0x8b0] sm:$0xff] %v3934_v8 }
  0x92   : > { %585 = vst [vmem:[#allocation2 + $0x8b8] sm:$0xff] %v3934_v8  ;;  %586 = vst [vmem:[#allocation2 + $0x8c0] sm:$0xff] %v3934_v8 }
  0x93   : > { %587 = vst [vmem:[#allocation2 + $0x8c8] sm:$0xff] %v3934_v8  ;;  %588 = vst [vmem:[#allocation2 + $0x8d0] sm:$0xff] %v3934_v8 }
  0x94   : > { %589 = vst [vmem:[#allocation2 + $0x8d8] sm:$0xff] %v3934_v8  ;;  %590 = vst [vmem:[#allocation2 + $0x8e0] sm:$0xff] %v3934_v8 }
  0x95   : > { %591 = vst [vmem:[#allocation2 + $0x8e8] sm:$0xff] %v3934_v8  ;;  %592 = vst [vmem:[#allocation2 + $0x8f0] sm:$0xff] %v3934_v8 }
  0x96   : > { %593 = vst [vmem:[#allocation2 + $0x8f8] sm:$0xff] %v3934_v8  ;;  %649 = vst.msk [vmem:[#allocation2] sm:$0xff] %vm648_vm0, %v594_v45  ;;  %v1551_v45 = vld [vmem:[%s6414_s1 + $0x90] sm:$0xff] }
  0x97   : > { %650 = vst.msk [vmem:[#allocation2 + $0x48] sm:$0xff] %vm648_vm0, %v595_v46  ;;  %1019 = vst.msk [vmem:[#allocation2 + $0x18] sm:$0xff] %vm648_vm0, %v597_v52  ;;  %v1552_v46 = vld [vmem:[%s6414_s1 + $0x98] sm:$0xff] }
  0x98   : > { %651 = vst.msk [vmem:[#allocation2 + $0x90] sm:$0xff] %vm648_vm0, %v597_v52  ;;  %1020 = vst.msk [vmem:[#allocation2 + $0x60] sm:$0xff] %vm648_vm0, %v4450_v59  ;;  %v1583_v52 = vld [vmem:[%s6414_s1 + $0x190] sm:$0xff] }
  0x99   : > { %652 = vst.msk [vmem:[#allocation2 + $0xd8] sm:$0xff] %vm648_vm0, %v4450_v59  ;;  %842 = vst.msk [vmem:[#allocation2 + $0x8] sm:$0xff] %vm648_vm0, %v732_v62  ;;  %v752_v59 = vsel %vm729_vm1, %v750_v50, %v751_v51  ;;  %v3511_v62 = vpack.c.bf16 %v1552_v46, %v1551_v45  ;;  %v3559_v60 = vpack.c.bf16 %v1584_v53, %v1583_v52  ;;  %v4828_v52 = vld [vmem:[%s6414_s1 + $0x1d8] sm:$0xff] }
  0x9a   : > { %1021 = vst.msk [vmem:[#allocation2 + $0xa8] sm:$0xff] %vm648_vm0, %v4470_v2  ;;  %653 = vst.msk [vmem:[#allocation2 + $0x120] sm:$0xff] %vm648_vm0, %v4470_v2  ;;  %v3568_v50 = vpack.c.bf16 %v4766_v33, %v4745_v28 }
  0x9b   : > { %1132 = vst.msk [vmem:[#allocation2 + $0x30] sm:$0xff] %vm648_vm0, %v4470_v2  ;;  %987 = vst.msk [vmem:[#allocation2 + $0x10] sm:$0xff] %vm648_vm0, %v877_v5  ;;  %v1586_v2 = vld [vmem:[%s6414_s1 + $0x1a8] sm:$0xff]  ;;  %3512 = vmatpush1.bf16.msra.mxu1 %v3511_v62  ;;  %v4679_v5 = vld [vmem:[%s6414_s1 + $0xb0] sm:$0xff]  ;;  %3560 = vmatpush1.bf16.msra.mxu0 %v3559_v60 }
  0x9c   : > { %1022 = vst.msk [vmem:[#allocation2 + $0xf0] sm:$0xff] %vm648_vm0, %v4486_v9  ;;  %654 = vst.msk [vmem:[#allocation2 + $0x168] sm:$0xff] %vm648_vm0, %v4486_v9  ;;  %3513 = vmatprep.subr.bf16.mxu1 %v3933_v3  ;;  %3561 = vmatprep.subr.bf16.mxu0 %v3933_v3  ;;  %v617_v62 = vld [vmem:[%s4401_s22 + $0xb8] sm:$0x3] }
  0x9d   : > { %1133 = vst.msk [vmem:[#allocation2 + $0x78] sm:$0xff] %vm648_vm0, %v4486_v9  ;;  %1023 = vst.msk [vmem:[#allocation2 + $0x138] sm:$0xff] %vm648_vm0, %v4490_v11  ;;  %v3562_v9 = vpack.c.bf16 %v1586_v2, %v1585_v1  ;;  %v768_v0 = vrot.slane %v617_v62, 1  ;;  %v913_v1 = vrot.slane %v617_v62, 2 }
  0x9e   : > { %655 = vst.msk [vmem:[#allocation2 + $0x1b0] sm:$0xff] %vm648_vm0, %v4490_v11  ;;  %1134 = vst.msk [vmem:[#allocation2 + $0xc0] sm:$0xff] %vm648_vm0, %v4490_v11  ;;  %v1248_v36 = vld [vmem:[#allocation2 + $0x18] sm:$0xff]  ;;  %v4690_v11 = vld [vmem:[%s4401_s22 + $0x80] sm:$0xff] }
  0x9f   : > { %843 = vst.msk [vmem:[#allocation2 + $0x50] sm:$0xff] %vm648_vm0, %v734_v12  ;;  %988 = vst.msk [vmem:[#allocation2 + $0x58] sm:$0xff] %vm648_vm0, %v879_v13  ;;  %1973 = vmatprep.mubr.f32.mxu0 %v1248_v36  ;;  %v900_v12 = vrot.slane %v4577_v35, 2  ;;  %v4697_v13 = vld [vmem:[%s6414_s1 + $0x1b0] sm:$0xff]  ;;  %v756_v17 = vrot.slane %v4690_v11, 1  ;;  %v901_v20 = vrot.slane %v4690_v11, 2  ;;  %3515 = vmatpush1.bf16.msra.mxu1 %v3514_v4 }
  0xa0   : > { %844 = vst.msk [vmem:[#allocation2 + $0x98] sm:$0xff] %vm648_vm0, %v737_v14  ;;  %1061 = vst.msk [vmem:[#allocation2 + $0x20] sm:$0xff] %vm648_vm0, %v737_v14  ;;  %v1246_v47 = vld [vmem:[#allocation2 + $0x8] sm:$0xff]  ;;  %v4702_v14 = vld [vmem:[%s6414_s1 + $0x1b8] sm:$0xff]  ;;  %3563 = vmatpush1.bf16.msra.mxu0 %v3562_v9  ;;  %3516 = vmatprep.subr.bf16.mxu1 %v3933_v3 }
  0xa1   : > { %989 = vst.msk [vmem:[#allocation2 + $0xa0] sm:$0xff] %vm648_vm0, %v882_v18  ;;  %1100 = vst.msk [vmem:[#allocation2 + $0x28] sm:$0xff] %vm648_vm0, %v882_v18  ;;  %1748 = vmatprep.mubr.f32.mxu1 %v1246_v47  ;;  %v3517_v18 = vpack.c.bf16 %v4684_v6, %v4679_v5  ;;  %v757_v25 = vsel %vm729_vm1, %v755_v7, %v756_v17  ;;  %v3565_v27 = vpack.c.bf16 %v4702_v14, %v4697_v13  ;;  %v1561_v7 = vld [vmem:[%s6414_s1 + $0xe0] sm:$0xff]  ;;  %v1562_v9 = vld [vmem:[%s6414_s1 + $0xe8] sm:$0xff] }
  0xa2   : > { %1024 = vst.msk [vmem:[#allocation2 + $0x180] sm:$0xff] %vm648_vm0, %v4524_v22  ;;  %656 = vst.msk [vmem:[#allocation2 + $0x1f8] sm:$0xff] %vm648_vm0, %v4524_v22  ;;  %v902_v29 = vsel %vm874_vm2, %v900_v12, %v901_v20  ;;  %3564 = vmatprep.subr.bf16.mxu0 %v3933_v3  ;;  %v770_v5 = vrot.slane %v4815_v49, 1  ;;  %v915_v12 = vrot.slane %v4815_v49, 2  ;;  %v1593_v14 = vld [vmem:[%s6414_s1 + $0x1e0] sm:$0xff] }
  0xa3   : > { %1135 = vst.msk [vmem:[#allocation2 + $0x108] sm:$0xff] %vm648_vm0, %v4524_v22  ;;  %1025 = vst.msk [vmem:[#allocation2 + $0x1c8] sm:$0xff] %vm648_vm0, %v4527_v23  ;;  %v4725_v22 = vld [vmem:[%s6414_s1 + $0xc8] sm:$0xff]  ;;  %3518 = vmatpush1.bf16.msra.mxu1 %v3517_v18 }
  0xa4   : > { %657 = vst.msk [vmem:[#allocation2 + $0x240] sm:$0xff] %vm648_vm0, %v4527_v23  ;;  %1136 = vst.msk [vmem:[#allocation2 + $0x150] sm:$0xff] %vm648_vm0, %v4527_v23  ;;  %v754_v23 = vsel %vm729_vm1, %v751_v51, %v753_v15  ;;  %v3520_v39 = vpack.c.bf16 %v4725_v22, %v4720_v21  ;;  %3566 = vmatpush1.bf16.msra.mxu0 %v3565_v27  ;;  %3519 = vmatprep.subr.bf16.mxu1 %v3933_v3  ;;  %v4823_v51 = vld [vmem:[%s6414_s1 + $0x1d0] sm:$0xff]  ;;  %v1594_v15 = vld [vmem:[%s6414_s1 + $0x1e8] sm:$0xff] }
  0xa5   : > { %845 = vst.msk [vmem:[#allocation2 + $0xe0] sm:$0xff] %vm648_vm0, %v739_v26  ;;  %1062 = vst.msk [vmem:[#allocation2 + $0x68] sm:$0xff] %vm648_vm0, %v739_v26  ;;  %v760_v26 = vrot.slane %v4714_v19, 1  ;;  %3567 = vmatprep.subr.bf16.mxu0 %v3933_v3  ;;  %v3571_v2 = vpack.c.bf16 %v4828_v52, %v4823_v51  ;;  %v1563_v21 = vld [vmem:[%s6414_s1 + $0xf0] sm:$0xff]  ;;  %v1564_v22 = vld [vmem:[%s6414_s1 + $0xf8] sm:$0xff] }
  0xa6   : > { %1026 = vst.msk [vmem:[#allocation2 + $0x210] sm:$0xff] %vm648_vm0, %v4561_v30  ;;  %658 = vst.msk [vmem:[#allocation2 + $0x288] sm:$0xff] %vm648_vm0, %v4561_v30  ;;  %v3529_v28 = vpack.c.bf16 %v1564_v22, %v1563_v21  ;;  %v1255_v51 = vld [vmem:[#allocation2 + $0x50] sm:$0xff] }
  0xa7   : > { %1137 = vst.msk [vmem:[#allocation2 + $0x198] sm:$0xff] %vm648_vm0, %v4561_v30  ;;  %990 = vst.msk [vmem:[#allocation2 + $0xe8] sm:$0xff] %vm648_vm0, %v884_v31  ;;  %v611_v30 = vld [vmem:[%s4401_s22 + $0x88] sm:$0x3]  ;;  %3521 = vmatpush1.bf16.msra.mxu1 %v3520_v39  ;;  %v1629_v39 = vld [vmem:[%s6414_s1 + $0x300] sm:$0xff] }
  0xa8   : > { %1101 = vst.msk [vmem:[#allocation2 + $0x70] sm:$0xff] %vm648_vm0, %v884_v31  ;;  %846 = vst.msk [vmem:[#allocation2 + $0x128] sm:$0xff] %vm648_vm0, %v742_v32  ;;  %v4759_v31 = vld [vmem:[%s4401_s22 + $0x98] sm:$0xff]  ;;  %v903_v36 = vrot.slane %v611_v30, 2  ;;  %3569 = vmatpush1.bf16.msra.mxu0 %v3568_v50  ;;  %3522 = vmatprep.subr.bf16.mxu1 %v3933_v3 }
  0xa9   : > { %1063 = vst.msk [vmem:[#allocation2 + $0xb0] sm:$0xff] %vm648_vm0, %v742_v32  ;;  %1174 = vst.msk [vmem:[#allocation2 + $0x38] sm:$0xff] %vm648_vm0, %v742_v32  ;;  %v905_v32 = vrot.slane %v4714_v19, 2  ;;  %v906_v41 = vrot.slane %v4759_v31, 2  ;;  %3570 = vmatprep.subr.bf16.mxu0 %v3933_v3 }
  0xaa   : > { %1027 = vst.msk [vmem:[#allocation2 + $0x258] sm:$0xff] %vm648_vm0, %v4577_v35  ;;  %659 = vst.msk [vmem:[#allocation2 + $0x2d0] sm:$0xff] %vm648_vm0, %v4577_v35  ;;  %v904_v46 = vsel %vm874_vm2, %v901_v20, %v903_v36  ;;  %v3574_v20 = vpack.c.bf16 %v1594_v15, %v1593_v14  ;;  %v4959_v36 = vld [vmem:[%s6414_s1 + $0x208] sm:$0xff]  ;;  %v5063_v15 = vld [vmem:[%s4401_s22 + $0x120] sm:$0xff] }
  0xab   : > { %1138 = vst.msk [vmem:[#allocation2 + $0x1e0] sm:$0xff] %vm648_vm0, %v4577_v35  ;;  %991 = vst.msk [vmem:[#allocation2 + $0x130] sm:$0xff] %vm648_vm0, %v887_v37  ;;  %v758_v35 = vrot.slane %v611_v30, 1  ;;  %v907_v53 = vsel %vm874_vm2, %v905_v32, %v906_v41  ;;  %3524 = vmatpush1.bf16.msra.mxu1 %v3523_v56  ;;  %v4939_v30 = vld [vmem:[%s4401_s22 + $0xe0] sm:$0xff]  ;;  %v5005_v56 = vld [vmem:[%s6414_s1 + $0x218] sm:$0xff] }
  0xac   : > { %1102 = vst.msk [vmem:[#allocation2 + $0xb8] sm:$0xff] %vm648_vm0, %v887_v37  ;;  %1213 = vst.msk [vmem:[#allocation2 + $0x40] sm:$0xff] %vm648_vm0, %v887_v37  ;;  %v761_v37 = vrot.slane %v4759_v31, 1  ;;  %3572 = vmatpush1.bf16.msra.mxu0 %v3571_v2  ;;  %3525 = vmatprep.subr.bf16.mxu1 %v3933_v3  ;;  %v776_v33 = vrot.slane %v4939_v30, 1  ;;  %v921_v34 = vrot.slane %v4939_v30, 2 }
  0xad   : > { %847 = vst.msk [vmem:[#allocation2 + $0x170] sm:$0xff] %vm648_vm0, %v744_v38  ;;  %1064 = vst.msk [vmem:[#allocation2 + $0xf8] sm:$0xff] %vm648_vm0, %v744_v38  ;;  %v759_v45 = vsel %vm729_vm1, %v756_v17, %v758_v35  ;;  %v621_v17 = vld [vmem:[%s4401_s22 + $0xd8] sm:$0xff]  ;;  %3573 = vmatprep.subr.bf16.mxu0 %v3933_v3  ;;  %v4954_v35 = vld [vmem:[%s6414_s1 + $0x200] sm:$0xff] }
  0xae   : > { %1175 = vst.msk [vmem:[#allocation2 + $0x80] sm:$0xff] %vm648_vm0, %v744_v38  ;;  %992 = vst.msk [vmem:[#allocation2 + $0x178] sm:$0xff] %vm648_vm0, %v889_v44  ;;  %v4784_v38 = vld [vmem:[%s4401_s22 + $0xa8] sm:$0xff]  ;;  %v762_v47 = vsel %vm729_vm1, %v760_v26, %v761_v37  ;;  %v775_v26 = vrot.slane %v621_v17, 1  ;;  %v920_v27 = vrot.slane %v621_v17, 2  ;;  %v3580_v50 = vpack.c.bf16 %v4959_v36, %v4954_v35 }
  0xaf   : > { %1103 = vst.msk [vmem:[#allocation2 + $0x100] sm:$0xff] %vm648_vm0, %v889_v44  ;;  %1214 = vst.msk [vmem:[#allocation2 + $0x88] sm:$0xff] %vm648_vm0, %v889_v44  ;;  %v614_v44 = vld [vmem:[%s4401_s22 + $0xa0] sm:$0x3]  ;;  %v765_v43 = vrot.slane %v4784_v38, 1 }
  0xb0   : > { %848 = vst.msk [vmem:[#allocation2 + $0x1b8] sm:$0xff] %vm648_vm0, %v747_v48  ;;  %1065 = vst.msk [vmem:[#allocation2 + $0x140] sm:$0xff] %vm648_vm0, %v747_v48  ;;  %3575 = vmatpush1.bf16.msra.mxu0 %v3574_v20  ;;  %v629_v36 = vld [vmem:[%s4401_s22 + $0x118] sm:$0x3] }
  0xb1   : > { %1176 = vst.msk [vmem:[#allocation2 + $0xc8] sm:$0xff] %vm648_vm0, %v747_v48  ;;  %993 = vst.msk [vmem:[#allocation2 + $0x1c0] sm:$0xff] %vm648_vm0, %v892_v54  ;;  %v763_v48 = vrot.slane %v614_v44, 1  ;;  %3576 = vmatprep.subr.bf16.mxu0 %v3933_v3 }
  0xb2   : > { %1104 = vst.msk [vmem:[#allocation2 + $0x148] sm:$0xff] %vm648_vm0, %v892_v54  ;;  %1215 = vst.msk [vmem:[#allocation2 + $0xd0] sm:$0xff] %vm648_vm0, %v892_v54  ;;  %v908_v54 = vrot.slane %v614_v44, 2  ;;  %v624_v44 = vld [vmem:[%s4401_s22 + $0xf0] sm:$0xff] }
  0xb3   : > { %849 = vst.msk [vmem:[#allocation2 + $0x200] sm:$0xff] %vm648_vm0, %v749_v55  ;;  %1066 = vst.msk [vmem:[#allocation2 + $0x188] sm:$0xff] %vm648_vm0, %v749_v55  ;;  %v764_v57 = vsel %vm729_vm1, %v761_v37, %v763_v48  ;;  %v925_v48 = vrot.slane %v624_v44, 2 }
  0xb4   : > { %1177 = vst.msk [vmem:[#allocation2 + $0x110] sm:$0xff] %vm648_vm0, %v749_v55  ;;  %994 = vst.msk [vmem:[#allocation2 + $0x208] sm:$0xff] %vm648_vm0, %v894_v58  ;;  %v766_v55 = vrot.slane %v4802_v42, 1  ;;  %v909_v60 = vsel %vm874_vm2, %v906_v41, %v908_v54  ;;  %v777_v41 = vsel %vm729_vm1, %v775_v26, %v776_v33 }
  0xb5   : > { %1105 = vst.msk [vmem:[#allocation2 + $0x190] sm:$0xff] %vm648_vm0, %v894_v58  ;;  %1216 = vst.msk [vmem:[#allocation2 + $0x118] sm:$0xff] %vm648_vm0, %v894_v58  ;;  %v910_v58 = vrot.slane %v4784_v38, 2 }
  0xb6   : > { %850 = vst.msk [vmem:[#allocation2 + $0x248] sm:$0xff] %vm648_vm0, %v752_v59  ;;  %1067 = vst.msk [vmem:[#allocation2 + $0x1d0] sm:$0xff] %vm648_vm0, %v752_v59  ;;  %v767_v61 = vsel %vm729_vm1, %v765_v43, %v766_v55  ;;  %v769_v10 = vsel %vm729_vm1, %v766_v55, %v768_v0  ;;  %v1245_v43 = vld [vmem:[#allocation2] sm:$0xff] }
  0xb7   : > { %1178 = vst.msk [vmem:[#allocation2 + $0x158] sm:$0xff] %vm648_vm0, %v752_v59  ;;  %995 = vst.msk [vmem:[#allocation2 + $0x250] sm:$0xff] %vm648_vm0, %v897_v63  ;;  %v911_v59 = vrot.slane %v4802_v42, 2  ;;  %v1257_v55 = vld [vmem:[#allocation2 + $0x60] sm:$0xff] }
  0xb8   : > { %1106 = vst.msk [vmem:[#allocation2 + $0x1d8] sm:$0xff] %vm648_vm0, %v897_v63  ;;  %1217 = vst.msk [vmem:[#allocation2 + $0x160] sm:$0xff] %vm648_vm0, %v897_v63  ;;  %v4858_v63 = vld [vmem:[%s4401_s22 + $0xc8] sm:$0xff] }
  0xb9   : > { %1028 = vst.msk [vmem:[#allocation2 + $0x2a0] sm:$0xff] %vm648_vm0, %v4690_v11  ;;  %660 = vst.msk [vmem:[#allocation2 + $0x318] sm:$0xff] %vm648_vm0, %v4690_v11  ;;  %v912_v4 = vsel %vm874_vm2, %v910_v58, %v911_v59  ;;  %v771_v6 = vrot.slane %v4858_v63, 1  ;;  %v916_v13 = vrot.slane %v4858_v63, 2 }
  0xba   : > { %1139 = vst.msk [vmem:[#allocation2 + $0x228] sm:$0xff] %vm648_vm0, %v4690_v11  ;;  %1029 = vst.msk [vmem:[#allocation2 + $0x2e8] sm:$0xff] %vm648_vm0, %v4714_v19  ;;  %v914_v11 = vsel %vm874_vm2, %v911_v59, %v913_v1  ;;  %v5017_v59 = vld [vmem:[%s4401_s22 + $0x108] sm:$0xff]  ;;  %v626_v1 = vld [vmem:[%s4401_s22 + $0x100] sm:$0x3] }
  0xbb   : > { %661 = vst.msk [vmem:[#allocation2 + $0x360] sm:$0xff] %vm648_vm0, %v4714_v19  ;;  %1140 = vst.msk [vmem:[#allocation2 + $0x270] sm:$0xff] %vm648_vm0, %v4714_v19  ;;  %v772_v16 = vsel %vm729_vm1, %v770_v5, %v771_v6  ;;  %v917_v18 = vsel %vm874_vm2, %v915_v12, %v916_v13  ;;  %v3526_v19 = vpack.c.bf16 %v1562_v9, %v1561_v7  ;;  %v785_v2 = vrot.slane %v5017_v59, 1  ;;  %v5045_v9 = vld [vmem:[%s4401_s22 + $0x110] sm:$0xff] }
  0xbc   : > { %851 = vst.msk [vmem:[#allocation2 + $0x290] sm:$0xff] %vm648_vm0, %v754_v23  ;;  %1068 = vst.msk [vmem:[#allocation2 + $0x218] sm:$0xff] %vm648_vm0, %v754_v23  ;;  %v783_v7 = vrot.slane %v626_v1, 1  ;;  %v786_v14 = vrot.slane %v5045_v9, 1  ;;  %v931_v22 = vrot.slane %v5045_v9, 2 }
  0xbd   : > { %1179 = vst.msk [vmem:[#allocation2 + $0x1a0] sm:$0xff] %vm648_vm0, %v754_v23  ;;  %996 = vst.msk [vmem:[#allocation2 + $0x298] sm:$0xff] %vm648_vm0, %v899_v24  ;;  %v1595_v23 = vld [vmem:[%s6414_s1 + $0x1f0] sm:$0xff]  ;;  %3527 = vmatpush1.bf16.msra.mxu1 %v3526_v19  ;;  %v1602_v19 = vld [vmem:[%s6414_s1 + $0x228] sm:$0xff] }
  0xbe   : > { %1107 = vst.msk [vmem:[#allocation2 + $0x220] sm:$0xff] %vm648_vm0, %v899_v24  ;;  %1218 = vst.msk [vmem:[#allocation2 + $0x1a8] sm:$0xff] %vm648_vm0, %v899_v24  ;;  %v1596_v24 = vld [vmem:[%s6414_s1 + $0x1f8] sm:$0xff]  ;;  %3528 = vmatprep.subr.bf16.mxu1 %v3933_v3  ;;  %v787_v26 = vsel %vm729_vm1, %v785_v2, %v786_v14 }
  0xbf   : > { %852 = vst.msk [vmem:[#allocation2 + $0x2d8] sm:$0xff] %vm648_vm0, %v757_v25  ;;  %1069 = vst.msk [vmem:[#allocation2 + $0x260] sm:$0xff] %vm648_vm0, %v757_v25  ;;  %v3577_v32 = vpack.c.bf16 %v1596_v24, %v1595_v23  ;;  %v1633_v23 = vld [vmem:[%s6414_s1 + $0x320] sm:$0xff]  ;;  %v1634_v24 = vld [vmem:[%s6414_s1 + $0x328] sm:$0xff] }
  0xc0   : > { %1180 = vst.msk [vmem:[#allocation2 + $0x1e8] sm:$0xff] %vm648_vm0, %v757_v25  ;;  %997 = vst.msk [vmem:[#allocation2 + $0x2e0] sm:$0xff] %vm648_vm0, %v902_v29  ;;  %v620_v25 = vld [vmem:[%s4401_s22 + $0xd0] sm:$0x3]  ;;  %v5123_v35 = vpack.c.bf16 %v1634_v24, %v1633_v23  ;;  %v1292_v24 = vld [vmem:[#allocation2 + $0x178] sm:$0xff] }
  0xc1   : > { %1108 = vst.msk [vmem:[#allocation2 + $0x268] sm:$0xff] %vm648_vm0, %v902_v29  ;;  %1219 = vst.msk [vmem:[#allocation2 + $0x1f0] sm:$0xff] %vm648_vm0, %v902_v29  ;;  %v773_v29 = vrot.slane %v620_v25, 1  ;;  %3530 = vmatpush1.bf16.msra.mxu1 %v3529_v28  ;;  %3578 = vmatpush1.bf16.msra.mxu0 %v3577_v32  ;;  %v5111_v32 = vld [vmem:[%s6414_s1 + $0x230] sm:$0xff] }
  0xc2   : > { %1030 = vst.msk [vmem:[#allocation2 + $0x330] sm:$0xff] %vm648_vm0, %v4759_v31  ;;  %662 = vst.msk [vmem:[#allocation2 + $0x3a8] sm:$0xff] %vm648_vm0, %v4759_v31  ;;  %3707 = vmatprep.subr.bf16.mxu1 %v3933_v3  ;;  %3579 = vmatprep.subr.bf16.mxu0 %v3933_v3 }
  0xc3   : > { %1141 = vst.msk [vmem:[#allocation2 + $0x2b8] sm:$0xff] %vm648_vm0, %v4759_v31  ;;  %1031 = vst.msk [vmem:[#allocation2 + $0x378] sm:$0xff] %vm648_vm0, %v4784_v38  ;;  %v918_v31 = vrot.slane %v620_v25, 2  ;;  %v774_v37 = vsel %vm729_vm1, %v771_v6, %v773_v29  ;;  %v1265_v29 = vld [vmem:[#allocation2 + $0xa0] sm:$0xff] }
  0xc4   : > { %663 = vst.msk [vmem:[#allocation2 + $0x3f0] sm:$0xff] %vm648_vm0, %v4784_v38  ;;  %1142 = vst.msk [vmem:[#allocation2 + $0x300] sm:$0xff] %vm648_vm0, %v4784_v38  ;;  %1749 = vmatmul.mubr.f32.vlgmr.msra.gmra.mrb[0].mxu1 %v1245_v43  ;;  %v1272_v43 = vld [vmem:[#allocation2 + $0xd8] sm:$0xff] }
  0xc5   : > { %1032 = vst.msk [vmem:[#allocation2 + $0x3c0] sm:$0xff] %vm648_vm0, %v4802_v42  ;;  %664 = vst.msk [vmem:[#allocation2 + $0x438] sm:$0xff] %vm648_vm0, %v4802_v42  ;;  %v919_v38 = vsel %vm874_vm2, %v916_v13, %v918_v31  ;;  %1753 = vmatprep.mubr.f32.mxu1 %v1255_v51  ;;  %v928_v13 = vrot.slane %v626_v1, 2  ;;  %v1291_v1 = vld [vmem:[#allocation2 + $0x170] sm:$0xff] }
  0xc6   : > { %1143 = vst.msk [vmem:[#allocation2 + $0x348] sm:$0xff] %vm648_vm0, %v4802_v42  ;;  %853 = vst.msk [vmem:[#allocation2 + $0x320] sm:$0xff] %vm648_vm0, %v759_v45  ;;  %v922_v42 = vsel %vm874_vm2, %v920_v27, %v921_v34  ;;  %v1263_v27 = vld [vmem:[#allocation2 + $0x90] sm:$0xff] }
  0xc7   : > { %1070 = vst.msk [vmem:[#allocation2 + $0x2a8] sm:$0xff] %vm648_vm0, %v759_v45  ;;  %1181 = vst.msk [vmem:[#allocation2 + $0x230] sm:$0xff] %vm648_vm0, %v759_v45  ;;  %v4983_v45 = vld [vmem:[%s6414_s1 + $0x210] sm:$0xff] }
  0xc8   : > { %998 = vst.msk [vmem:[#allocation2 + $0x328] sm:$0xff] %vm648_vm0, %v904_v46  ;;  %1109 = vst.msk [vmem:[#allocation2 + $0x2b0] sm:$0xff] %vm648_vm0, %v904_v46  ;;  %v3583_v12 = vpack.c.bf16 %v5005_v56, %v4983_v45 }
  0xc9   : > { %1220 = vst.msk [vmem:[#allocation2 + $0x238] sm:$0xff] %vm648_vm0, %v904_v46  ;;  %854 = vst.msk [vmem:[#allocation2 + $0x368] sm:$0xff] %vm648_vm0, %v762_v47  ;;  %v623_v46 = vld [vmem:[%s4401_s22 + $0xe8] sm:$0x3] }
  0xca   : > { %1071 = vst.msk [vmem:[#allocation2 + $0x2f0] sm:$0xff] %vm648_vm0, %v762_v47  ;;  %1182 = vst.msk [vmem:[#allocation2 + $0x278] sm:$0xff] %vm648_vm0, %v762_v47  ;;  %v780_v47 = vrot.slane %v624_v44, 1  ;;  %v778_v52 = vrot.slane %v623_v46, 1  ;;  %v923_v54 = vrot.slane %v623_v46, 2 }
  0xcb   : > { %1033 = vst.msk [vmem:[#allocation2 + $0x408] sm:$0xff] %vm648_vm0, %v4815_v49  ;;  %665 = vst.msk [vmem:[#allocation2 + $0x480] sm:$0xff] %vm648_vm0, %v4815_v49 }
  0xcc   : > { %1144 = vst.msk [vmem:[#allocation2 + $0x390] sm:$0xff] %vm648_vm0, %v4815_v49  ;;  %999 = vst.msk [vmem:[#allocation2 + $0x370] sm:$0xff] %vm648_vm0, %v907_v53  ;;  %v1247_v49 = vld [vmem:[#allocation2 + $0x10] sm:$0xff]  ;;  %v924_v0 = vsel %vm874_vm2, %v921_v34, %v923_v54  ;;  %v5120_v34 = vld [vmem:[%s6414_s1 + $0x238] sm:$0xff] }
  0xcd   : > { %1110 = vst.msk [vmem:[#allocation2 + $0x2f8] sm:$0xff] %vm648_vm0, %v907_v53  ;;  %1221 = vst.msk [vmem:[#allocation2 + $0x280] sm:$0xff] %vm648_vm0, %v907_v53  ;;  %v4999_v53 = vld [vmem:[%s4401_s22 + $0xf8] sm:$0xff]  ;;  %1974 = vmatmul.mubr.f32.vlgmr.msra.gmra.mrb[0].mxu0 %v1247_v49  ;;  %v3589_v49 = vpack.c.bf16 %v5120_v34, %v5111_v32  ;;  %v5161_v54 = vld [vmem:[%s6414_s1 + $0x248] sm:$0xff] }
  0xce   : > { %855 = vst.msk [vmem:[#allocation2 + $0x3b0] sm:$0xff] %vm648_vm0, %v764_v57  ;;  %1072 = vst.msk [vmem:[#allocation2 + $0x338] sm:$0xff] %vm648_vm0, %v764_v57  ;;  %v781_v58 = vrot.slane %v4999_v53, 1  ;;  %v926_v62 = vrot.slane %v4999_v53, 2  ;;  %3581 = vmatpush1.bf16.msra.mxu0 %v3580_v50  ;;  %1978 = vmatprep.mubr.f32.mxu0 %v1257_v55  ;;  %v5151_v50 = vld [vmem:[%s6414_s1 + $0x240] sm:$0xff] }
  0xcf   : > { %1183 = vst.msk [vmem:[#allocation2 + $0x2c0] sm:$0xff] %vm648_vm0, %v764_v57  ;;  %1034 = vst.msk [vmem:[#allocation2 + $0x450] sm:$0xff] %vm648_vm0, %v4858_v63  ;;  %v5007_v57 = vpack.c.bf16 %v1630_v40, %v1629_v39  ;;  %3582 = vmatprep.subr.bf16.mxu0 %v3933_v3  ;;  %v1635_v39 = vld [vmem:[%s6414_s1 + $0x330] sm:$0xff]  ;;  %v1636_v40 = vld [vmem:[%s6414_s1 + $0x338] sm:$0xff]  ;;  %v3592_v2 = vpack.c.bf16 %v5161_v54, %v5151_v50 }
  0xd0   : > { %666 = vst.msk [vmem:[#allocation2 + $0x4c8] sm:$0xff] %vm648_vm0, %v4858_v63  ;;  %1145 = vst.msk [vmem:[#allocation2 + $0x3d8] sm:$0xff] %vm648_vm0, %v4858_v63  ;;  %v1631_v63 = vld [vmem:[%s6414_s1 + $0x310] sm:$0xff]  ;;  %v782_v5 = vsel %vm729_vm1, %v780_v47, %v781_v58  ;;  %v927_v6 = vsel %vm874_vm2, %v925_v48, %v926_v62  ;;  %v784_v21 = vsel %vm729_vm1, %v781_v58, %v783_v7  ;;  %v1274_v47 = vld [vmem:[#allocation2 + $0xe8] sm:$0xff] }
  0xd1   : > { %1000 = vst.msk [vmem:[#allocation2 + $0x3b8] sm:$0xff] %vm648_vm0, %v909_v60  ;;  %1111 = vst.msk [vmem:[#allocation2 + $0x340] sm:$0xff] %vm648_vm0, %v909_v60  ;;  %3723 = vmatpush1.bf16.msra.mxu1 %v5007_v57  ;;  %v929_v25 = vsel %vm874_vm2, %v926_v62, %v928_v13  ;;  %v1282_v48 = vld [vmem:[#allocation2 + $0x128] sm:$0xff]  ;;  %v5164_v55 = vpack.c.bf16 %v1636_v40, %v1635_v39  ;;  %v5176_v58 = vld [vmem:[%s4401_s22 + $0x138] sm:$0xff] }
  0xd2   : > { %1222 = vst.msk [vmem:[#allocation2 + $0x2c8] sm:$0xff] %vm648_vm0, %v909_v60  ;;  %856 = vst.msk [vmem:[#allocation2 + $0x3f8] sm:$0xff] %vm648_vm0, %v767_v61  ;;  %v1632_v60 = vld [vmem:[%s6414_s1 + $0x318] sm:$0xff]  ;;  %3708 = vmatprep.subr.bf16.mxu1 %v3933_v3  ;;  %3584 = vmatpush1.bf16.msra.mxu0 %v3583_v12  ;;  %v1637_v62 = vld [vmem:[%s6414_s1 + $0x340] sm:$0xff] }
  0xd3   : > { %1073 = vst.msk [vmem:[#allocation2 + $0x380] sm:$0xff] %vm648_vm0, %v767_v61  ;;  %1184 = vst.msk [vmem:[#allocation2 + $0x308] sm:$0xff] %vm648_vm0, %v767_v61  ;;  %v779_v61 = vsel %vm729_vm1, %v776_v33, %v778_v52  ;;  %v5076_v20 = vpack.c.bf16 %v1632_v60, %v1631_v63  ;;  %v1275_v33 = vld [vmem:[#allocation2 + $0xf0] sm:$0xff]  ;;  %3585 = vmatprep.subr.bf16.mxu0 %v3933_v3  ;;  %v1638_v63 = vld [vmem:[%s6414_s1 + $0x348] sm:$0xff] }
  0xd4   : > { %1001 = vst.msk [vmem:[#allocation2 + $0x400] sm:$0xff] %vm648_vm0, %v912_v4  ;;  %1112 = vst.msk [vmem:[#allocation2 + $0x388] sm:$0xff] %vm648_vm0, %v912_v4  ;;  %v1281_v60 = vld [vmem:[#allocation2 + $0x120] sm:$0xff]  ;;  %v5209_v7 = vld [vmem:[%s6414_s1 + $0x250] sm:$0xff] }
  0xd5   : > { %1223 = vst.msk [vmem:[#allocation2 + $0x310] sm:$0xff] %vm648_vm0, %v912_v4  ;;  %857 = vst.msk [vmem:[#allocation2 + $0x440] sm:$0xff] %vm648_vm0, %v769_v10  ;;  %v1254_v4 = vld [vmem:[#allocation2 + $0x48] sm:$0xff]  ;;  %3724 = vmatpush1.bf16.msra.mxu1 %v5076_v20  ;;  %v5220_v12 = vld [vmem:[%s4401_s22 + $0x140] sm:$0xff] }
  0xd6   : > { %1074 = vst.msk [vmem:[#allocation2 + $0x3c8] sm:$0xff] %vm648_vm0, %v769_v10  ;;  %1185 = vst.msk [vmem:[#allocation2 + $0x350] sm:$0xff] %vm648_vm0, %v769_v10  ;;  %v1256_v10 = vld [vmem:[#allocation2 + $0x58] sm:$0xff]  ;;  %1754 = vmatmul.mubr.f32.gmra.mrb[2].mxu1 %v1254_v4  ;;  %3709 = vmatprep.subr.bf16.mxu1 %v3933_v3  ;;  %v632_v4 = vld [vmem:[%s4401_s22 + $0x130] sm:$0x3] }
  0xd7   : > { %1002 = vst.msk [vmem:[#allocation2 + $0x448] sm:$0xff] %vm648_vm0, %v914_v11  ;;  %1113 = vst.msk [vmem:[#allocation2 + $0x3d0] sm:$0xff] %vm648_vm0, %v914_v11  ;;  %1979 = vmatmul.mubr.f32.gmra.mrb[2].mxu0 %v1256_v10  ;;  %v5217_v10 = vpack.c.bf16 %v1638_v63, %v1637_v62  ;;  %v938_v13 = vrot.slane %v632_v4, 2  ;;  %v1641_v32 = vld [vmem:[%s6414_s1 + $0x360] sm:$0xff]  ;;  %v1299_v39 = vld [vmem:[#allocation2 + $0x1b0] sm:$0xff] }
  0xd8   : > { %1224 = vst.msk [vmem:[#allocation2 + $0x358] sm:$0xff] %vm648_vm0, %v914_v11  ;;  %858 = vst.msk [vmem:[#allocation2 + $0x488] sm:$0xff] %vm648_vm0, %v772_v16  ;;  %v1264_v11 = vld [vmem:[#allocation2 + $0x98] sm:$0xff]  ;;  %v5324_v50 = vld [vmem:[%s6414_s1 + $0x270] sm:$0xff] }
  0xd9   : > { %1075 = vst.msk [vmem:[#allocation2 + $0x410] sm:$0xff] %vm648_vm0, %v772_v16  ;;  %1186 = vst.msk [vmem:[#allocation2 + $0x398] sm:$0xff] %vm648_vm0, %v772_v16  ;;  %v930_v16 = vrot.slane %v5017_v59, 2  ;;  %1758 = vmatprep.mubr.f32.mxu1 %v1264_v11  ;;  %3725 = vmatpush1.bf16.msra.mxu1 %v5123_v35  ;;  %v793_v11 = vrot.slane %v632_v4, 1  ;;  %v638_v62 = vld [vmem:[%s4401_s22 + $0x160] sm:$0x3] }
  0xda   : > { %1035 = vst.msk [vmem:[#allocation2 + $0x498] sm:$0xff] %vm648_vm0, %v621_v17  ;;  %667 = vst.msk [vmem:[#allocation2 + $0x510] sm:$0xff] %vm648_vm0, %v621_v17  ;;  %1759 = vmatmul.mubr.f32.gmra.mrb[4].mxu1 %v1263_v27  ;;  %3710 = vmatprep.subr.bf16.mxu1 %v3933_v3  ;;  %v5257_v27 = vld [vmem:[%s6414_s1 + $0x260] sm:$0xff]  ;;  %v1310_v4 = vld [vmem:[#allocation2 + $0x208] sm:$0xff] }
  0xdb   : > { %1146 = vst.msk [vmem:[#allocation2 + $0x420] sm:$0xff] %vm648_vm0, %v621_v17  ;;  %1003 = vst.msk [vmem:[#allocation2 + $0x490] sm:$0xff] %vm648_vm0, %v917_v18  ;;  %v1266_v17 = vld [vmem:[#allocation2 + $0xa8] sm:$0xff]  ;;  %v932_v28 = vsel %vm874_vm2, %v930_v16, %v931_v22  ;;  %v796_v16 = vrot.slane %v5220_v12, 1 }
  0xdc   : > { %1114 = vst.msk [vmem:[#allocation2 + $0x418] sm:$0xff] %vm648_vm0, %v917_v18  ;;  %1225 = vst.msk [vmem:[#allocation2 + $0x3a0] sm:$0xff] %vm648_vm0, %v917_v18  ;;  %v5070_v18 = vld [vmem:[%s6414_s1 + $0x220] sm:$0xff]  ;;  %1983 = vmatprep.mubr.f32.mxu0 %v1266_v17  ;;  %v5237_v17 = vld [vmem:[%s4401_s22 + $0x150] sm:$0xff] }
  0xdd   : > { %1036 = vst.msk [vmem:[#allocation2 + $0x4e0] sm:$0xff] %vm648_vm0, %v4939_v30  ;;  %668 = vst.msk [vmem:[#allocation2 + $0x558] sm:$0xff] %vm648_vm0, %v4939_v30  ;;  %v3586_v31 = vpack.c.bf16 %v1602_v19, %v5070_v18  ;;  %1984 = vmatmul.mubr.f32.gmra.mrb[4].mxu0 %v1265_v29  ;;  %3726 = vmatpush1.bf16.msra.mxu1 %v5164_v55  ;;  %v941_v18 = vrot.slane %v5220_v12, 2  ;;  %v1290_v19 = vld [vmem:[#allocation2 + $0x168] sm:$0xff]  ;;  %v800_v34 = vrot.slane %v5237_v17, 1 }
  0xde   : > { %1147 = vst.msk [vmem:[#allocation2 + $0x468] sm:$0xff] %vm648_vm0, %v4939_v30  ;;  %859 = vst.msk [vmem:[#allocation2 + $0x4d0] sm:$0xff] %vm648_vm0, %v774_v37  ;;  %v1273_v30 = vld [vmem:[#allocation2 + $0xe0] sm:$0xff]  ;;  %1988 = vmatprep.mubr.f32.mxu0 %v1275_v33  ;;  %3711 = vmatprep.subr.bf16.mxu1 %v3933_v3  ;;  %v1642_v33 = vld [vmem:[%s6414_s1 + $0x368] sm:$0xff] }
  0xdf   : > { %1076 = vst.msk [vmem:[#allocation2 + $0x458] sm:$0xff] %vm648_vm0, %v774_v37  ;;  %1187 = vst.msk [vmem:[#allocation2 + $0x3e0] sm:$0xff] %vm648_vm0, %v774_v37  ;;  %v790_v37 = vrot.slane %v5063_v15, 1  ;;  %1763 = vmatprep.mubr.f32.mxu1 %v1273_v30  ;;  %3587 = vmatpush1.bf16.msra.mxu0 %v3586_v31  ;;  %v5275_v30 = vld [vmem:[%s6414_s1 + $0x268] sm:$0xff] }
  0xe0   : > { %1004 = vst.msk [vmem:[#allocation2 + $0x4d8] sm:$0xff] %vm648_vm0, %v919_v38  ;;  %1115 = vst.msk [vmem:[#allocation2 + $0x460] sm:$0xff] %vm648_vm0, %v919_v38  ;;  %3588 = vmatprep.subr.bf16.mxu0 %v3933_v3  ;;  %1764 = vmatmul.mubr.f32.gmra.mrb[6].mxu1 %v1272_v43  ;;  %v1301_v43 = vld [vmem:[#allocation2 + $0x1c0] sm:$0xff] }
  0xe1   : > { %1226 = vst.msk [vmem:[#allocation2 + $0x3e8] sm:$0xff] %vm648_vm0, %v919_v38  ;;  %860 = vst.msk [vmem:[#allocation2 + $0x518] sm:$0xff] %vm648_vm0, %v777_v41  ;;  %v935_v38 = vrot.slane %v5063_v15, 2  ;;  %1989 = vmatmul.mubr.f32.gmra.mrb[6].mxu0 %v1274_v47  ;;  %1768 = vmatprep.mubr.f32.mxu1 %v1282_v48  ;;  %v5311_v47 = vpack.c.bf16 %v1642_v33, %v1641_v32  ;;  %v1616_v32 = vld [vmem:[%s6414_s1 + $0x298] sm:$0xff] }
  0xe2   : > { %1077 = vst.msk [vmem:[#allocation2 + $0x4a0] sm:$0xff] %vm648_vm0, %v777_v41  ;;  %1188 = vst.msk [vmem:[#allocation2 + $0x428] sm:$0xff] %vm648_vm0, %v777_v41  ;;  %v788_v41 = vrot.slane %v629_v36, 1  ;;  %3727 = vmatpush1.bf16.msra.mxu1 %v5217_v10 }
  0xe3   : > { %1037 = vst.msk [vmem:[#allocation2 + $0x528] sm:$0xff] %vm648_vm0, %v624_v44  ;;  %669 = vst.msk [vmem:[#allocation2 + $0x5a0] sm:$0xff] %vm648_vm0, %v624_v44  ;;  %3590 = vmatpush1.bf16.msra.mxu0 %v3589_v49  ;;  %3712 = vmatprep.subr.bf16.mxu1 %v3933_v3  ;;  %v1311_v49 = vld [vmem:[#allocation2 + $0x210] sm:$0xff] }
  0xe4   : > { %1148 = vst.msk [vmem:[#allocation2 + $0x4b0] sm:$0xff] %vm648_vm0, %v624_v44  ;;  %1005 = vst.msk [vmem:[#allocation2 + $0x520] sm:$0xff] %vm648_vm0, %v922_v42  ;;  %v5136_v44 = vld [vmem:[%s4401_s22 + $0x128] sm:$0xff]  ;;  %v789_v51 = vsel %vm729_vm1, %v786_v14, %v788_v41  ;;  %3591 = vmatprep.subr.bf16.mxu0 %v3933_v3  ;;  %1769 = vmatmul.mubr.f32.gmra.mrb[8].mxu1 %v1281_v60  ;;  %v1639_v14 = vld [vmem:[%s6414_s1 + $0x350] sm:$0xff] }
  0xe5   : > { %1116 = vst.msk [vmem:[#allocation2 + $0x4a8] sm:$0xff] %vm648_vm0, %v922_v42  ;;  %1227 = vst.msk [vmem:[#allocation2 + $0x430] sm:$0xff] %vm648_vm0, %v922_v42  ;;  %v933_v42 = vrot.slane %v629_v36, 2  ;;  %v791_v45 = vrot.slane %v5136_v44, 1  ;;  %v936_v46 = vrot.slane %v5136_v44, 2  ;;  %1773 = vmatprep.mubr.f32.mxu1 %v1291_v1  ;;  %v5365_v1 = vld [vmem:[%s4401_s22 + $0x170] sm:$0xff] }
  0xe6   : > { %1038 = vst.msk [vmem:[#allocation2 + $0x570] sm:$0xff] %vm648_vm0, %v4999_v53  ;;  %670 = vst.msk [vmem:[#allocation2 + $0x5e8] sm:$0xff] %vm648_vm0, %v4999_v53  ;;  %v635_v36 = vld [vmem:[%s4401_s22 + $0x148] sm:$0x3] }
  0xe7   : > { %1149 = vst.msk [vmem:[#allocation2 + $0x4f8] sm:$0xff] %vm648_vm0, %v4999_v53  ;;  %1039 = vst.msk [vmem:[#allocation2 + $0x5b8] sm:$0xff] %vm648_vm0, %v5017_v59  ;;  %v934_v52 = vsel %vm874_vm2, %v931_v22, %v933_v42  ;;  %v1284_v53 = vld [vmem:[#allocation2 + $0x138] sm:$0xff]  ;;  %v792_v56 = vsel %vm729_vm1, %v790_v37, %v791_v45  ;;  %v794_v22 = vsel %vm729_vm1, %v791_v45, %v793_v11  ;;  %3593 = vmatpush1.bf16.msra.mxu0 %v3592_v2  ;;  %v5307_v42 = vld [vmem:[%s4401_s22 + $0x168] sm:$0xff] }
  0xe8   : > { %671 = vst.msk [vmem:[#allocation2 + $0x630] sm:$0xff] %vm648_vm0, %v5017_v59  ;;  %1150 = vst.msk [vmem:[#allocation2 + $0x540] sm:$0xff] %vm648_vm0, %v5017_v59  ;;  %v937_v59 = vsel %vm874_vm2, %v935_v38, %v936_v46  ;;  %1993 = vmatprep.mubr.f32.mxu0 %v1284_v53  ;;  %v939_v23 = vsel %vm874_vm2, %v936_v46, %v938_v13  ;;  %3594 = vmatprep.subr.bf16.mxu0 %v3933_v3  ;;  %v5296_v37 = vld [vmem:[%s4401_s22 + $0x158] sm:$0xff]  ;;  %v945_v38 = vrot.slane %v5237_v17, 2  ;;  %v1309_v45 = vld [vmem:[#allocation2 + $0x200] sm:$0xff] }
  0xe9   : > { %861 = vst.msk [vmem:[#allocation2 + $0x560] sm:$0xff] %vm648_vm0, %v779_v61  ;;  %1078 = vst.msk [vmem:[#allocation2 + $0x4e8] sm:$0xff] %vm648_vm0, %v779_v61  ;;  %1774 = vmatmul.mubr.f32.gmra.mrb[10].mxu1 %v1290_v19  ;;  %v798_v40 = vrot.slane %v635_v36, 1  ;;  %v943_v41 = vrot.slane %v635_v36, 2  ;;  %v3598_v46 = vpack.c.bf16 %v5275_v30, %v5257_v27  ;;  %v946_v48 = vrot.slane %v5296_v37, 2  ;;  %v1614_v13 = vld [vmem:[%s6414_s1 + $0x288] sm:$0xff] }
  0xea   : > { %1189 = vst.msk [vmem:[#allocation2 + $0x470] sm:$0xff] %vm648_vm0, %v779_v61  ;;  %1006 = vst.msk [vmem:[#allocation2 + $0x568] sm:$0xff] %vm648_vm0, %v924_v0  ;;  %v1293_v61 = vld [vmem:[#allocation2 + $0x180] sm:$0xff]  ;;  %v805_v63 = vrot.slane %v5307_v42, 1  ;;  %v950_v60 = vrot.slane %v5307_v42, 2  ;;  %v948_v2 = vrot.slane %v638_v62, 2 }
  0xeb   : > { %1117 = vst.msk [vmem:[#allocation2 + $0x4f0] sm:$0xff] %vm648_vm0, %v924_v0  ;;  %1228 = vst.msk [vmem:[#allocation2 + $0x478] sm:$0xff] %vm648_vm0, %v924_v0  ;;  %v1283_v0 = vld [vmem:[#allocation2 + $0x130] sm:$0xff]  ;;  %v944_v53 = vsel %vm874_vm2, %v941_v18, %v943_v41  ;;  %v951_v11 = vrot.slane %v5365_v1, 2  ;;  %v1646_v19 = vld [vmem:[%s6414_s1 + $0x388] sm:$0xff] }
  0xec   : > { %862 = vst.msk [vmem:[#allocation2 + $0x5a8] sm:$0xff] %vm648_vm0, %v782_v5  ;;  %1079 = vst.msk [vmem:[#allocation2 + $0x530] sm:$0xff] %vm648_vm0, %v782_v5  ;;  %1994 = vmatmul.mubr.f32.gmra.mrb[8].mxu0 %v1283_v0  ;;  %v803_v0 = vrot.slane %v638_v62, 1  ;;  %v641_v27 = vld [vmem:[%s4401_s22 + $0x178] sm:$0x3]  ;;  %v1615_v30 = vld [vmem:[%s6414_s1 + $0x290] sm:$0xff] }
  0xed   : > { %1190 = vst.msk [vmem:[#allocation2 + $0x4b8] sm:$0xff] %vm648_vm0, %v782_v5  ;;  %1007 = vst.msk [vmem:[#allocation2 + $0x5b0] sm:$0xff] %vm648_vm0, %v927_v6  ;;  %v795_v5 = vrot.slane %v5176_v58, 1  ;;  %1998 = vmatprep.mubr.f32.mxu0 %v1293_v61  ;;  %v1308_v61 = vld [vmem:[#allocation2 + $0x1f8] sm:$0xff]  ;;  %v953_v36 = vrot.slane %v641_v27, 2 }
  0xee   : > { %1118 = vst.msk [vmem:[#allocation2 + $0x538] sm:$0xff] %vm648_vm0, %v927_v6  ;;  %1229 = vst.msk [vmem:[#allocation2 + $0x4c0] sm:$0xff] %vm648_vm0, %v927_v6  ;;  %v940_v6 = vrot.slane %v5176_v58, 2  ;;  %v1620_v62 = vld [vmem:[%s6414_s1 + $0x2b8] sm:$0xff] }
  0xef   : > { %1040 = vst.msk [vmem:[#allocation2 + $0x600] sm:$0xff] %vm648_vm0, %v5045_v9  ;;  %672 = vst.msk [vmem:[#allocation2 + $0x678] sm:$0xff] %vm648_vm0, %v5045_v9  ;;  %v954_v41 = vsel %vm874_vm2, %v951_v11, %v953_v36  ;;  %v1626_v36 = vld [vmem:[%s6414_s1 + $0x2e8] sm:$0xff] }
  0xf0   : > { %1151 = vst.msk [vmem:[#allocation2 + $0x588] sm:$0xff] %vm648_vm0, %v5045_v9  ;;  %1041 = vst.msk [vmem:[#allocation2 + $0x648] sm:$0xff] %vm648_vm0, %v5063_v15  ;;  %v5214_v9 = vld [vmem:[%s6414_s1 + $0x258] sm:$0xff]  ;;  %v942_v29 = vsel %vm874_vm2, %v940_v6, %v941_v18  ;;  %1999 = vmatmul.mubr.f32.gmra.mrb[10].mxu0 %v1292_v24  ;;  %v1645_v18 = vld [vmem:[%s6414_s1 + $0x380] sm:$0xff] }
  0xf1   : > { %673 = vst.msk [vmem:[#allocation2 + $0x6c0] sm:$0xff] %vm648_vm0, %v5063_v15  ;;  %1152 = vst.msk [vmem:[#allocation2 + $0x5d0] sm:$0xff] %vm648_vm0, %v5063_v15  ;;  %v1640_v15 = vld [vmem:[%s6414_s1 + $0x358] sm:$0xff]  ;;  %v1319_v24 = vld [vmem:[#allocation2 + $0x250] sm:$0xff]  ;;  %v5431_v33 = vpack.c.bf16 %v1646_v19, %v1645_v18 }
  0xf2   : > { %863 = vst.msk [vmem:[#allocation2 + $0x5f0] sm:$0xff] %vm648_vm0, %v784_v21  ;;  %1080 = vst.msk [vmem:[#allocation2 + $0x578] sm:$0xff] %vm648_vm0, %v784_v21  ;;  %v5278_v31 = vpack.c.bf16 %v1640_v15, %v1639_v14  ;;  %v1320_v6 = vld [vmem:[#allocation2 + $0x258] sm:$0xff]  ;;  %v1365_v19 = vld [vmem:[#allocation2 + $0x3c0] sm:$0xff] }
  0xf3   : > { %1191 = vst.msk [vmem:[#allocation2 + $0x500] sm:$0xff] %vm648_vm0, %v784_v21  ;;  %1008 = vst.msk [vmem:[#allocation2 + $0x5f8] sm:$0xff] %vm648_vm0, %v929_v25  ;;  %v1302_v21 = vld [vmem:[#allocation2 + $0x1c8] sm:$0xff] }
  0xf4   : > { %1119 = vst.msk [vmem:[#allocation2 + $0x580] sm:$0xff] %vm648_vm0, %v929_v25  ;;  %1230 = vst.msk [vmem:[#allocation2 + $0x508] sm:$0xff] %vm648_vm0, %v929_v25  ;;  %v1300_v25 = vld [vmem:[#allocation2 + $0x1b8] sm:$0xff]  ;;  %2003 = vmatprep.mubr.f32.mxu0 %v1302_v21  ;;  %3728 = vmatpush1.bf16.msra.mxu1 %v5278_v31 }
  0xf5   : > { %864 = vst.msk [vmem:[#allocation2 + $0x638] sm:$0xff] %vm648_vm0, %v787_v26  ;;  %1081 = vst.msk [vmem:[#allocation2 + $0x5c0] sm:$0xff] %vm648_vm0, %v787_v26  ;;  %1778 = vmatprep.mubr.f32.mxu1 %v1300_v25  ;;  %3713 = vmatprep.subr.bf16.mxu1 %v3933_v3  ;;  %v1327_v25 = vld [vmem:[#allocation2 + $0x290] sm:$0xff] }
  0xf6   : > { %1192 = vst.msk [vmem:[#allocation2 + $0x548] sm:$0xff] %vm648_vm0, %v787_v26  ;;  %1009 = vst.msk [vmem:[#allocation2 + $0x640] sm:$0xff] %vm648_vm0, %v932_v28  ;;  %v3595_v26 = vpack.c.bf16 %v5214_v9, %v5209_v7  ;;  %1779 = vmatmul.mubr.f32.gmra.mrb[12].mxu1 %v1299_v39  ;;  %2004 = vmatmul.mubr.f32.gmra.mrb[12].mxu0 %v1301_v43  ;;  %v806_v9 = vrot.slane %v5365_v1, 1  ;;  %v1326_v39 = vld [vmem:[#allocation2 + $0x288] sm:$0xff]  ;;  %v3607_v43 = vpack.c.bf16 %v1616_v32, %v1615_v30 }
  0xf7   : > { %1120 = vst.msk [vmem:[#allocation2 + $0x5c8] sm:$0xff] %vm648_vm0, %v932_v28  ;;  %1231 = vst.msk [vmem:[#allocation2 + $0x550] sm:$0xff] %vm648_vm0, %v932_v28  ;;  %v797_v28 = vsel %vm729_vm1, %v795_v5, %v796_v16  ;;  %1783 = vmatprep.mubr.f32.mxu1 %v1309_v45  ;;  %2008 = vmatprep.mubr.f32.mxu0 %v1311_v49  ;;  %v1318_v5 = vld [vmem:[#allocation2 + $0x248] sm:$0xff] }
  0xf8   : > { %1042 = vst.msk [vmem:[#allocation2 + $0x690] sm:$0xff] %vm648_vm0, %v5136_v44  ;;  %674 = vst.msk [vmem:[#allocation2 + $0x708] sm:$0xff] %vm648_vm0, %v5136_v44  ;;  %3596 = vmatpush1.bf16.msra.mxu0 %v3595_v26  ;;  %3729 = vmatpush1.bf16.msra.mxu1 %v5311_v47  ;;  %v807_v21 = vsel %vm729_vm1, %v805_v63, %v806_v9  ;;  %v1338_v45 = vld [vmem:[#allocation2 + $0x2e8] sm:$0xff] }
  0xf9   : > { %1153 = vst.msk [vmem:[#allocation2 + $0x618] sm:$0xff] %vm648_vm0, %v5136_v44  ;;  %865 = vst.msk [vmem:[#allocation2 + $0x680] sm:$0xff] %vm648_vm0, %v789_v51  ;;  %v801_v44 = vrot.slane %v5296_v37, 1  ;;  %3597 = vmatprep.subr.bf16.mxu0 %v3933_v3  ;;  %3714 = vmatprep.subr.bf16.mxu1 %v3933_v3  ;;  %v1374_v32 = vld [vmem:[#allocation2 + $0x408] sm:$0xff] }
  0xfa   : > { %1082 = vst.msk [vmem:[#allocation2 + $0x608] sm:$0xff] %vm648_vm0, %v789_v51  ;;  %1193 = vst.msk [vmem:[#allocation2 + $0x590] sm:$0xff] %vm648_vm0, %v789_v51  ;;  %v5329_v51 = vld [vmem:[%s6414_s1 + $0x278] sm:$0xff]  ;;  %1784 = vmatmul.mubr.f32.gmra.mrb[14].mxu1 %v1308_v61  ;;  %2009 = vmatmul.mubr.f32.gmra.mrb[14].mxu0 %v1310_v4 }
  0xfb   : > { %1010 = vst.msk [vmem:[#allocation2 + $0x688] sm:$0xff] %vm648_vm0, %v934_v52  ;;  %1121 = vst.msk [vmem:[#allocation2 + $0x610] sm:$0xff] %vm648_vm0, %v934_v52  ;;  %v802_v54 = vsel %vm729_vm1, %v800_v34, %v801_v44  ;;  %v3601_v7 = vpack.c.bf16 %v5329_v51, %v5324_v50  ;;  %v804_v15 = vsel %vm729_vm1, %v801_v44, %v803_v0  ;;  %1788 = vmatprep.mubr.f32.mxu1 %v1318_v5  ;;  %v1328_v44 = vld [vmem:[#allocation2 + $0x298] sm:$0xff]  ;;  %v1649_v50 = vld [vmem:[%s6414_s1 + $0x3a0] sm:$0xff] }
  0xfc   : > { %1232 = vst.msk [vmem:[#allocation2 + $0x598] sm:$0xff] %vm648_vm0, %v934_v52  ;;  %866 = vst.msk [vmem:[#allocation2 + $0x6c8] sm:$0xff] %vm648_vm0, %v792_v56  ;;  %v799_v52 = vsel %vm729_vm1, %v796_v16, %v798_v40  ;;  %3599 = vmatpush1.bf16.msra.mxu0 %v3598_v46  ;;  %v949_v16 = vsel %vm874_vm2, %v946_v48, %v948_v2  ;;  %2013 = vmatprep.mubr.f32.mxu0 %v1320_v6  ;;  %v808_v34 = vrot.slane %v641_v27, 1  ;;  %v1617_v46 = vld [vmem:[%s6414_s1 + $0x2a0] sm:$0xff]  ;;  %v1650_v51 = vld [vmem:[%s6414_s1 + $0x3a8] sm:$0xff] }
  0xfd   : > { %1083 = vst.msk [vmem:[#allocation2 + $0x650] sm:$0xff] %vm648_vm0, %v792_v56  ;;  %1194 = vst.msk [vmem:[#allocation2 + $0x5d8] sm:$0xff] %vm648_vm0, %v792_v56  ;;  %v1643_v56 = vld [vmem:[%s6414_s1 + $0x370] sm:$0xff]  ;;  %3600 = vmatprep.subr.bf16.mxu0 %v3933_v3  ;;  %v5477_v63 = vpack.c.bf16 %v1650_v51, %v1649_v50  ;;  %v1652_v61 = vld [vmem:[%s6414_s1 + $0x3b8] sm:$0xff] }
  0xfe   : > { %1043 = vst.msk [vmem:[#allocation2 + $0x6d8] sm:$0xff] %vm648_vm0, %v5176_v58  ;;  %675 = vst.msk [vmem:[#allocation2 + $0x750] sm:$0xff] %vm648_vm0, %v5176_v58  ;;  %2014 = vmatmul.mubr.f32.gmra.mrb[16].mxu0 %v1319_v24  ;;  %v809_v40 = vsel %vm729_vm1, %v806_v9, %v808_v34  ;;  %v1344_v0 = vld [vmem:[#allocation2 + $0x318] sm:$0xff]  ;;  %v1354_v2 = vld [vmem:[#allocation2 + $0x368] sm:$0xff] }
  0xff   : > { %1154 = vst.msk [vmem:[#allocation2 + $0x660] sm:$0xff] %vm648_vm0, %v5176_v58  ;;  %1011 = vst.msk [vmem:[#allocation2 + $0x6d0] sm:$0xff] %vm648_vm0, %v937_v59  ;;  %v1644_v58 = vld [vmem:[%s6414_s1 + $0x378] sm:$0xff]  ;;  %v1621_v6 = vld [vmem:[%s6414_s1 + $0x2c0] sm:$0xff] }
 0x100   : > { %1122 = vst.msk [vmem:[#allocation2 + $0x658] sm:$0xff] %vm648_vm0, %v937_v59  ;;  %1233 = vst.msk [vmem:[#allocation2 + $0x5e0] sm:$0xff] %vm648_vm0, %v937_v59  ;;  %v947_v59 = vsel %vm874_vm2, %v945_v38, %v946_v48  ;;  %v5385_v14 = vpack.c.bf16 %v1644_v58, %v1643_v56  ;;  %3602 = vmatpush1.bf16.msra.mxu0 %v3601_v7  ;;  %v1648_v38 = vld [vmem:[%s6414_s1 + $0x398] sm:$0xff]  ;;  %v1618_v48 = vld [vmem:[%s6414_s1 + $0x2a8] sm:$0xff] }
 0x101   : > { %1044 = vst.msk [vmem:[#allocation2 + $0x720] sm:$0xff] %vm648_vm0, %v5220_v12  ;;  %676 = vst.msk [vmem:[#allocation2 + $0x798] sm:$0xff] %vm648_vm0, %v5220_v12  ;;  %3603 = vmatprep.subr.bf16.mxu0 %v3933_v3  ;;  %v3610_v56 = vpack.c.bf16 %v1618_v48, %v1617_v46  ;;  %v1347_v58 = vld [vmem:[#allocation2 + $0x330] sm:$0xff]  ;;  %v1356_v5 = vld [vmem:[#allocation2 + $0x378] sm:$0xff] }
 0x102   : > { %1155 = vst.msk [vmem:[#allocation2 + $0x6a8] sm:$0xff] %vm648_vm0, %v5220_v12  ;;  %1045 = vst.msk [vmem:[#allocation2 + $0x768] sm:$0xff] %vm648_vm0, %v5237_v17  ;;  %v1613_v12 = vld [vmem:[%s6414_s1 + $0x280] sm:$0xff]  ;;  %3730 = vmatpush1.bf16.msra.mxu1 %v5385_v14  ;;  %v1622_v7 = vld [vmem:[%s6414_s1 + $0x2c8] sm:$0xff] }
 0x103   : > { %677 = vst.msk [vmem:[#allocation2 + $0x7e0] sm:$0xff] %vm648_vm0, %v5237_v17  ;;  %1156 = vst.msk [vmem:[#allocation2 + $0x6f0] sm:$0xff] %vm648_vm0, %v5237_v17  ;;  %v5392_v17 = vld [vmem:[%s4401_s22 + $0x180] sm:$0xff]  ;;  %v3604_v26 = vpack.c.bf16 %v1614_v13, %v1613_v12  ;;  %3715 = vmatprep.subr.bf16.mxu1 %v3933_v3  ;;  %v1654_v12 = vld [vmem:[%s6414_s1 + $0x3c8] sm:$0xff]  ;;  %v3616_v18 = vpack.c.bf16 %v1622_v7, %v1621_v6 }
 0x104   : > { %867 = vst.msk [vmem:[#allocation2 + $0x710] sm:$0xff] %vm648_vm0, %v794_v22  ;;  %1084 = vst.msk [vmem:[#allocation2 + $0x698] sm:$0xff] %vm648_vm0, %v794_v22  ;;  %v1353_v13 = vld [vmem:[#allocation2 + $0x360] sm:$0xff]  ;;  %v1655_v24 = vld [vmem:[%s6414_s1 + $0x3d0] sm:$0xff]  ;;  %v1054_v6 = vrot.slane %v5392_v17, 1 }
 0x105   : > { %1195 = vst.msk [vmem:[#allocation2 + $0x620] sm:$0xff] %vm648_vm0, %v794_v22  ;;  %1012 = vst.msk [vmem:[#allocation2 + $0x718] sm:$0xff] %vm648_vm0, %v939_v23  ;;  %v952_v22 = vsel %vm874_vm2, %v950_v60, %v951_v11  ;;  %3605 = vmatpush1.bf16.msra.mxu0 %v3604_v26  ;;  %v1651_v60 = vld [vmem:[%s6414_s1 + $0x3b0] sm:$0xff]  ;;  %v1653_v11 = vld [vmem:[%s6414_s1 + $0x3c0] sm:$0xff] }
 0x106   : > { %1123 = vst.msk [vmem:[#allocation2 + $0x6a0] sm:$0xff] %vm648_vm0, %v939_v23  ;;  %1234 = vst.msk [vmem:[#allocation2 + $0x628] sm:$0xff] %vm648_vm0, %v939_v23  ;;  %v1317_v23 = vld [vmem:[#allocation2 + $0x240] sm:$0xff]  ;;  %3606 = vmatprep.subr.bf16.mxu0 %v3933_v3  ;;  %3731 = vmatpush1.bf16.msra.mxu1 %v5431_v33  ;;  %v5494_v9 = vpack.c.bf16 %v1652_v61, %v1651_v60  ;;  %v1362_v26 = vld [vmem:[#allocation2 + $0x3a8] sm:$0xff] }
 0x107   : > { %868 = vst.msk [vmem:[#allocation2 + $0x758] sm:$0xff] %vm648_vm0, %v797_v28  ;;  %1085 = vst.msk [vmem:[#allocation2 + $0x6e0] sm:$0xff] %vm648_vm0, %v797_v28  ;;  %1789 = vmatmul.mubr.f32.gmra.mrb[16].mxu1 %v1317_v23  ;;  %3716 = vmatprep.subr.bf16.mxu1 %v3933_v3  ;;  %v5511_v23 = vpack.c.bf16 %v1654_v12, %v1653_v11  ;;  %v1364_v27 = vld [vmem:[#allocation2 + $0x3b8] sm:$0xff]  ;;  %v1625_v34 = vld [vmem:[%s6414_s1 + $0x2e0] sm:$0xff] }
 0x108   : > { %1196 = vst.msk [vmem:[#allocation2 + $0x668] sm:$0xff] %vm648_vm0, %v797_v28  ;;  %1013 = vst.msk [vmem:[#allocation2 + $0x760] sm:$0xff] %vm648_vm0, %v942_v29  ;;  %v5421_v28 = vld [vmem:[%s4401_s22 + $0x188] sm:$0xff]  ;;  %1793 = vmatprep.mubr.f32.mxu1 %v1327_v25  ;;  %v1656_v25 = vld [vmem:[%s6414_s1 + $0x3d8] sm:$0xff] }
 0x109   : > { %1124 = vst.msk [vmem:[#allocation2 + $0x6e8] sm:$0xff] %vm648_vm0, %v942_v29  ;;  %1235 = vst.msk [vmem:[#allocation2 + $0x670] sm:$0xff] %vm648_vm0, %v942_v29  ;;  %v1329_v29 = vld [vmem:[#allocation2 + $0x2a0] sm:$0xff]  ;;  %3608 = vmatpush1.bf16.msra.mxu0 %v3607_v43  ;;  %v1383_v43 = vld [vmem:[#allocation2 + $0x450] sm:$0xff]  ;;  %v1055_v7 = vrot.slane %v5421_v28, 1 }
 0x10a   : > { %1046 = vst.msk [vmem:[#allocation2 + $0x7b0] sm:$0xff] %vm648_vm0, %v5296_v37  ;;  %678 = vst.msk [vmem:[#allocation2 + $0x828] sm:$0xff] %vm648_vm0, %v5296_v37  ;;  %2018 = vmatprep.mubr.f32.mxu0 %v1329_v29  ;;  %3609 = vmatprep.subr.bf16.mxu0 %v3933_v3  ;;  %v1372_v29 = vld [vmem:[#allocation2 + $0x3f8] sm:$0xff]  ;;  %v1659_v50 = vld [vmem:[%s6414_s1 + $0x3f0] sm:$0xff] }
 0x10b   : > { %1157 = vst.msk [vmem:[#allocation2 + $0x738] sm:$0xff] %vm648_vm0, %v5296_v37  ;;  %1047 = vst.msk [vmem:[#allocation2 + $0x7f8] sm:$0xff] %vm648_vm0, %v5307_v42  ;;  %v1647_v37 = vld [vmem:[%s6414_s1 + $0x390] sm:$0xff]  ;;  %1794 = vmatmul.mubr.f32.gmra.mrb[18].mxu1 %v1326_v39  ;;  %2019 = vmatmul.mubr.f32.gmra.mrb[18].mxu0 %v1328_v44  ;;  %v1658_v39 = vld [vmem:[%s6414_s1 + $0x3e8] sm:$0xff] }
 0x10c   : > { %679 = vst.msk [vmem:[#allocation2 + $0x870] sm:$0xff] %vm648_vm0, %v5307_v42  ;;  %1158 = vst.msk [vmem:[#allocation2 + $0x780] sm:$0xff] %vm648_vm0, %v5307_v42  ;;  %v1336_v42 = vld [vmem:[#allocation2 + $0x2d8] sm:$0xff]  ;;  %v5460_v49 = vpack.c.bf16 %v1648_v38, %v1647_v37  ;;  %2023 = vmatprep.mubr.f32.mxu0 %v1338_v45  ;;  %v5528_v37 = vpack.c.bf16 %v1656_v25, %v1655_v24  ;;  %v1657_v38 = vld [vmem:[%s6414_s1 + $0x3e0] sm:$0xff] }
 0x10d   : > { %869 = vst.msk [vmem:[#allocation2 + $0x7a0] sm:$0xff] %vm648_vm0, %v799_v52  ;;  %1086 = vst.msk [vmem:[#allocation2 + $0x728] sm:$0xff] %vm648_vm0, %v799_v52  ;;  %1798 = vmatprep.mubr.f32.mxu1 %v1336_v42  ;;  %3611 = vmatpush1.bf16.msra.mxu0 %v3610_v56  ;;  %v1381_v44 = vld [vmem:[#allocation2 + $0x440] sm:$0xff]  ;;  %v3622_v42 = vpack.c.bf16 %v1626_v36, %v1625_v34  ;;  %v1627_v45 = vld [vmem:[%s6414_s1 + $0x2f0] sm:$0xff]  ;;  %v5545_v48 = vpack.c.bf16 %v1658_v39, %v1657_v38 }
 0x10e   : > { %1197 = vst.msk [vmem:[#allocation2 + $0x6b0] sm:$0xff] %vm648_vm0, %v799_v52  ;;  %1014 = vst.msk [vmem:[#allocation2 + $0x7a8] sm:$0xff] %vm648_vm0, %v944_v53  ;;  %v1335_v52 = vld [vmem:[#allocation2 + $0x2d0] sm:$0xff]  ;;  %3732 = vmatpush1.bf16.msra.mxu1 %v5460_v49  ;;  %3612 = vmatprep.subr.bf16.mxu0 %v3933_v3  ;;  %v1628_v46 = vld [vmem:[%s6414_s1 + $0x2f8] sm:$0xff] }
 0x10f   : > { %1125 = vst.msk [vmem:[#allocation2 + $0x730] sm:$0xff] %vm648_vm0, %v944_v53  ;;  %1236 = vst.msk [vmem:[#allocation2 + $0x6b8] sm:$0xff] %vm648_vm0, %v944_v53  ;;  %v1337_v53 = vld [vmem:[#allocation2 + $0x2e0] sm:$0xff]  ;;  %1799 = vmatmul.mubr.f32.gmra.mrb[20].mxu1 %v1335_v52  ;;  %3717 = vmatprep.subr.bf16.mxu1 %v3933_v3  ;;  %v1660_v51 = vld [vmem:[%s6414_s1 + $0x3f8] sm:$0xff] }
 0x110   : > { %870 = vst.msk [vmem:[#allocation2 + $0x7e8] sm:$0xff] %vm648_vm0, %v802_v54  ;;  %1087 = vst.msk [vmem:[#allocation2 + $0x770] sm:$0xff] %vm648_vm0, %v802_v54  ;;  %2024 = vmatmul.mubr.f32.gmra.mrb[20].mxu0 %v1337_v53  ;;  %v1380_v52 = vld [vmem:[#allocation2 + $0x438] sm:$0xff]  ;;  %v1661_v53 = vld [vmem:[%s6414_s1 + $0x400] sm:$0xff]  ;;  %v5562_v60 = vpack.c.bf16 %v1660_v51, %v1659_v50 }
 0x111   : > { %1198 = vst.msk [vmem:[#allocation2 + $0x6f8] sm:$0xff] %vm648_vm0, %v802_v54  ;;  %1015 = vst.msk [vmem:[#allocation2 + $0x7f0] sm:$0xff] %vm648_vm0, %v947_v59  ;;  %v1345_v54 = vld [vmem:[#allocation2 + $0x320] sm:$0xff]  ;;  %2028 = vmatprep.mubr.f32.mxu0 %v1347_v58  ;;  %v1382_v56 = vld [vmem:[#allocation2 + $0x448] sm:$0xff] }
 0x112   : > { %1126 = vst.msk [vmem:[#allocation2 + $0x778] sm:$0xff] %vm648_vm0, %v947_v59  ;;  %1237 = vst.msk [vmem:[#allocation2 + $0x700] sm:$0xff] %vm648_vm0, %v947_v59  ;;  %v1619_v59 = vld [vmem:[%s6414_s1 + $0x2b0] sm:$0xff]  ;;  %1803 = vmatprep.mubr.f32.mxu1 %v1345_v54  ;;  %3733 = vmatpush1.bf16.msra.mxu1 %v5477_v63  ;;  %v1662_v54 = vld [vmem:[%s6414_s1 + $0x408] sm:$0xff] }
 0x113   : > { %1048 = vst.msk [vmem:[#allocation2 + $0x840] sm:$0xff] %vm648_vm0, %v5365_v1  ;;  %680 = vst.msk [vmem:[#allocation2 + $0x8b8] sm:$0xff] %vm648_vm0, %v5365_v1  ;;  %v3613_v4 = vpack.c.bf16 %v1620_v62, %v1619_v59  ;;  %1804 = vmatmul.mubr.f32.gmra.mrb[22].mxu1 %v1344_v0  ;;  %3718 = vmatprep.subr.bf16.mxu1 %v3933_v3  ;;  %v1390_v58 = vld [vmem:[#allocation2 + $0x488] sm:$0xff]  ;;  %v3625_v59 = vpack.c.bf16 %v1628_v46, %v1627_v45  ;;  %v1392_v62 = vld [vmem:[#allocation2 + $0x498] sm:$0xff] }
 0x114   : > { %1159 = vst.msk [vmem:[#allocation2 + $0x7c8] sm:$0xff] %vm648_vm0, %v5365_v1  ;;  %871 = vst.msk [vmem:[#allocation2 + $0x830] sm:$0xff] %vm648_vm0, %v804_v15  ;;  %v1346_v1 = vld [vmem:[#allocation2 + $0x328] sm:$0xff]  ;;  %1808 = vmatprep.mubr.f32.mxu1 %v1354_v2  ;;  %v5565_v61 = vpack.c.bf16 %v1662_v54, %v1661_v53  ;;  %v1389_v0 = vld [vmem:[#allocation2 + $0x480] sm:$0xff] }
 0x115   : > { %1088 = vst.msk [vmem:[#allocation2 + $0x7b8] sm:$0xff] %vm648_vm0, %v804_v15  ;;  %1199 = vst.msk [vmem:[#allocation2 + $0x740] sm:$0xff] %vm648_vm0, %v804_v15  ;;  %2029 = vmatmul.mubr.f32.gmra.mrb[22].mxu0 %v1346_v1  ;;  %v1355_v15 = vld [vmem:[#allocation2 + $0x370] sm:$0xff]  ;;  %v1400_v11 = vld [vmem:[#allocation2 + $0x4d8] sm:$0xff] }
 0x116   : > { %1016 = vst.msk [vmem:[#allocation2 + $0x838] sm:$0xff] %vm648_vm0, %v949_v16  ;;  %1127 = vst.msk [vmem:[#allocation2 + $0x7c0] sm:$0xff] %vm648_vm0, %v949_v16  ;;  %2033 = vmatprep.mubr.f32.mxu0 %v1356_v5  ;;  %3614 = vmatpush1.bf16.msra.mxu0 %v3613_v4  ;;  %v1391_v1 = vld [vmem:[#allocation2 + $0x490] sm:$0xff]  ;;  %v1401_v4 = vld [vmem:[#allocation2 + $0x4e0] sm:$0xff] }
 0x117   : > { %1238 = vst.msk [vmem:[#allocation2 + $0x748] sm:$0xff] %vm648_vm0, %v949_v16  ;;  %1049 = vst.msk [vmem:[#allocation2 + $0x888] sm:$0xff] %vm648_vm0, %v5392_v17  ;;  %v1363_v16 = vld [vmem:[#allocation2 + $0x3b0] sm:$0xff]  ;;  %3615 = vmatprep.subr.bf16.mxu0 %v3933_v3  ;;  %3734 = vmatpush1.bf16.msra.mxu1 %v5494_v9  ;;  %v1398_v5 = vld [vmem:[#allocation2 + $0x4c8] sm:$0xff] }
 0x118   : > { %1160 = vst.msk [vmem:[#allocation2 + $0x810] sm:$0xff] %vm648_vm0, %v5392_v17  ;;  %872 = vst.msk [vmem:[#allocation2 + $0x878] sm:$0xff] %vm648_vm0, %v807_v21  ;;  %1809 = vmatmul.mubr.f32.gmra.mrb[24].mxu1 %v1353_v13  ;;  %3719 = vmatprep.subr.bf16.mxu1 %v3933_v3  ;;  %v1399_v2 = vld [vmem:[#allocation2 + $0x4d0] sm:$0xff]  ;;  %v1408_v12 = vld [vmem:[#allocation2 + $0x518] sm:$0xff] }
 0x119   : > { %1089 = vst.msk [vmem:[#allocation2 + $0x800] sm:$0xff] %vm648_vm0, %v807_v21  ;;  %1200 = vst.msk [vmem:[#allocation2 + $0x788] sm:$0xff] %vm648_vm0, %v807_v21  ;;  %v1623_v21 = vld [vmem:[%s6414_s1 + $0x2d0] sm:$0xff]  ;;  %2034 = vmatmul.mubr.f32.gmra.mrb[24].mxu0 %v1355_v15  ;;  %1813 = vmatprep.mubr.f32.mxu1 %v1363_v16  ;;  %v1410_v13 = vld [vmem:[#allocation2 + $0x528] sm:$0xff]  ;;  %v1056_v15 = vsel %vm729_vm1, %v1054_v6, %v1055_v7 }
 0x11a   : > { %1017 = vst.msk [vmem:[#allocation2 + $0x880] sm:$0xff] %vm648_vm0, %v952_v22  ;;  %1128 = vst.msk [vmem:[#allocation2 + $0x808] sm:$0xff] %vm648_vm0, %v952_v22  ;;  %2038 = vmatprep.mubr.f32.mxu0 %v1365_v19  ;;  %3617 = vmatpush1.bf16.msra.mxu0 %v3616_v18  ;;  %v5576_v16 = vld [vmem:[%s4401_s22 + $0x190] sm:$0x3]  ;;  %v1418_v34 = vld [vmem:[#allocation2 + $0x568] sm:$0xff] }
 0x11b   : > { %1239 = vst.msk [vmem:[#allocation2 + $0x790] sm:$0xff] %vm648_vm0, %v952_v22  ;;  %1050 = vst.msk [vmem:[#allocation2 + $0x8d0] sm:$0xff] %vm648_vm0, %v5421_v28  ;;  %v1624_v22 = vld [vmem:[%s6414_s1 + $0x2d8] sm:$0xff]  ;;  %3618 = vmatprep.subr.bf16.mxu0 %v3933_v3  ;;  %3735 = vmatpush1.bf16.msra.mxu1 %v5511_v23  ;;  %v1407_v18 = vld [vmem:[#allocation2 + $0x510] sm:$0xff]  ;;  %v1057_v19 = vrot.slane %v5576_v16, 1 }
 0x11c   : > { %1161 = vst.msk [vmem:[#allocation2 + $0x858] sm:$0xff] %vm648_vm0, %v5421_v28  ;;  %873 = vst.msk [vmem:[#allocation2 + $0x8c0] sm:$0xff] %vm648_vm0, %v809_v40  ;;  %v3619_v30 = vpack.c.bf16 %v1624_v22, %v1623_v21  ;;  %1814 = vmatmul.mubr.f32.gmra.mrb[26].mxu1 %v1362_v26  ;;  %3720 = vmatprep.subr.bf16.mxu1 %v3933_v3  ;;  %v1409_v21 = vld [vmem:[#allocation2 + $0x520] sm:$0xff]  ;;  %v1419_v24 = vld [vmem:[#allocation2 + $0x570] sm:$0xff] }
 0x11d   : > { %1090 = vst.msk [vmem:[#allocation2 + $0x848] sm:$0xff] %vm648_vm0, %v809_v40  ;;  %1201 = vst.msk [vmem:[#allocation2 + $0x7d0] sm:$0xff] %vm648_vm0, %v809_v40  ;;  %2039 = vmatmul.mubr.f32.gmra.mrb[26].mxu0 %v1364_v27  ;;  %1818 = vmatprep.mubr.f32.mxu1 %v1372_v29  ;;  %v1371_v40 = vld [vmem:[#allocation2 + $0x3f0] sm:$0xff]  ;;  %v1417_v22 = vld [vmem:[#allocation2 + $0x560] sm:$0xff]  ;;  %v1058_v25 = vsel %vm729_vm1, %v1055_v7, %v1057_v19 }
 0x11e   : > { %1018 = vst.msk [vmem:[#allocation2 + $0x8c8] sm:$0xff] %vm648_vm0, %v954_v41  ;;  %1129 = vst.msk [vmem:[#allocation2 + $0x850] sm:$0xff] %vm648_vm0, %v954_v41  ;;  %2043 = vmatprep.mubr.f32.mxu0 %v1374_v32  ;;  %3620 = vmatpush1.bf16.msra.mxu0 %v3619_v30  ;;  %v5583_v26 = vld [vmem:[%s4401_s22 + $0x198] sm:$0xff]  ;;  %v5586_v27 = vld [vmem:[%s4401_s22 + $0x1a0] sm:$0xff] }
 0x11f   : > { %1240 = vst.msk [vmem:[#allocation2 + $0x7d8] sm:$0xff] %vm648_vm0, %v954_v41  ;;  %v1373_v41 = vld [vmem:[#allocation2 + $0x400] sm:$0xff]  ;;  %3621 = vmatprep.subr.bf16.mxu0 %v3933_v3  ;;  %3736 = vmatpush1.bf16.msra.mxu1 %v5528_v37  ;;  %1202 = vst.msk [vmem:[#allocation2 + $0x818] sm:$0xff] %vm648_vm0, %v1056_v15  ;;  %v1416_v29 = vld [vmem:[#allocation2 + $0x558] sm:$0xff]  ;;  %v1167_v30 = vrot.slane %v5583_v26, 1  ;;  %v1168_v32 = vrot.slane %v5586_v27, 1 }
 0x120   : > { %1819 = vmatmul.mubr.f32.gmra.mrb[28].mxu1 %v1371_v40  ;;  %3721 = vmatprep.subr.bf16.mxu1 %v3933_v3  ;;  %1091 = vst.msk [vmem:[#allocation2 + $0x890] sm:$0xff] %vm648_vm0, %v1056_v15  ;;  %1203 = vst.msk [vmem:[#allocation2 + $0x860] sm:$0xff] %vm648_vm0, %v1058_v25  ;;  %v1426_v36 = vld [vmem:[#allocation2 + $0x5a8] sm:$0xff]  ;;  %v1428_v38 = vld [vmem:[#allocation2 + $0x5b8] sm:$0xff] }
 0x121   : > { %2044 = vmatmul.mubr.f32.gmra.mrb[28].mxu0 %v1373_v41  ;;  %1823 = vmatprep.mubr.f32.mxu1 %v1381_v44  ;;  %1092 = vst.msk [vmem:[#allocation2 + $0x8d8] sm:$0xff] %vm648_vm0, %v1058_v25  ;;  %1162 = vst.msk [vmem:[#allocation2 + $0x8a0] sm:$0xff] %vm648_vm0, %v5583_v26  ;;  %v1169_v39 = vsel %vm729_vm1, %v1167_v30, %v1168_v32  ;;  %v5597_v40 = vld [vmem:[%s4401_s22 + $0x1a8] sm:$0x3]  ;;  %v1425_v41 = vld [vmem:[#allocation2 + $0x5a0] sm:$0xff]  ;;  %s3936_s22 = smov 124  }
 0x122   : > { %2048 = vmatprep.mubr.f32.mxu0 %v1383_v43  ;;  %3623 = vmatpush1.bf16.msra.mxu0 %v3622_v42  ;;  %1163 = vst.msk [vmem:[#allocation2 + $0x8e8] sm:$0xff] %vm648_vm0, %v5586_v27  ;;  %1204 = vst.msk [vmem:[#allocation2 + $0x8a8] sm:$0xff] %vm648_vm0, %v1169_v39  ;;  %v1170_v44 = vrot.slane %v5597_v40, 1  ;;  %v1427_v42 = vld [vmem:[#allocation2 + $0x5b0] sm:$0xff]  ;;  %v1437_v45 = vld [vmem:[#allocation2 + $0x600] sm:$0xff] }
 0x123   : > { %3624 = vmatprep.subr.bf16.mxu0 %v3933_v3  ;;  %3737 = vmatpush1.bf16.msra.mxu1 %v5545_v48  ;;  %v1435_v43 = vld [vmem:[#allocation2 + $0x5f0] sm:$0xff]  ;;  %v1434_v50 = vld [vmem:[#allocation2 + $0x5e8] sm:$0xff]  ;;  %v1436_v51 = vld [vmem:[#allocation2 + $0x5f8] sm:$0xff] }
 0x124   : > { %1824 = vmatmul.mubr.f32.gmra.mrb[30].mxu1 %v1380_v52  ;;  %3722 = vmatprep.subr.bf16.mxu1 %v3933_v3  ;;  %v1171_v46 = vsel %vm729_vm1, %v1168_v32, %v1170_v44  ;;  %v1444_v52 = vld [vmem:[#allocation2 + $0x638] sm:$0xff]  ;;  %v1446_v53 = vld [vmem:[#allocation2 + $0x648] sm:$0xff]  ;;  %v1443_v54 = vld [vmem:[#allocation2 + $0x630] sm:$0xff] }
 0x125   : > { %2049 = vmatmul.mubr.f32.gmra.mrb[30].mxu0 %v1382_v56  ;;  %1828 = vmatprep.mubr.f32.mxu1 %v1390_v58  ;;  %1205 = vst.msk [vmem:[#allocation2 + $0x8f0] sm:$0xff] %vm648_vm0, %v1171_v46  ;;  %v1445_v56 = vld [vmem:[#allocation2 + $0x640] sm:$0xff]  ;;  %v1471_v6 = vld [vmem:[#allocation2 + $0x710] sm:$0xff]  ;;  %v1482_v15 = vld [vmem:[#allocation2 + $0x768] sm:$0xff] }
 0x126   : > { %2053 = vmatprep.mubr.f32.mxu0 %v1392_v62  ;;  %3626 = vmatpush1.bf16.msra.mxu0 %v3625_v59  ;;  %v1453_v58 = vld [vmem:[#allocation2 + $0x680] sm:$0xff]  ;;  %v1455_v59 = vld [vmem:[#allocation2 + $0x690] sm:$0xff]  ;;  %v1452_v62 = vld [vmem:[#allocation2 + $0x678] sm:$0xff] }
 0x127   : > { %3738 = vmatpush1.bf16.msra.mxu1 %v5562_v60  ;;  %3627 = vmatprep.subr.bf16.mxu0 %v3933_v3  ;;  %v1473_v7 = vld [vmem:[#allocation2 + $0x720] sm:$0xff]  ;;  %v1490_v25 = vld [vmem:[#allocation2 + $0x7a8] sm:$0xff]  ;;  %v1500_v30 = vld [vmem:[#allocation2 + $0x7f8] sm:$0xff] }
 0x128   : > { %1829 = vmatmul.mubr.f32.gmra.mrb[32].mxu1 %v1389_v0  ;;  %3676 = vmatprep.subr.bf16.mxu1 %v5565_v61  ;;  %v1454_v0 = vld [vmem:[#allocation2 + $0x688] sm:$0xff]  ;;  %v1481_v19 = vld [vmem:[#allocation2 + $0x760] sm:$0xff]  ;;  %v1507_v39 = vld [vmem:[#allocation2 + $0x830] sm:$0xff] }
 0x129   : > { %2054 = vmatmul.mubr.f32.gmra.mrb[32].mxu0 %v1391_v1  ;;  %1833 = vmatprep.mubr.f32.mxu1 %v1399_v2  ;;  %v1462_v1 = vld [vmem:[#allocation2 + $0x6c8] sm:$0xff]  ;;  %v1464_v2 = vld [vmem:[#allocation2 + $0x6d8] sm:$0xff]  ;;  %v1497_v32 = vld [vmem:[#allocation2 + $0x7e0] sm:$0xff] }
 0x12a   : > { %2058 = vmatprep.mubr.f32.mxu0 %v1401_v4  ;;  %v1461_v4 = vld [vmem:[#allocation2 + $0x6c0] sm:$0xff] }
 0x12c   : > { %1834 = vmatmul.mubr.f32.gmra.mrb[34].mxu1 %v1398_v5  ;;  %v1463_v5 = vld [vmem:[#allocation2 + $0x6d0] sm:$0xff] }
 0x12d   : > { %2059 = vmatmul.mubr.f32.gmra.mrb[34].mxu0 %v1400_v11  ;;  %1838 = vmatprep.mubr.f32.mxu1 %v1408_v12  ;;  %v1470_v11 = vld [vmem:[#allocation2 + $0x708] sm:$0xff]  ;;  %v1472_v12 = vld [vmem:[#allocation2 + $0x718] sm:$0xff] }
 0x12e   : > { %2063 = vmatprep.mubr.f32.mxu0 %v1410_v13  ;;  %v1480_v13 = vld [vmem:[#allocation2 + $0x758] sm:$0xff] }
 0x130   : > { %1839 = vmatmul.mubr.f32.gmra.mrb[36].mxu1 %v1407_v18  ;;  %v1479_v18 = vld [vmem:[#allocation2 + $0x750] sm:$0xff] }
 0x131   : > { %2064 = vmatmul.mubr.f32.gmra.mrb[36].mxu0 %v1409_v21  ;;  %1843 = vmatprep.mubr.f32.mxu1 %v1417_v22  ;;  %v1489_v21 = vld [vmem:[#allocation2 + $0x7a0] sm:$0xff]  ;;  %v1491_v22 = vld [vmem:[#allocation2 + $0x7b0] sm:$0xff] }
 0x132   : > { %2068 = vmatprep.mubr.f32.mxu0 %v1419_v24  ;;  %v1488_v24 = vld [vmem:[#allocation2 + $0x798] sm:$0xff] }
 0x134   : > { %1844 = vmatmul.mubr.f32.gmra.mrb[38].mxu1 %v1416_v29  ;;  %v1498_v29 = vld [vmem:[#allocation2 + $0x7e8] sm:$0xff] }
 0x135   : > { %2069 = vmatmul.mubr.f32.gmra.mrb[38].mxu0 %v1418_v34  ;;  %1848 = vmatprep.mubr.f32.mxu1 %v1426_v36  ;;  %v1093_v34 = vrot.slane %v5392_v17, 2  ;;  %v1094_v36 = vrot.slane %v5421_v28, 2  ;;  %v1508_v17 = vld [vmem:[#allocation2 + $0x838] sm:$0xff]  ;;  %v1518_v28 = vld [vmem:[#allocation2 + $0x888] sm:$0xff] }
 0x136   : > { %2073 = vmatprep.mubr.f32.mxu0 %v1428_v38  ;;  %v1499_v38 = vld [vmem:[#allocation2 + $0x7f0] sm:$0xff] }
 0x137   : > { %v1095_v44 = vsel %vm874_vm2, %v1093_v34, %v1094_v36  ;;  %v1369_v34 = vld [vmem:[#allocation2 + $0x3e0] sm:$0xff] }
 0x138   : > { %1849 = vmatmul.mubr.f32.gmra.mrb[40].mxu1 %v1425_v41  ;;  %v1509_v41 = vld [vmem:[#allocation2 + $0x840] sm:$0xff]  ;;  %1130 = vst.msk [vmem:[#allocation2 + $0x898] sm:$0xff] %vm648_vm0, %v1095_v44  ;;  %1241 = vst.msk [vmem:[#allocation2 + $0x820] sm:$0xff] %vm648_vm0, %v1095_v44  ;;  %v1672_v44 = vld [vmem:[%s6414_s1 + $0x458] sm:$0xff] }
 0x139   : > { %2074 = vmatmul.mubr.f32.gmra.mrb[40].mxu0 %v1427_v42  ;;  %1853 = vmatprep.mubr.f32.mxu1 %v1435_v43  ;;  %v1506_v42 = vld [vmem:[#allocation2 + $0x828] sm:$0xff]  ;;  %v1096_v43 = vrot.slane %v5576_v16, 2  ;;  %v1524_v16 = vld [vmem:[#allocation2 + $0x8b8] sm:$0xff] }
 0x13a   : > { %2078 = vmatprep.mubr.f32.mxu0 %v1437_v45  ;;  %v1516_v45 = vld [vmem:[#allocation2 + $0x878] sm:$0xff] }
 0x13b   : > { %v1097_v46 = vsel %vm874_vm2, %v1094_v36, %v1096_v43  ;;  %v1286_v36 = vld [vmem:[#allocation2 + $0x148] sm:$0xff]  ;;  %v1285_v43 = vld [vmem:[#allocation2 + $0x140] sm:$0xff] }
 0x13c   : > { %1854 = vmatmul.mubr.f32.gmra.mrb[42].mxu1 %v1434_v50  ;;  %1131 = vst.msk [vmem:[#allocation2 + $0x8e0] sm:$0xff] %vm648_vm0, %v1097_v46  ;;  %1242 = vst.msk [vmem:[#allocation2 + $0x868] sm:$0xff] %vm648_vm0, %v1097_v46  ;;  %v1515_v50 = vld [vmem:[#allocation2 + $0x870] sm:$0xff] }
 0x13d   : > { %2079 = vmatmul.mubr.f32.gmra.mrb[42].mxu0 %v1436_v51  ;;  %1858 = vmatprep.mubr.f32.mxu1 %v1444_v52  ;;  %v1517_v51 = vld [vmem:[#allocation2 + $0x880] sm:$0xff] }
 0x13e   : > { %2083 = vmatprep.mubr.f32.mxu0 %v1446_v53  ;;  %v1525_v52 = vld [vmem:[#allocation2 + $0x8c0] sm:$0xff]  ;;  %v1527_v53 = vld [vmem:[#allocation2 + $0x8d0] sm:$0xff] }
 0x140   : > { %1859 = vmatmul.mubr.f32.gmra.mrb[44].mxu1 %v1443_v54  ;;  %v1526_v54 = vld [vmem:[#allocation2 + $0x8c8] sm:$0xff] }
 0x141   : > { %2084 = vmatmul.mubr.f32.gmra.mrb[44].mxu0 %v1445_v56  ;;  %1863 = vmatprep.mubr.f32.mxu1 %v1453_v58  ;;  %v1333_v56 = vld [vmem:[#allocation2 + $0x2c0] sm:$0xff]  ;;  %v1250_v58 = vld [vmem:[#allocation2 + $0x28] sm:$0xff] }
 0x142   : > { %2088 = vmatprep.mubr.f32.mxu0 %v1455_v59  ;;  %v1332_v59 = vld [vmem:[#allocation2 + $0x2b8] sm:$0xff] }
 0x144   : > { %1864 = vmatmul.mubr.f32.gmra.mrb[46].mxu1 %v1452_v62  ;;  %v1663_v62 = vld [vmem:[%s6414_s1 + $0x410] sm:$0xff] }
 0x145   : > { %2089 = vmatmul.mubr.f32.gmra.mrb[46].mxu0 %v1454_v0  ;;  %1868 = vmatprep.mubr.f32.mxu1 %v1462_v1  ;;  %v1664_v0 = vld [vmem:[%s6414_s1 + $0x418] sm:$0xff]  ;;  %v1249_v1 = vld [vmem:[#allocation2 + $0x20] sm:$0xff] }
 0x146   : > { %2093 = vmatprep.mubr.f32.mxu0 %v1464_v2  ;;  %v1342_v2 = vld [vmem:[#allocation2 + $0x308] sm:$0xff] }
 0x148   : > { %1869 = vmatmul.mubr.f32.gmra.mrb[48].mxu1 %v1461_v4  ;;  %v1259_v4 = vld [vmem:[#allocation2 + $0x70] sm:$0xff] }
 0x149   : > { %2094 = vmatmul.mubr.f32.gmra.mrb[48].mxu0 %v1463_v5  ;;  %1873 = vmatprep.mubr.f32.mxu1 %v1471_v6  ;;  %v3679_v5 = vpack.c.bf16 %v1664_v0, %v1663_v62  ;;  %v1341_v6 = vld [vmem:[#allocation2 + $0x300] sm:$0xff] }
 0x14a   : > { %2098 = vmatprep.mubr.f32.mxu0 %v1473_v7  ;;  %v1665_v7 = vld [vmem:[%s6414_s1 + $0x420] sm:$0xff] }
 0x14b   : > { %v1313_v62 = vld [vmem:[#allocation2 + $0x220] sm:$0xff] }
 0x14c   : > { %1874 = vmatmul.mubr.f32.gmra.mrb[50].mxu1 %v1470_v11  ;;  %v1666_v11 = vld [vmem:[%s6414_s1 + $0x428] sm:$0xff] }
 0x14d   : > { %2099 = vmatmul.mubr.f32.gmra.mrb[50].mxu0 %v1472_v12  ;;  %1878 = vmatprep.mubr.f32.mxu1 %v1480_v13  ;;  %v1258_v12 = vld [vmem:[#allocation2 + $0x68] sm:$0xff]  ;;  %v1351_v13 = vld [vmem:[#allocation2 + $0x350] sm:$0xff] }
 0x14e   : > { %2103 = vmatprep.mubr.f32.mxu0 %v1482_v15  ;;  %v1268_v15 = vld [vmem:[#allocation2 + $0xb8] sm:$0xff] }
 0x150   : > { %1879 = vmatmul.mubr.f32.gmra.mrb[52].mxu1 %v1479_v18  ;;  %v3683_v18 = vpack.c.bf16 %v1666_v11, %v1665_v7  ;;  %v1414_v7 = vld [vmem:[#allocation2 + $0x548] sm:$0xff]  ;;  %v1331_v11 = vld [vmem:[#allocation2 + $0x2b0] sm:$0xff] }
 0x151   : > { %2104 = vmatmul.mubr.f32.gmra.mrb[52].mxu0 %v1481_v19  ;;  %1883 = vmatprep.mubr.f32.mxu1 %v1489_v21  ;;  %v1350_v19 = vld [vmem:[#allocation2 + $0x348] sm:$0xff]  ;;  %v1667_v21 = vld [vmem:[%s6414_s1 + $0x430] sm:$0xff] }
 0x152   : > { %2108 = vmatprep.mubr.f32.mxu0 %v1491_v22  ;;  %v1267_v22 = vld [vmem:[#allocation2 + $0xb0] sm:$0xff] }
 0x154   : > { %1884 = vmatmul.mubr.f32.gmra.mrb[54].mxu1 %v1488_v24  ;;  %v1360_v24 = vld [vmem:[#allocation2 + $0x398] sm:$0xff] }
 0x155   : > { %2109 = vmatmul.mubr.f32.gmra.mrb[54].mxu0 %v1490_v25  ;;  %1888 = vmatprep.mubr.f32.mxu1 %v1498_v29  ;;  %v1359_v29 = vld [vmem:[#allocation2 + $0x390] sm:$0xff] }
 0x156   : > { %2113 = vmatprep.mubr.f32.mxu0 %v1500_v30  ;;  %v1669_v30 = vld [vmem:[%s6414_s1 + $0x440] sm:$0xff] }
 0x158   : > { %1889 = vmatmul.mubr.f32.gmra.mrb[56].mxu1 %v1497_v32  ;;  %v1670_v32 = vld [vmem:[%s6414_s1 + $0x448] sm:$0xff] }
 0x159   : > { %2114 = vmatmul.mubr.f32.gmra.mrb[56].mxu0 %v1499_v38  ;;  %1893 = vmatprep.mubr.f32.mxu1 %v1507_v39  ;;  %v3691_v38 = vpack.c.bf16 %v1670_v32, %v1669_v30  ;;  %v1368_v39 = vld [vmem:[#allocation2 + $0x3d8] sm:$0xff]  ;;  %v1449_v30 = vld [vmem:[#allocation2 + $0x660] sm:$0xff]  ;;  %v1459_v32 = vld [vmem:[#allocation2 + $0x6b0] sm:$0xff] }
 0x15a   : > { %2118 = vmatprep.mubr.f32.mxu0 %v1509_v41  ;;  %v1671_v41 = vld [vmem:[%s6414_s1 + $0x450] sm:$0xff] }
 0x15c   : > { %1894 = vmatmul.mubr.f32.gmra.mrb[58].mxu1 %v1506_v42  ;;  %v1207_v42 = vrot.slane %v5586_v27, 2  ;;  %v1377_v27 = vld [vmem:[#allocation2 + $0x420] sm:$0xff] }
 0x15d   : > { %2119 = vmatmul.mubr.f32.gmra.mrb[58].mxu0 %v1508_v17  ;;  %1898 = vmatprep.mubr.f32.mxu1 %v1516_v45  ;;  %v1378_v17 = vld [vmem:[#allocation2 + $0x428] sm:$0xff]  ;;  %v1209_v45 = vrot.slane %v5597_v40, 2 }
 0x15e   : > { %2123 = vmatprep.mubr.f32.mxu0 %v1518_v28  ;;  %v1295_v28 = vld [vmem:[#allocation2 + $0x190] sm:$0xff]  ;;  %v1674_v40 = vld [vmem:[%s6414_s1 + $0x468] sm:$0xff] }
 0x160   : > { %1899 = vmatmul.mubr.f32.gmra.mrb[60].mxu1 %v1515_v50  ;;  %v3695_v50 = vpack.c.bf16 %v1672_v44, %v1671_v41  ;;  %v1477_v41 = vld [vmem:[#allocation2 + $0x740] sm:$0xff]  ;;  %v1394_v44 = vld [vmem:[#allocation2 + $0x4a8] sm:$0xff] }
 0x161   : > { %2124 = vmatmul.mubr.f32.gmra.mrb[60].mxu0 %v1517_v51  ;;  %1903 = vmatprep.mubr.f32.mxu1 %v1525_v52  ;;  %v1294_v51 = vld [vmem:[#allocation2 + $0x188] sm:$0xff]  ;;  %v1387_v52 = vld [vmem:[#allocation2 + $0x470] sm:$0xff] }
 0x162   : > { %2128 = vmatprep.mubr.f32.mxu0 %v1527_v53  ;;  %v1304_v53 = vld [vmem:[#allocation2 + $0x1d8] sm:$0xff] }
 0x164   : > { %1904 = vmatmul.mubr.f32.gmra.mrb[62].mxu1 %v1524_v16 }
 0x165   : > { %2129 = vmatmul.mubr.f32.gmra.mrb[62].mxu0 %v1526_v54  ;;  %2468 = vmatprep.mubr.f32.mxu1 %v1333_v56  ;;  %v1386_v54 = vld [vmem:[#allocation2 + $0x468] sm:$0xff]  ;;  %v1675_v56 = vld [vmem:[%s6414_s1 + $0x470] sm:$0xff] }
 0x166   : > { %2198 = vmatprep.mubr.f32.mxu0 %v1250_v58  ;;  %v1676_v58 = vld [vmem:[%s6414_s1 + $0x478] sm:$0xff] }
 0x167   : > { %v3703_v0 = vpack.c.bf16 %v1676_v58, %v1675_v56  ;;  %v1438_v56 = vld [vmem:[#allocation2 + $0x608] sm:$0xff]  ;;  %v1531_v58 = vld [vmem:[#allocation2 + $0x8f0] sm:$0xff] }
 0x168   : > { %2469 = vmatmul.mubr.f32.vlgmr.msra.gmra.mrb[64].mxu1 %v1332_v59  ;;  %v1396_v59 = vld [vmem:[#allocation2 + $0x4b8] sm:$0xff] }
 0x169   : > { %2199 = vmatmul.mubr.f32.vlgmr.msra.gmra.mrb[0].mxu0 %v1249_v1  ;;  %2473 = vmatprep.mubr.f32.mxu1 %v1342_v2  ;;  %v1395_v1 = vld [vmem:[#allocation2 + $0x4b0] sm:$0xff]  ;;  %v1312_v2 = vld [vmem:[#allocation2 + $0x218] sm:$0xff] }
 0x16a   : > { %3629 = vmatpush1.bf16.msra.mxu0 %v5007_v57  ;;  %2203 = vmatprep.mubr.f32.mxu0 %v1259_v4  ;;  %v1668_v57 = vld [vmem:[%s6414_s1 + $0x438] sm:$0xff]  ;;  %v1405_v4 = vld [vmem:[#allocation2 + $0x500] sm:$0xff] }
 0x16b   : > { %3630 = vmatprep.subr.bf16.mxu0 %v3933_v3  ;;  %3678 = vmatpush3.bf16.msra.mxu1 %v5565_v61  ;;  %v1277_v61 = vld [vmem:[#allocation2 + $0x100] sm:$0xff]  ;;  %v3687_v25 = vpack.c.bf16 %v1668_v57, %v1667_v21  ;;  %v1431_v57 = vld [vmem:[#allocation2 + $0x5d0] sm:$0xff] }
 0x16c   : > { %2474 = vmatmul.mubr.f32.gmra.mrb[66].mxu1 %v1341_v6  ;;  %3680 = vmatprep.subr.bf16.mxu1 %v3679_v5  ;;  %v1321_v6 = vld [vmem:[#allocation2 + $0x260] sm:$0xff] }
 0x16d   : > { %2204 = vmatmul.mubr.f32.gmra.mrb[2].mxu0 %v1258_v12  ;;  %2478 = vmatprep.mubr.f32.mxu1 %v1351_v13  ;;  %v1330_v12 = vld [vmem:[#allocation2 + $0x2a8] sm:$0xff]  ;;  %v1423_v13 = vld [vmem:[#allocation2 + $0x590] sm:$0xff]  ;;  %v1349_v21 = vld [vmem:[#allocation2 + $0x340] sm:$0xff] }
 0x16e   : > { %2208 = vmatprep.mubr.f32.mxu0 %v1268_v15  ;;  %3632 = vmatpush1.bf16.msra.mxu0 %v5076_v20  ;;  %v1276_v20 = vld [vmem:[#allocation2 + $0xf8] sm:$0xff] }
 0x16f   : > { %3633 = vmatprep.subr.bf16.mxu0 %v3933_v3  ;;  %3682 = vmatpush3.bf16.msra.mxu1 %v3679_v5  ;;  %v1322_v5 = vld [vmem:[#allocation2 + $0x268] sm:$0xff]  ;;  %v1340_v15 = vld [vmem:[#allocation2 + $0x2f8] sm:$0xff] }
 0x170   : > { %2479 = vmatmul.mubr.f32.gmra.mrb[68].mxu1 %v1350_v19  ;;  %3684 = vmatprep.subr.bf16.mxu1 %v3683_v18  ;;  %v1432_v19 = vld [vmem:[#allocation2 + $0x5d8] sm:$0xff] }
 0x171   : > { %2209 = vmatmul.mubr.f32.gmra.mrb[4].mxu0 %v1267_v22  ;;  %2483 = vmatprep.mubr.f32.mxu1 %v1360_v24  ;;  %v1441_v22 = vld [vmem:[#allocation2 + $0x620] sm:$0xff]  ;;  %v1358_v24 = vld [vmem:[#allocation2 + $0x388] sm:$0xff] }
 0x172   : > { %2213 = vmatprep.mubr.f32.mxu0 %v1277_v61  ;;  %3635 = vmatpush1.bf16.msra.mxu0 %v5123_v35  ;;  %v1206_v35 = vrot.slane %v5583_v26, 2  ;;  %v1210_v26 = vsel %vm874_vm2, %v1207_v42, %v1209_v45  ;;  %v1440_v61 = vld [vmem:[#allocation2 + $0x618] sm:$0xff]  ;;  %v1402_v45 = vld [vmem:[#allocation2 + $0x4e8] sm:$0xff] }
 0x173   : > { %3636 = vmatprep.subr.bf16.mxu0 %v3933_v3  ;;  %3686 = vmatpush3.bf16.msra.mxu1 %v3683_v18  ;;  %1244 = vst.msk [vmem:[#allocation2 + $0x8f8] sm:$0xff] %vm648_vm0, %v1210_v26  ;;  %v1339_v18 = vld [vmem:[#allocation2 + $0x2f0] sm:$0xff]  ;;  %v1421_v26 = vld [vmem:[#allocation2 + $0x580] sm:$0xff] }
 0x174   : > { %2484 = vmatmul.mubr.f32.gmra.mrb[70].mxu1 %v1359_v29  ;;  %3688 = vmatprep.subr.bf16.mxu1 %v3687_v25  ;;  %v1208_v46 = vsel %vm874_vm2, %v1206_v35, %v1207_v42  ;;  %v1367_v29 = vld [vmem:[#allocation2 + $0x3d0] sm:$0xff]  ;;  %v1476_v35 = vld [vmem:[#allocation2 + $0x738] sm:$0xff]  ;;  %v1486_v42 = vld [vmem:[#allocation2 + $0x788] sm:$0xff] }
 0x175   : > { %2214 = vmatmul.mubr.f32.gmra.mrb[6].mxu0 %v1276_v20  ;;  %2488 = vmatprep.mubr.f32.mxu1 %v1369_v34  ;;  %1243 = vst.msk [vmem:[#allocation2 + $0x8b0] sm:$0xff] %vm648_vm0, %v1208_v46  ;;  %v1376_v20 = vld [vmem:[#allocation2 + $0x418] sm:$0xff]  ;;  %v1458_v34 = vld [vmem:[#allocation2 + $0x6a8] sm:$0xff]  ;;  %v1411_v46 = vld [vmem:[#allocation2 + $0x530] sm:$0xff] }
 0x176   : > { %2218 = vmatprep.mubr.f32.mxu0 %v1286_v36  ;;  %3638 = vmatpush1.bf16.msra.mxu0 %v5164_v55  ;;  %v1673_v55 = vld [vmem:[%s6414_s1 + $0x460] sm:$0xff]  ;;  %v1468_v36 = vld [vmem:[#allocation2 + $0x6f8] sm:$0xff] }
 0x177   : > { %3639 = vmatprep.subr.bf16.mxu0 %v3933_v3  ;;  %3690 = vmatpush3.bf16.msra.mxu1 %v3687_v25  ;;  %v3699_v16 = vpack.c.bf16 %v1674_v40, %v1673_v55  ;;  %v1450_v25 = vld [vmem:[#allocation2 + $0x668] sm:$0xff]  ;;  %v1513_v55 = vld [vmem:[#allocation2 + $0x860] sm:$0xff] }
 0x178   : > { %2489 = vmatmul.mubr.f32.gmra.mrb[72].mxu1 %v1368_v39  ;;  %3692 = vmatprep.subr.bf16.mxu1 %v3691_v38  ;;  %v1467_v39 = vld [vmem:[#allocation2 + $0x6f0] sm:$0xff]  ;;  %v1430_v40 = vld [vmem:[#allocation2 + $0x5c8] sm:$0xff] }
 0x179   : > { %2219 = vmatmul.mubr.f32.gmra.mrb[8].mxu0 %v1285_v43  ;;  %2493 = vmatprep.mubr.f32.mxu1 %v1378_v17  ;;  %v1403_v43 = vld [vmem:[#allocation2 + $0x4f0] sm:$0xff]  ;;  %v1485_v17 = vld [vmem:[#allocation2 + $0x780] sm:$0xff] }
 0x17a   : > { %2223 = vmatprep.mubr.f32.mxu0 %v1295_v28  ;;  %3641 = vmatpush1.bf16.msra.mxu0 %v5217_v10  ;;  %v1303_v10 = vld [vmem:[#allocation2 + $0x1d0] sm:$0xff]  ;;  %v1412_v28 = vld [vmem:[#allocation2 + $0x538] sm:$0xff] }
 0x17b   : > { %3642 = vmatprep.subr.bf16.mxu0 %v3933_v3  ;;  %3694 = vmatpush3.bf16.msra.mxu1 %v3691_v38  ;;  %v1385_v38 = vld [vmem:[#allocation2 + $0x460] sm:$0xff] }
 0x17c   : > { %2494 = vmatmul.mubr.f32.gmra.mrb[74].mxu1 %v1377_v27  ;;  %3696 = vmatprep.subr.bf16.mxu1 %v3695_v50  ;;  %v1420_v27 = vld [vmem:[#allocation2 + $0x578] sm:$0xff] }
 0x17d   : > { %2224 = vmatmul.mubr.f32.gmra.mrb[10].mxu0 %v1294_v51  ;;  %2498 = vmatprep.mubr.f32.mxu1 %v1387_v52  ;;  %v1512_v51 = vld [vmem:[#allocation2 + $0x858] sm:$0xff]  ;;  %v1429_v52 = vld [vmem:[#allocation2 + $0x5c0] sm:$0xff] }
 0x17e   : > { %2228 = vmatprep.mubr.f32.mxu0 %v1304_v53  ;;  %3644 = vmatpush1.bf16.msra.mxu0 %v5278_v31  ;;  %v1404_v31 = vld [vmem:[#allocation2 + $0x4f8] sm:$0xff]  ;;  %v1522_v53 = vld [vmem:[#allocation2 + $0x8a8] sm:$0xff] }
 0x17f   : > { %3645 = vmatprep.subr.bf16.mxu0 %v3933_v3  ;;  %3698 = vmatpush3.bf16.msra.mxu1 %v3695_v50  ;;  %v1504_v50 = vld [vmem:[#allocation2 + $0x818] sm:$0xff] }
 0x180   : > { %2499 = vmatmul.mubr.f32.gmra.mrb[76].mxu1 %v1386_v54  ;;  %3700 = vmatprep.subr.bf16.mxu1 %v3699_v16  ;;  %v1521_v54 = vld [vmem:[#allocation2 + $0x8a0] sm:$0xff] }
 0x181   : > { %2229 = vmatmul.mubr.f32.gmra.mrb[12].mxu0 %v1303_v10  ;;  %2503 = vmatprep.mubr.f32.mxu1 %v1396_v59  ;;  %v1448_v10 = vld [vmem:[#allocation2 + $0x658] sm:$0xff] }
 0x182   : > { %2233 = vmatprep.mubr.f32.mxu0 %v1313_v62  ;;  %3647 = vmatpush1.bf16.msra.mxu0 %v5311_v47  ;;  %v1413_v47 = vld [vmem:[#allocation2 + $0x540] sm:$0xff] }
 0x183   : > { %3648 = vmatprep.subr.bf16.mxu0 %v3933_v3  ;;  %3702 = vmatpush3.bf16.msra.mxu1 %v3699_v16  ;;  %v1439_v16 = vld [vmem:[#allocation2 + $0x610] sm:$0xff] }
 0x184   : > { %2504 = vmatmul.mubr.f32.gmra.mrb[78].mxu1 %v1395_v1  ;;  %3704 = vmatprep.subr.bf16.mxu1 %v3703_v0  ;;  %v1447_v1 = vld [vmem:[#allocation2 + $0x650] sm:$0xff] }
 0x185   : > { %2234 = vmatmul.mubr.f32.gmra.mrb[14].mxu0 %v1312_v2  ;;  %2508 = vmatprep.mubr.f32.mxu1 %v1405_v4  ;;  %v1253_v2 = vld [vmem:[#allocation2 + $0x40] sm:$0xff] }
 0x186   : > { %2238 = vmatprep.mubr.f32.mxu0 %v1322_v5  ;;  %3650 = vmatpush1.bf16.msra.mxu0 %v5385_v14  ;;  %v1422_v14 = vld [vmem:[#allocation2 + $0x588] sm:$0xff]  ;;  %v1457_v4 = vld [vmem:[#allocation2 + $0x6a0] sm:$0xff] }
 0x187   : > { %3651 = vmatprep.subr.bf16.mxu0 %v3933_v3  ;;  %3706 = vmatpush3.bf16.msra.mxu1 %v3703_v0  ;;  %v1530_v0 = vld [vmem:[#allocation2 + $0x8e8] sm:$0xff] }
 0x188   : > { %2509 = vmatmul.mubr.f32.gmra.mrb[80].mxu1 %v1404_v31  ;;  %3473 = vmatprep.subr.mxu1 %v3934_v8 }
 0x189   : > { %2239 = vmatmul.mubr.f32.gmra.mrb[16].mxu0 %v1321_v6  ;;  %2513 = vmatprep.mubr.f32.mxu1 %v1414_v7  ;;  %v1262_v6 = vld [vmem:[#allocation2 + $0x88] sm:$0xff]  ;;  %v1456_v7 = vld [vmem:[#allocation2 + $0x698] sm:$0xff] }
 0x18a   : > { %2243 = vmatprep.mubr.f32.mxu0 %v1331_v11  ;;  %3653 = vmatpush1.bf16.msra.mxu0 %v5431_v33  ;;  %v1348_v33 = vld [vmem:[#allocation2 + $0x338] sm:$0xff]  ;;  %v1271_v11 = vld [vmem:[#allocation2 + $0xd0] sm:$0xff] }
 0x18b   : > { %3654 = vmatprep.subr.bf16.mxu0 %v3933_v3 }
 0x18c   : > { %2514 = vmatmul.mubr.f32.gmra.mrb[82].mxu1 %v1413_v47  ;;  %v1466_v47 = vld [vmem:[#allocation2 + $0x6e8] sm:$0xff] }
 0x18d   : > { %2244 = vmatmul.mubr.f32.gmra.mrb[18].mxu0 %v1330_v12  ;;  %2518 = vmatprep.mubr.f32.mxu1 %v1423_v13 }
 0x18e   : > { %2248 = vmatprep.mubr.f32.mxu0 %v1340_v15  ;;  %3656 = vmatpush1.bf16.msra.mxu0 %v5460_v49  ;;  %v1357_v49 = vld [vmem:[#allocation2 + $0x380] sm:$0xff]  ;;  %v1280_v15 = vld [vmem:[#allocation2 + $0x118] sm:$0xff] }
 0x18f   : > { %3657 = vmatprep.subr.bf16.mxu0 %v3933_v3 }
 0x190   : > { %2519 = vmatmul.mubr.f32.gmra.mrb[84].mxu1 %v1422_v14  ;;  %v1465_v14 = vld [vmem:[#allocation2 + $0x6e0] sm:$0xff] }
 0x191   : > { %2249 = vmatmul.mubr.f32.gmra.mrb[20].mxu0 %v1339_v18  ;;  %2523 = vmatprep.mubr.f32.mxu1 %v1432_v19  ;;  %v1289_v18 = vld [vmem:[#allocation2 + $0x160] sm:$0xff]  ;;  %v1475_v19 = vld [vmem:[#allocation2 + $0x730] sm:$0xff] }
 0x192   : > { %2253 = vmatprep.mubr.f32.mxu0 %v1349_v21  ;;  %3659 = vmatpush1.bf16.msra.mxu0 %v5477_v63  ;;  %v1366_v63 = vld [vmem:[#allocation2 + $0x3c8] sm:$0xff] }
 0x193   : > { %3660 = vmatprep.subr.bf16.mxu0 %v3933_v3 }
 0x194   : > { %2524 = vmatmul.mubr.f32.gmra.mrb[86].mxu1 %v1431_v57 }
 0x195   : > { %2254 = vmatmul.mubr.f32.gmra.mrb[22].mxu0 %v1348_v33  ;;  %2528 = vmatprep.mubr.f32.mxu1 %v1441_v22  ;;  %v1298_v33 = vld [vmem:[#allocation2 + $0x1a8] sm:$0xff] }
 0x196   : > { %2258 = vmatprep.mubr.f32.mxu0 %v1358_v24  ;;  %3662 = vmatpush1.bf16.msra.mxu0 %v5494_v9  ;;  %v1375_v9 = vld [vmem:[#allocation2 + $0x410] sm:$0xff]  ;;  %v1474_v22 = vld [vmem:[#allocation2 + $0x728] sm:$0xff] }
 0x197   : > { %3663 = vmatprep.subr.bf16.mxu0 %v3933_v3  ;;  %v5693_v59 = vpop.f32.mrb[0].mxu1  ;;  %v1307_v24 = vld [vmem:[#allocation2 + $0x1f0] sm:$0xff] }
 0x198   : > { %2529 = vmatmul.mubr.f32.gmra.mrb[88].mxu1 %v1440_v61  ;;  %v1752_v62 = vpop.f32.mrb[1].mxu1  ;;  %v1484_v61 = vld [vmem:[#allocation2 + $0x778] sm:$0xff] }
 0x199   : > { %2259 = vmatmul.mubr.f32.gmra.mrb[24].mxu0 %v1357_v49  ;;  %2533 = vmatprep.mubr.f32.mxu1 %v1450_v25  ;;  %v1251_v62 = vld [vmem:[#allocation2 + $0x30] sm:$0xff] }
 0x19a   : > { %2263 = vmatprep.mubr.f32.mxu0 %v1367_v29  ;;  %3665 = vmatpush1.bf16.msra.mxu0 %v5511_v23  ;;  %v1384_v23 = vld [vmem:[#allocation2 + $0x458] sm:$0xff] }
 0x19b   : > { %3666 = vmatprep.subr.bf16.mxu0 %v3933_v3  ;;  %v1316_v29 = vld [vmem:[#allocation2 + $0x238] sm:$0xff] }
 0x19c   : > { %2534 = vmatmul.mubr.f32.gmra.mrb[90].mxu1 %v1449_v30  ;;  %v1483_v30 = vld [vmem:[#allocation2 + $0x770] sm:$0xff] }
 0x19d   : > { %2264 = vmatmul.mubr.f32.gmra.mrb[26].mxu0 %v1366_v63  ;;  %2538 = vmatprep.mubr.f32.mxu1 %v1459_v32  ;;  %v1325_v63 = vld [vmem:[#allocation2 + $0x280] sm:$0xff] }
 0x19e   : > { %2268 = vmatprep.mubr.f32.mxu0 %v1376_v20  ;;  %3668 = vmatpush1.bf16.msra.mxu0 %v5528_v37  ;;  %v1393_v37 = vld [vmem:[#allocation2 + $0x4a0] sm:$0xff] }
 0x19f   : > { %3669 = vmatprep.subr.bf16.mxu0 %v3933_v3  ;;  %v1493_v32 = vld [vmem:[#allocation2 + $0x7c0] sm:$0xff] }
 0x1a0   : > { %2539 = vmatmul.mubr.f32.gmra.mrb[92].mxu1 %v1458_v34 }
 0x1a1   : > { %2269 = vmatmul.mubr.f32.gmra.mrb[28].mxu0 %v1375_v9  ;;  %2543 = vmatprep.mubr.f32.mxu1 %v1468_v36  ;;  %v1334_v9 = vld [vmem:[#allocation2 + $0x2c8] sm:$0xff]  ;;  %v1492_v36 = vld [vmem:[#allocation2 + $0x7b8] sm:$0xff] }
 0x1a2   : > { %2273 = vmatprep.mubr.f32.mxu0 %v1385_v38  ;;  %3671 = vmatpush1.bf16.msra.mxu0 %v5545_v48  ;;  %v1495_v48 = vld [vmem:[#allocation2 + $0x7d0] sm:$0xff] }
 0x1a3   : > { %3672 = vmatprep.subr.bf16.mxu0 %v3933_v3  ;;  %v1494_v3 = vld [vmem:[#allocation2 + $0x7c8] sm:$0xff]  ;;  %v1343_v38 = vld [vmem:[#allocation2 + $0x310] sm:$0xff] }
 0x1a4   : > { %2544 = vmatmul.mubr.f32.gmra.mrb[94].mxu1 %v1467_v39  ;;  %v1502_v39 = vld [vmem:[#allocation2 + $0x808] sm:$0xff] }
 0x1a5   : > { %2274 = vmatmul.mubr.f32.gmra.mrb[30].mxu0 %v1384_v23  ;;  %2548 = vmatprep.mubr.f32.mxu1 %v1477_v41 }
 0x1a6   : > { %2278 = vmatprep.mubr.f32.mxu0 %v1394_v44  ;;  %3674 = vmatpush1.bf16.msra.mxu0 %v5562_v60  ;;  %v1503_v60 = vld [vmem:[#allocation2 + $0x810] sm:$0xff]  ;;  %v1352_v44 = vld [vmem:[#allocation2 + $0x358] sm:$0xff] }
 0x1a8   : > { %2549 = vmatmul.mubr.f32.gmra.mrb[96].mxu1 %v1476_v35  ;;  %v1501_v35 = vld [vmem:[#allocation2 + $0x800] sm:$0xff] }
 0x1a9   : > { %2279 = vmatmul.mubr.f32.gmra.mrb[32].mxu0 %v1393_v37  ;;  %2553 = vmatprep.mubr.f32.mxu1 %v1486_v42  ;;  %v5695_v5 = vpop.f32.mrb[2].mxu1  ;;  %v1361_v37 = vld [vmem:[#allocation2 + $0x3a0] sm:$0xff]  ;;  %v1511_v42 = vld [vmem:[#allocation2 + $0x850] sm:$0xff] }
 0x1aa   : > { %2283 = vmatprep.mubr.f32.mxu0 %v1403_v43  ;;  %v1757_v31 = vpop.f32.mrb[3].mxu1 }
 0x1ab   : > { %v1442_v31 = vld [vmem:[#allocation2 + $0x628] sm:$0xff] }
 0x1ac   : > { %2554 = vmatmul.mubr.f32.gmra.mrb[98].mxu1 %v1485_v17 }
 0x1ad   : > { %2284 = vmatmul.mubr.f32.gmra.mrb[34].mxu0 %v1402_v45  ;;  %2558 = vmatprep.mubr.f32.mxu1 %v1495_v48  ;;  %v5697_v12 = vpop.f32.mrb[4].mxu1  ;;  %v1370_v45 = vld [vmem:[#allocation2 + $0x3e8] sm:$0xff] }
 0x1ae   : > { %2288 = vmatprep.mubr.f32.mxu0 %v1412_v28  ;;  %v1762_v13 = vpop.f32.mrb[5].mxu1  ;;  %v1510_v48 = vld [vmem:[#allocation2 + $0x848] sm:$0xff]  ;;  %v1379_v28 = vld [vmem:[#allocation2 + $0x430] sm:$0xff] }
 0x1b0   : > { %2559 = vmatmul.mubr.f32.gmra.mrb[100].mxu1 %v1494_v3  ;;  %v1520_v3 = vld [vmem:[#allocation2 + $0x898] sm:$0xff] }
 0x1b1   : > { %2289 = vmatmul.mubr.f32.gmra.mrb[36].mxu0 %v1411_v46  ;;  %2563 = vmatprep.mubr.f32.mxu1 %v1504_v50 }
 0x1b2   : > { %2293 = vmatprep.mubr.f32.mxu0 %v1421_v26  ;;  %v1388_v26 = vld [vmem:[#allocation2 + $0x478] sm:$0xff] }
 0x1b3   : > { %v5699_v21 = vpop.f32.mrb[6].mxu1 }
 0x1b4   : > { %2564 = vmatmul.mubr.f32.gmra.mrb[102].mxu1 %v1503_v60  ;;  %v1767_v57 = vpop.f32.mrb[7].mxu1  ;;  %v1519_v60 = vld [vmem:[#allocation2 + $0x890] sm:$0xff] }
 0x1b5   : > { %2294 = vmatmul.mubr.f32.gmra.mrb[38].mxu0 %v1420_v27  ;;  %2568 = vmatprep.mubr.f32.mxu1 %v1513_v55  ;;  %v1397_v27 = vld [vmem:[#allocation2 + $0x4c0] sm:$0xff] }
 0x1b6   : > { %2298 = vmatprep.mubr.f32.mxu0 %v1430_v40  ;;  %v1529_v55 = vld [vmem:[#allocation2 + $0x8e0] sm:$0xff] }
 0x1b7   : > { %v5701_v49 = vpop.f32.mrb[8].mxu1 }
 0x1b8   : > { %2569 = vmatmul.mubr.f32.gmra.mrb[104].mxu1 %v1512_v51  ;;  %v1772_v25 = vpop.f32.mrb[9].mxu1 }
 0x1b9   : > { %2299 = vmatmul.mubr.f32.gmra.mrb[40].mxu0 %v1429_v52  ;;  %2573 = vmatprep.mubr.f32.mxu1 %v1522_v53  ;;  %v1406_v52 = vld [vmem:[#allocation2 + $0x508] sm:$0xff]  ;;  %v1528_v53 = vld [vmem:[#allocation2 + $0x8d8] sm:$0xff] }
 0x1ba   : > { %2303 = vmatprep.mubr.f32.mxu0 %v1439_v16  ;;  %v1415_v16 = vld [vmem:[#allocation2 + $0x550] sm:$0xff]  ;;  %v1288_v25 = vld [vmem:[#allocation2 + $0x158] sm:$0xff] }
 0x1bc   : > { %2574 = vmatmul.mubr.f32.gmra.mrb[106].mxu1 %v1521_v54  ;;  %v5703_v20 = vpop.f32.mrb[10].mxu1  ;;  %v1252_v54 = vld [vmem:[#allocation2 + $0x38] sm:$0xff] }
 0x1bd   : > { %2304 = vmatmul.mubr.f32.gmra.mrb[42].mxu0 %v1438_v56  ;;  %2578 = vmatprep.mubr.f32.mxu1 %v1531_v58  ;;  %v1777_v34 = vpop.f32.mrb[11].mxu1 }
 0x1be   : > { %2308 = vmatprep.mubr.f32.mxu0 %v1448_v10  ;;  %v1424_v10 = vld [vmem:[#allocation2 + $0x598] sm:$0xff]  ;;  %v1505_v34 = vld [vmem:[#allocation2 + $0x820] sm:$0xff] }
 0x1c0   : > { %2579 = vmatmul.mubr.f32.gmra.mrb[108].mxu1 %v1530_v0  ;;  %v1433_v0 = vld [vmem:[#allocation2 + $0x5e0] sm:$0xff] }
 0x1c1   : > { %2309 = vmatmul.mubr.f32.gmra.mrb[44].mxu0 %v1447_v1  ;;  %3425 = vmatprep.mubr.f32.mxu1 %v1253_v2  ;;  %v1261_v1 = vld [vmem:[#allocation2 + $0x80] sm:$0xff] }
 0x1c2   : > { %2313 = vmatprep.mubr.f32.mxu0 %v1457_v4 }
 0x1c4   : > { %3426 = vmatmul.mubr.f32.vlgmr.msra.gmra.mrb[110].mxu1 %v1262_v6  ;;  %v1260_v6 = vld [vmem:[#allocation2 + $0x78] sm:$0xff] }
 0x1c5   : > { %2314 = vmatmul.mubr.f32.gmra.mrb[46].mxu0 %v1456_v7  ;;  %3428 = vmatprep.mubr.f32.mxu1 %v1271_v11  ;;  %v1451_v7 = vld [vmem:[#allocation2 + $0x670] sm:$0xff]  ;;  %v1270_v11 = vld [vmem:[#allocation2 + $0xc8] sm:$0xff] }
 0x1c6   : > { %2318 = vmatprep.mubr.f32.mxu0 %v1466_v47 }
 0x1c8   : > { %3429 = vmatmul.mubr.f32.gmra.mrb[112].mxu1 %v1280_v15  ;;  %v1460_v15 = vld [vmem:[#allocation2 + $0x6b8] sm:$0xff] }
 0x1c9   : > { %2319 = vmatmul.mubr.f32.gmra.mrb[48].mxu0 %v1465_v14  ;;  %3431 = vmatprep.mubr.f32.mxu1 %v1289_v18  ;;  %v5705_v23 = vpop.f32.mrb[12].mxu1  ;;  %v1269_v14 = vld [vmem:[#allocation2 + $0xc0] sm:$0xff] }
 0x1ca   : > { %2323 = vmatprep.mubr.f32.mxu0 %v1475_v19  ;;  %v1782_v41 = vpop.f32.mrb[13].mxu1  ;;  %v1469_v18 = vld [vmem:[#allocation2 + $0x700] sm:$0xff]  ;;  %v1279_v19 = vld [vmem:[#allocation2 + $0x110] sm:$0xff] }
 0x1cb   : > { %v1296_v41 = vld [vmem:[#allocation2 + $0x198] sm:$0xff] }
 0x1cc   : > { %3432 = vmatmul.mubr.f32.gmra.mrb[114].mxu1 %v1298_v33 }
 0x1cd   : > { %2324 = vmatmul.mubr.f32.gmra.mrb[50].mxu0 %v1474_v22  ;;  %3434 = vmatprep.mubr.f32.mxu1 %v1307_v24  ;;  %v5707_v43 = vpop.f32.mrb[14].mxu1  ;;  %v1478_v22 = vld [vmem:[#allocation2 + $0x748] sm:$0xff] }
 0x1ce   : > { %2328 = vmatprep.mubr.f32.mxu0 %v1484_v61  ;;  %v1787_v17 = vpop.f32.mrb[15].mxu1  ;;  %v1278_v24 = vld [vmem:[#allocation2 + $0x108] sm:$0xff]  ;;  %v1487_v61 = vld [vmem:[#allocation2 + $0x790] sm:$0xff] }
 0x1cf   : > { %v1532_v17 = vld [vmem:[#allocation2 + $0x8f8] sm:$0xff] }
 0x1d0   : > { %3435 = vmatmul.mubr.f32.gmra.mrb[116].mxu1 %v1316_v29 }
 0x1d1   : > { %2329 = vmatmul.mubr.f32.gmra.mrb[52].mxu0 %v1483_v30  ;;  %3437 = vmatprep.mubr.f32.mxu1 %v1325_v63  ;;  %v1496_v63 = vld [vmem:[#allocation2 + $0x7d8] sm:$0xff] }
 0x1d2   : > { %2333 = vmatprep.mubr.f32.mxu0 %v1493_v32  ;;  %v1287_v32 = vld [vmem:[#allocation2 + $0x150] sm:$0xff] }
 0x1d4   : > { %3438 = vmatmul.mubr.f32.gmra.mrb[118].mxu1 %v1334_v9  ;;  %v1297_v9 = vld [vmem:[#allocation2 + $0x1a0] sm:$0xff] }
 0x1d5   : > { %2334 = vmatmul.mubr.f32.gmra.mrb[54].mxu0 %v1492_v36  ;;  %3440 = vmatprep.mubr.f32.mxu1 %v1343_v38 }
 0x1d6   : > { %2338 = vmatprep.mubr.f32.mxu0 %v1502_v39  ;;  %v1514_v39 = vld [vmem:[#allocation2 + $0x868] sm:$0xff] }
 0x1d8   : > { %3441 = vmatmul.mubr.f32.gmra.mrb[120].mxu1 %v1352_v44  ;;  %v1523_v44 = vld [vmem:[#allocation2 + $0x8b0] sm:$0xff] }
 0x1d9   : > { %2339 = vmatmul.mubr.f32.gmra.mrb[56].mxu0 %v1501_v35  ;;  %3443 = vmatprep.mubr.f32.mxu1 %v1361_v37  ;;  %v1306_v35 = vld [vmem:[#allocation2 + $0x1e8] sm:$0xff] }
 0x1da   : > { %2343 = vmatprep.mubr.f32.mxu0 %v1511_v42  ;;  %v5709_v46 = vpop.f32.mrb[16].mxu1 }
 0x1db   : > { %v1792_v50 = vpop.f32.mrb[17].mxu1 }
 0x1dc   : > { %3444 = vmatmul.mubr.f32.gmra.mrb[122].mxu1 %v1370_v45  ;;  %v1305_v45 = vld [vmem:[#allocation2 + $0x1e0] sm:$0xff]  ;;  %v1314_v50 = vld [vmem:[#allocation2 + $0x228] sm:$0xff] }
 0x1dd   : > { %2344 = vmatmul.mubr.f32.gmra.mrb[58].mxu0 %v1510_v48  ;;  %3446 = vmatprep.mubr.f32.mxu1 %v1379_v28  ;;  %v1315_v48 = vld [vmem:[#allocation2 + $0x230] sm:$0xff] }
 0x1de   : > { %2348 = vmatprep.mubr.f32.mxu0 %v1520_v3  ;;  %v5711_v40 = vpop.f32.mrb[18].mxu1 }
 0x1df   : > { %v1797_v51 = vpop.f32.mrb[19].mxu1 }
 0x1e0   : > { %3447 = vmatmul.mubr.f32.gmra.mrb[124].mxu1 %v1388_v26  ;;  %v1324_v26 = vld [vmem:[#allocation2 + $0x278] sm:$0xff] }
 0x1e1   : > { %2349 = vmatmul.mubr.f32.gmra.mrb[60].mxu0 %v1519_v60  ;;  %3449 = vmatprep.mubr.f32.mxu1 %v1397_v27 }
 0x1e2   : > { %2353 = vmatprep.mubr.f32.mxu0 %v1529_v55  ;;  %v5713_v56 = vpop.f32.mrb[20].mxu1  ;;  %v1323_v55 = vld [vmem:[#allocation2 + $0x270] sm:$0xff] }
 0x1e3   : > { %v1802_v58 = vpop.f32.mrb[21].mxu1 }
 0x1e4   : > { %3450 = vmatmul.mubr.f32.gmra.mrb[126].mxu1 %v1406_v52 }
 0x1e5   : > { %2354 = vmatmul.mubr.f32.gmra.mrb[62].mxu0 %v1528_v53  ;;  %3452 = vmatprep.mubr.f32.mxu1 %v1415_v16 }
 0x1e6   : > { %2423 = vmatprep.mubr.f32.mxu0 %v1252_v54  ;;  %v5715_v2 = vpop.f32.mrb[22].mxu1 }
 0x1e7   : > { %v1807_v4 = vpop.f32.mrb[23].mxu1 }
 0x1e8   : > { %3453 = vmatmul.mubr.f32.gmra.mrb[128].mxu1 %v1424_v10 }
 0x1e9   : > { %2424 = vmatmul.mubr.f32.vlgmr.msra.gmra.mrb[0].mxu0 %v1251_v62  ;;  %3455 = vmatprep.mubr.f32.mxu1 %v1433_v0 }
 0x1ea   : > { %2428 = vmatprep.mubr.f32.mxu0 %v1261_v1 }
 0x1eb   : > { %v5717_v47 = vpop.f32.mrb[24].mxu1 }
 0x1ec   : > { %3456 = vmatmul.mubr.f32.gmra.mrb[130].mxu1 %v1442_v31  ;;  %v1812_v13 = vpop.f32.mrb[25].mxu1 }
 0x1ed   : > { %2429 = vmatmul.mubr.f32.gmra.mrb[2].mxu0 %v1260_v6  ;;  %3458 = vmatprep.mubr.f32.mxu1 %v1451_v7 }
 0x1ee   : > { %2433 = vmatprep.mubr.f32.mxu0 %v1270_v11 }
 0x1ef   : > { %v5719_v57 = vpop.f32.mrb[26].mxu1 }
 0x1f0   : > { %3459 = vmatmul.mubr.f32.gmra.mrb[132].mxu1 %v1460_v15  ;;  %v1817_v33 = vpop.f32.mrb[27].mxu1 }
 0x1f1   : > { %2434 = vmatmul.mubr.f32.gmra.mrb[4].mxu0 %v1269_v14  ;;  %3461 = vmatprep.mubr.f32.mxu1 %v1469_v18 }
 0x1f2   : > { %2438 = vmatprep.mubr.f32.mxu0 %v1279_v19 }
 0x1f3   : > { %v5721_v29 = vpop.f32.mrb[28].mxu1 }
 0x1f4   : > { %3462 = vmatmul.mubr.f32.gmra.mrb[134].mxu1 %v1478_v22  ;;  %v1822_v30 = vpop.f32.mrb[29].mxu1 }
 0x1f5   : > { %2439 = vmatmul.mubr.f32.gmra.mrb[6].mxu0 %v1278_v24  ;;  %3464 = vmatprep.mubr.f32.mxu1 %v1487_v61 }
 0x1f6   : > { %2443 = vmatprep.mubr.f32.mxu0 %v1288_v25 }
 0x1f7   : > { %v5723_v36 = vpop.f32.mrb[30].mxu1 }
 0x1f8   : > { %3465 = vmatmul.mubr.f32.gmra.mrb[136].mxu1 %v1496_v63  ;;  %v1827_v38 = vpop.f32.mrb[31].mxu1 }
 0x1f9   : > { %2444 = vmatmul.mubr.f32.gmra.mrb[8].mxu0 %v1287_v32  ;;  %3467 = vmatprep.mubr.f32.mxu1 %v1505_v34 }
 0x1fa   : > { %2448 = vmatprep.mubr.f32.mxu0 %v1297_v9 }
 0x1fb   : > { %v5725_v37 = vpop.f32.mrb[32].mxu1 }
 0x1fc   : > { %3468 = vmatmul.mubr.f32.gmra.mrb[138].mxu1 %v1514_v39  ;;  %v1832_v42 = vpop.f32.mrb[33].mxu1 }
 0x1fd   : > { %2449 = vmatmul.mubr.f32.gmra.mrb[10].mxu0 %v1296_v41  ;;  %3470 = vmatprep.mubr.f32.mxu1 %v1523_v44 }
 0x1fe   : > { %2453 = vmatprep.mubr.f32.mxu0 %v1306_v35 }
 0x1ff   : > { %v5727_v28 = vpop.f32.mrb[34].mxu1 }
 0x200   : > { %3471 = vmatmul.mubr.f32.gmra.mrb[140].mxu1 %v1532_v17  ;;  %v1837_v3 = vpop.f32.mrb[35].mxu1 }
 0x201   : > { %2454 = vmatmul.mubr.f32.gmra.mrb[12].mxu0 %v1305_v45  ;;  %3475 = vmatprep.mubr.msk.f32.mxu1 %vm3935_vm3, %v3934_v8 }
 0x202   : > { %2458 = vmatprep.mubr.f32.mxu0 %v1315_v48 }
 0x203   : > { %v5729_v60 = vpop.f32.mrb[36].mxu1 }
 0x204   : > { %v1842_v27 = vpop.f32.mrb[37].mxu1 }
 0x205   : > { %2459 = vmatmul.mubr.f32.gmra.mrb[14].mxu0 %v1314_v50 }
 0x206   : > { %2463 = vmatprep.mubr.f32.mxu0 %v1324_v26 }
 0x207   : > { %v5731_v51 = vpop.f32.mrb[38].mxu1 }
 0x208   : > { %v1847_v52 = vpop.f32.mrb[39].mxu1 }
 0x209   : > { %2464 = vmatmul.mubr.f32.gmra.mrb[16].mxu0 %v1323_v55  ;;  %v5762_v52 = vld [vmem:[%s6415_s2] ss:$0 sm:$0xff] }
 0x20b   : > { %v5733_v53 = vpop.f32.mrb[40].mxu1 }
 0x20c   : > { %v1852_v16 = vpop.f32.mrb[41].mxu1 }
 0x20d   : > { %v1796_v16 = vadd.f32 %v5762_v52, %v5711_v40  ;;  %v1806_v40 = vadd.f32 %v5762_v52, %v5715_v2  ;;  %v1816_v2 = vadd.f32 %v5762_v52, %v5719_v57  ;;  %v1826_v57 = vadd.f32 %v5762_v52, %v5723_v36 }
 0x20e   : > { %v1836_v36 = vadd.f32 %v5762_v52, %v5727_v28 }
 0x20f   : > { %v5735_v54 = vpop.f32.mrb[42].mxu1 }
 0x210   : > { %v1857_v58 = vpop.f32.mrb[43].mxu1 }
 0x213   : > { %v5737_v10 = vpop.f32.mrb[44].mxu1 }
 0x214   : > { %v1862_v62 = vpop.f32.mrb[45].mxu1 }
 0x217   : > { %v5739_v0 = vpop.f32.mrb[46].mxu1 }
 0x218   : > { %v1867_v1 = vpop.f32.mrb[47].mxu1 }
 0x21b   : > { %v5741_v4 = vpop.f32.mrb[48].mxu1 }
 0x21c   : > { %v1872_v31 = vpop.f32.mrb[49].mxu1 }
 0x21f   : > { %v5743_v6 = vpop.f32.mrb[50].mxu1 }
 0x220   : > { %v1877_v7 = vpop.f32.mrb[51].mxu1 }
 0x223   : > { %v5745_v11 = vpop.f32.mrb[52].mxu1 }
 0x224   : > { %v1882_v13 = vpop.f32.mrb[53].mxu1 }
 0x225   : > { %v1801_v13 = vadd.f32 %v5762_v52, %v5713_v56  ;;  %v1811_v56 = vadd.f32 %v5762_v52, %v5717_v47  ;;  %v1821_v47 = vadd.f32 %v5762_v52, %v5721_v29  ;;  %v1831_v29 = vadd.f32 %v5762_v52, %v5725_v37  ;;  %v2880_v37 = vld [vmem:[%s6416_s3] sm:$0xff] }
 0x226   : > { %3474 = vmatpush3.msra.mxu1 %v2880_v37 }
 0x227   : > { %v5747_v15 = vpop.f32.mrb[54].mxu1  ;;  %3478 = vmatprep.subr.mxu1 %v3934_v8 }
 0x228   : > { %v1887_v14 = vpop.f32.mrb[55].mxu1 }
 0x22b   : > { %v5749_v18 = vpop.f32.mrb[56].mxu1 }
 0x22c   : > { %v1892_v19 = vpop.f32.mrb[57].mxu1 }
 0x22f   : > { %v5751_v33 = vpop.f32.mrb[58].mxu1 }
 0x230   : > { %v1897_v22 = vpop.f32.mrb[59].mxu1 }
 0x233   : > { %v5753_v24 = vpop.f32.mrb[60].mxu1 }
 0x234   : > { %v1902_v61 = vpop.f32.mrb[61].mxu1 }
 0x237   : > { %v5755_v25 = vpop.f32.mrb[62].mxu1 }
 0x238   : > { %v1907_v30 = vpop.f32.mrb[63].mxu1 }
 0x23b   : > { %v2470_v63 = vpop.f32.mrb[64].mxu1 }
 0x23c   : > { %v2472_v32 = vpop.f32.mrb[65].mxu1 }
 0x23f   : > { %v2475_v34 = vpop.f32.mrb[66].mxu1 }
 0x240   : > { %v2477_v9 = vpop.f32.mrb[67].mxu1 }
 0x243   : > { %v2480_v38 = vpop.f32.mrb[68].mxu1 }
 0x244   : > { %v2482_v39 = vpop.f32.mrb[69].mxu1 }
 0x247   : > { %v2485_v41 = vpop.f32.mrb[70].mxu1 }
 0x248   : > { %v2487_v44 = vpop.f32.mrb[71].mxu1 }
 0x24b   : > { %v2490_v35 = vpop.f32.mrb[72].mxu1 }
 0x24c   : > { %v2492_v42 = vpop.f32.mrb[73].mxu1 }
 0x24f   : > { %v2495_v17 = vpop.f32.mrb[74].mxu1 }
 0x250   : > { %v2497_v45 = vpop.f32.mrb[75].mxu1 }
 0x253   : > { %v2500_v48 = vpop.f32.mrb[76].mxu1 }
 0x254   : > { %v2502_v3 = vpop.f32.mrb[77].mxu1 }
 0x257   : > { %v2505_v50 = vpop.f32.mrb[78].mxu1 }
 0x258   : > { %v2507_v26 = vpop.f32.mrb[79].mxu1 }
 0x25b   : > { %v5757_v27 = vpop.f32.mrb[80].mxu1 }
 0x25c   : > { %v2512_v55 = vpop.f32.mrb[81].mxu1 }
 0x25f   : > { %v5766_v58 = vpop.f32.mrb[82].mxu1 }
 0x260   : > { %v2245_v62 = vpop.f32.mrb[18].mxu0  ;;  %v2517_v1 = vpop.f32.mrb[83].mxu1 }
 0x261   : > { %v3758_v31 = vadd.f32 %v2245_v62, %v1796_v16  ;;  %v2247_v7 = vpop.f32.mrb[19].mxu0 }
 0x263   : > { %v5770_v14 = vadd.f32 %v3758_v31, %v2470_v63  ;;  %v5772_v19 = vpop.f32.mrb[84].mxu1 }
 0x264   : > { %v2250_v22 = vpop.f32.mrb[20].mxu0  ;;  %v2522_v61 = vpop.f32.mrb[85].mxu1 }
 0x265   : > { %v3761_v30 = vadd.f32 %v2250_v22, %v1801_v13  ;;  %v2252_v32 = vpop.f32.mrb[21].mxu0 }
 0x267   : > { %v5776_v9 = vadd.f32 %v3761_v30, %v2475_v34  ;;  %v5778_v39 = vpop.f32.mrb[86].mxu1 }
 0x268   : > { %v2255_v44 = vpop.f32.mrb[22].mxu0  ;;  %v2527_v42 = vpop.f32.mrb[87].mxu1 }
 0x269   : > { %v3764_v45 = vadd.f32 %v2255_v44, %v1806_v40  ;;  %v2257_v3 = vpop.f32.mrb[23].mxu0 }
 0x26b   : > { %v5782_v63 = vadd.f32 %v3764_v45, %v2480_v38  ;;  %v5784_v26 = vpop.f32.mrb[88].mxu1 }
 0x26c   : > { %v2260_v55 = vpop.f32.mrb[24].mxu0  ;;  %v2532_v16 = vpop.f32.mrb[89].mxu1 }
 0x26d   : > { %v3767_v62 = vadd.f32 %v2260_v55, %v1811_v56  ;;  %v2262_v1 = vpop.f32.mrb[25].mxu0 }
 0x26f   : > { %v5788_v34 = vadd.f32 %v3767_v62, %v2485_v41  ;;  %v5790_v31 = vpop.f32.mrb[90].mxu1 }
 0x270   : > { %v2265_v7 = vpop.f32.mrb[26].mxu0  ;;  %v2537_v13 = vpop.f32.mrb[91].mxu1 }
 0x271   : > { %v3770_v22 = vadd.f32 %v2265_v7, %v1816_v2  ;;  %v2267_v61 = vpop.f32.mrb[27].mxu0 }
 0x273   : > { %v5794_v38 = vadd.f32 %v3770_v22, %v2490_v35  ;;  %v5796_v30 = vpop.f32.mrb[92].mxu1 }
 0x274   : > { %v2270_v32 = vpop.f32.mrb[28].mxu0  ;;  %v2542_v40 = vpop.f32.mrb[93].mxu1 }
 0x275   : > { %v3773_v44 = vadd.f32 %v2270_v32, %v1821_v47  ;;  %v2272_v42 = vpop.f32.mrb[29].mxu0 }
 0x277   : > { %v5800_v41 = vadd.f32 %v3773_v44, %v2495_v17  ;;  %v5802_v45 = vpop.f32.mrb[94].mxu1 }
 0x278   : > { %v2275_v3 = vpop.f32.mrb[30].mxu0  ;;  %v2547_v56 = vpop.f32.mrb[95].mxu1 }
 0x279   : > { %v3776_v55 = vadd.f32 %v2275_v3, %v1826_v57  ;;  %v2277_v16 = vpop.f32.mrb[31].mxu0  ;;  %v1846_v56 = vadd.f32 %v5762_v52, %v5731_v51 }
 0x27b   : > { %v5806_v35 = vadd.f32 %v3776_v55, %v2500_v48  ;;  %v5808_v62 = vpop.f32.mrb[96].mxu1  ;;  %v1841_v48 = vadd.f32 %v5762_v52, %v5729_v60 }
 0x27c   : > { %v2280_v1 = vpop.f32.mrb[32].mxu0  ;;  %v2552_v2 = vpop.f32.mrb[97].mxu1 }
 0x27d   : > { %v3779_v7 = vadd.f32 %v2280_v1, %v1831_v29  ;;  %v2282_v13 = vpop.f32.mrb[33].mxu0  ;;  %v1851_v2 = vadd.f32 %v5762_v52, %v5733_v53 }
 0x27f   : > { %v5812_v17 = vadd.f32 %v3779_v7, %v2505_v50  ;;  %v5814_v22 = vpop.f32.mrb[98].mxu1 }
 0x280   : > { %v2285_v61 = vpop.f32.mrb[34].mxu0  ;;  %v2557_v47 = vpop.f32.mrb[99].mxu1 }
 0x281   : > { %v3782_v32 = vadd.f32 %v2285_v61, %v1836_v36  ;;  %v2287_v40 = vpop.f32.mrb[35].mxu0 }
 0x283   : > { %v5822_v44 = vadd.f32 %v3782_v32, %v5757_v27  ;;  %v5824_v42 = vpop.f32.mrb[100].mxu1 }
 0x284   : > { %v2290_v28 = vpop.f32.mrb[36].mxu0  ;;  %v2562_v50 = vpop.f32.mrb[101].mxu1 }
 0x285   : > { %v3785_v57 = vadd.f32 %v2290_v28, %v1841_v48  ;;  %v2292_v3 = vpop.f32.mrb[37].mxu0 }
 0x287   : > { %v5832_v60 = vadd.f32 %v3785_v57, %v5766_v58  ;;  %v5834_v27 = vpop.f32.mrb[102].mxu1  ;;  %v1856_v58 = vadd.f32 %v5762_v52, %v5735_v54 }
 0x288   : > { %v2295_v55 = vpop.f32.mrb[38].mxu0  ;;  %v2567_v16 = vpop.f32.mrb[103].mxu1 }
 0x289   : > { %v3788_v29 = vadd.f32 %v2295_v55, %v1846_v56  ;;  %v2297_v1 = vpop.f32.mrb[39].mxu0 }
 0x28b   : > { %v5838_v7 = vpop.f32.mrb[104].mxu1  ;;  %v5841_v13 = vadd.f32 %v3788_v29, %v5772_v19  ;;  %v1861_v19 = vadd.f32 %v5762_v52, %v5737_v10 }
 0x28c   : > { %v2300_v36 = vpop.f32.mrb[40].mxu0  ;;  %v2572_v61 = vpop.f32.mrb[105].mxu1 }
 0x28d   : > { %v3791_v51 = vadd.f32 %v2300_v36, %v1851_v2  ;;  %v2302_v47 = vpop.f32.mrb[41].mxu0 }
 0x28f   : > { %v5845_v32 = vpop.f32.mrb[106].mxu1  ;;  %v5848_v40 = vadd.f32 %v3791_v51, %v5778_v39  ;;  %v1866_v39 = vadd.f32 %v5762_v52, %v5739_v0 }
 0x290   : > { %v2305_v37 = vpop.f32.mrb[42].mxu0  ;;  %v2577_v48 = vpop.f32.mrb[107].mxu1 }
 0x291   : > { %v3794_v53 = vadd.f32 %v2305_v37, %v1856_v58  ;;  %v2307_v28 = vpop.f32.mrb[43].mxu0 }
 0x293   : > { %v5852_v50 = vpop.f32.mrb[108].mxu1  ;;  %v5855_v57 = vadd.f32 %v3794_v53, %v5784_v26  ;;  %v1871_v26 = vadd.f32 %v5762_v52, %v5741_v4 }
 0x294   : > { %v2310_v3 = vpop.f32.mrb[44].mxu0  ;;  %v2582_v56 = vpop.f32.mrb[109].mxu1 }
 0x295   : > { %v3797_v54 = vadd.f32 %v2310_v3, %v1861_v19  ;;  %v2312_v55 = vpop.f32.mrb[45].mxu0 }
 0x297   : > { %v5859_v16 = vpop.f32.mrb[110].mxu1  ;;  %v5862_v29 = vadd.f32 %v3797_v54, %v5790_v31  ;;  %v1876_v31 = vadd.f32 %v5762_v52, %v5743_v6 }
 0x298   : > { %v2315_v1 = vpop.f32.mrb[46].mxu0  ;;  %v5864_v2 = vpop.f32.mrb[111].mxu1 }
 0x299   : > { %v3800_v10 = vadd.f32 %v2315_v1, %v1866_v39  ;;  %v2317_v36 = vpop.f32.mrb[47].mxu0 }
 0x29b   : > { %v5868_v61 = vpop.f32.mrb[112].mxu1  ;;  %v5871_v51 = vadd.f32 %v3800_v10, %v5796_v30  ;;  %v1881_v30 = vadd.f32 %v5762_v52, %v5745_v11 }
 0x29c   : > { %v2320_v47 = vpop.f32.mrb[48].mxu0  ;;  %v5873_v0 = vpop.f32.mrb[113].mxu1 }
 0x29d   : > { %v3803_v58 = vadd.f32 %v2320_v47, %v1871_v26  ;;  %v2322_v37 = vpop.f32.mrb[49].mxu0 }
 0x29e   : > { %v1891_v37 = vadd.f32 %v5762_v52, %v5749_v18 }
 0x29f   : > { %v5877_v48 = vpop.f32.mrb[114].mxu1  ;;  %v5880_v53 = vadd.f32 %v3803_v58, %v5802_v45  ;;  %v1886_v45 = vadd.f32 %v5762_v52, %v5747_v15 }
 0x2a0   : > { %v2325_v28 = vpop.f32.mrb[50].mxu0  ;;  %v5882_v4 = vpop.f32.mrb[115].mxu1 }
 0x2a1   : > { %v3806_v19 = vadd.f32 %v2325_v28, %v1876_v31  ;;  %v2327_v3 = vpop.f32.mrb[51].mxu0 }
 0x2a3   : > { %v5886_v56 = vpop.f32.mrb[116].mxu1  ;;  %v5889_v54 = vadd.f32 %v3806_v19, %v5808_v62 }
 0x2a4   : > { %v2330_v55 = vpop.f32.mrb[52].mxu0  ;;  %v5891_v6 = vpop.f32.mrb[117].mxu1 }
 0x2a5   : > { %v3809_v39 = vadd.f32 %v2330_v55, %v1881_v30  ;;  %v2332_v1 = vpop.f32.mrb[53].mxu0  ;;  %v1896_v55 = vadd.f32 %v5762_v52, %v5751_v33 }
 0x2a7   : > { %v3439_v10 = vpop.f32.mrb[118].mxu1  ;;  %v5896_v36 = vadd.f32 %v3809_v39, %v5814_v22 }
 0x2a8   : > { %v2335_v26 = vpop.f32.mrb[54].mxu0  ;;  %v5899_v11 = vadd.f32 %v5770_v14, %v3439_v10  ;;  %v5901_v47 = vpop.f32.mrb[119].mxu1 }
 0x2a9   : > { %v3812_v62 = vadd.f32 %v2335_v26, %v1886_v45  ;;  %v2337_v58 = vpop.f32.mrb[55].mxu0 }
 0x2ab   : > { %v3442_v31 = vpop.f32.mrb[120].mxu1  ;;  %v5906_v28 = vadd.f32 %v3812_v62, %v5824_v42 }
 0x2ac   : > { %v2340_v15 = vpop.f32.mrb[56].mxu0  ;;  %v5909_v19 = vadd.f32 %v5782_v63, %v3442_v31  ;;  %v2700_v22 = vpop.f32.mrb[121].mxu1 }
 0x2ad   : > { %v3815_v3 = vadd.f32 %v2340_v15, %v1891_v37  ;;  %v2342_v30 = vpop.f32.mrb[57].mxu0  ;;  %v5912_v14 = vadd.f32 %v5776_v9, %v2700_v22  ;;  %v1901_v9 = vadd.f32 %v5762_v52, %v5753_v24 }
 0x2af   : > { %v3445_v39 = vpop.f32.mrb[122].mxu1  ;;  %v5917_v18 = vadd.f32 %v3815_v3, %v5834_v27 }
 0x2b0   : > { %v2345_v1 = vpop.f32.mrb[58].mxu0  ;;  %v5920_v42 = vadd.f32 %v5794_v38, %v3445_v39  ;;  %v2710_v45 = vpop.f32.mrb[123].mxu1 }
 0x2b1   : > { %v3818_v63 = vadd.f32 %v2345_v1, %v1896_v55  ;;  %v2347_v10 = vpop.f32.mrb[59].mxu0  ;;  %v5923_v26 = vadd.f32 %v5788_v34, %v2710_v45  ;;  %v1906_v34 = vadd.f32 %v5762_v52, %v5755_v25 }
 0x2b3   : > { %v3448_v62 = vpop.f32.mrb[124].mxu1  ;;  %v5928_v33 = vadd.f32 %v3818_v63, %v5838_v7 }
 0x2b4   : > { %v2350_v58 = vpop.f32.mrb[60].mxu0  ;;  %v5931_v27 = vadd.f32 %v5806_v35, %v3448_v62  ;;  %v2720_v37 = vpop.f32.mrb[125].mxu1 }
 0x2b5   : > { %v3821_v38 = vadd.f32 %v2350_v58, %v1901_v9  ;;  %v2352_v31 = vpop.f32.mrb[61].mxu0  ;;  %v5934_v15 = vadd.f32 %v5800_v41, %v2720_v37  ;;  %v1751_v41 = vadd.f32 %v5762_v52, %v5693_v59 }
 0x2b7   : > { %v3451_v22 = vpop.f32.mrb[126].mxu1  ;;  %v5939_v24 = vadd.f32 %v3821_v38, %v5845_v32 }
 0x2b8   : > { %v2355_v3 = vpop.f32.mrb[62].mxu0  ;;  %v5942_v7 = vadd.f32 %v5822_v44, %v3451_v22  ;;  %v2730_v30 = vpop.f32.mrb[127].mxu1 }
 0x2b9   : > { %v3824_v35 = vadd.f32 %v2355_v3, %v1906_v34  ;;  %v2357_v55 = vpop.f32.mrb[63].mxu0  ;;  %v5945_v39 = vadd.f32 %v5812_v17, %v2730_v30  ;;  %v1756_v17 = vadd.f32 %v5762_v52, %v5695_v5 }
 0x2bb   : > { %v3454_v1 = vpop.f32.mrb[128].mxu1  ;;  %v3825_v25 = vadd.f32 %v3824_v35, %v5852_v50 }
 0x2bc   : > { %v2425_v45 = vpop.f32.mrb[0].mxu0  ;;  %v5951_v32 = vadd.f32 %v5841_v13, %v3454_v1  ;;  %v2740_v63 = vpop.f32.mrb[129].mxu1 }
 0x2bd   : > { %v3740_v10 = vadd.f32 %v2425_v45, %v1751_v41  ;;  %v2427_v44 = vpop.f32.mrb[1].mxu0  ;;  %v5954_v9 = vadd.f32 %v5832_v60, %v2740_v63  ;;  %v1761_v60 = vadd.f32 %v5762_v52, %v5697_v12 }
 0x2bf   : > { %v5959_v62 = vadd.f32 %v3740_v10, %v5864_v2  ;;  %v3457_v59 = vpop.f32.mrb[130].mxu1 }
 0x2c0   : > { %v2430_v58 = vpop.f32.mrb[2].mxu0  ;;  %v5962_v50 = vadd.f32 %v5855_v57, %v3457_v59  ;;  %v2750_v37 = vpop.f32.mrb[131].mxu1 }
 0x2c1   : > { %v3742_v13 = vadd.f32 %v2430_v58, %v1756_v17  ;;  %v2432_v38 = vpop.f32.mrb[3].mxu0  ;;  %v5965_v31 = vadd.f32 %v5848_v40, %v2750_v37  ;;  %v1766_v40 = vadd.f32 %v5762_v52, %v5699_v21 }
 0x2c3   : > { %v5970_v34 = vadd.f32 %v3742_v13, %v5859_v16  ;;  %v3460_v5 = vpop.f32.mrb[132].mxu1 }
 0x2c4   : > { %v2435_v2 = vpop.f32.mrb[4].mxu0  ;;  %v5973_v22 = vadd.f32 %v5871_v51, %v3460_v5  ;;  %v2760_v3 = vpop.f32.mrb[133].mxu1 }
 0x2c5   : > { %v3744_v57 = vadd.f32 %v2435_v2, %v1761_v60  ;;  %v2437_v30 = vpop.f32.mrb[5].mxu0  ;;  %v5976_v35 = vadd.f32 %v5862_v29, %v2760_v3  ;;  %v1771_v29 = vadd.f32 %v5762_v52, %v5701_v49 }
 0x2c7   : > { %v5981_v55 = vadd.f32 %v3744_v57, %v5873_v0  ;;  %v3463_v12 = vpop.f32.mrb[134].mxu1 }
 0x2c8   : > { %v2440_v16 = vpop.f32.mrb[6].mxu0  ;;  %v5984_v41 = vadd.f32 %v5889_v54, %v3463_v12  ;;  %v2770_v1 = vpop.f32.mrb[135].mxu1 }
 0x2c9   : > { %v3746_v51 = vadd.f32 %v2440_v16, %v1766_v40  ;;  %v2442_v45 = vpop.f32.mrb[7].mxu0  ;;  %v5987_v63 = vadd.f32 %v5880_v53, %v2770_v1  ;;  %v1776_v53 = vadd.f32 %v5762_v52, %v5703_v20  ;;  %v1781_v20 = vadd.f32 %v5762_v52, %v5705_v23 }
 0x2ca   : > { %v2812_v2 = vsel %vm648_vm0, %v5981_v55, 0.0  ;;  %v1786_v45 = vadd.f32 %v5762_v52, %v5707_v43 }
 0x2cb   : > { %v5992_v10 = vadd.f32 %v3746_v51, %v5868_v61  ;;  %v3466_v21 = vpop.f32.mrb[136].mxu1 }
 0x2cc   : > { %v2445_v0 = vpop.f32.mrb[8].mxu0  ;;  %v5995_v44 = vadd.f32 %v5906_v28, %v3466_v21  ;;  %v2780_v17 = vpop.f32.mrb[137].mxu1  ;;  %v2810_v28 = vsel %vm648_vm0, %v5970_v34, 0.0 }
 0x2cd   : > { %v3748_v54 = vadd.f32 %v2445_v0, %v1771_v29  ;;  %v2447_v59 = vpop.f32.mrb[9].mxu0  ;;  %v5998_v58 = vadd.f32 %v5896_v36, %v2780_v17 }
 0x2cf   : > { %v6003_v37 = vadd.f32 %v3748_v54, %v5882_v4  ;;  %v3469_v49 = vpop.f32.mrb[138].mxu1  ;;  %v2809_v4 = vsel %vm648_vm0, %v5959_v62, 0.0 }
 0x2d0   : > { %v2450_v61 = vpop.f32.mrb[10].mxu0  ;;  %v6006_v13 = vadd.f32 %v5928_v33, %v3469_v49  ;;  %v2790_v38 = vpop.f32.mrb[139].mxu1  ;;  %v2811_v57 = vadd.f32 %v2810_v28, %v2809_v4 }
 0x2d1   : > { %v3750_v60 = vadd.f32 %v2450_v61, %v1776_v53  ;;  %v2452_v5 = vpop.f32.mrb[11].mxu0  ;;  %v6011_v36 = vadd.f32 %v5917_v18, %v2790_v38  ;;  %v2814_v18 = vsel %vm648_vm0, %v5992_v10, 0.0 }
 0x2d2   : > { %v2813_v51 = vadd.f32 %v2812_v2, %v2811_v57  ;;  %v2828_v2 = vsel %vm648_vm0, %v5912_v14, 0.0  ;;  %v2830_v57 = vsel %vm648_vm0, %v5909_v19, 0.0 }
 0x2d3   : > { %v6020_v33 = vadd.f32 %v3750_v60, %v5877_v48  ;;  %v3472_v3 = vpop.f32.mrb[140].mxu1  ;;  %v2816_v48 = vsel %vm648_vm0, %v6003_v37, 0.0 }
 0x2d4   : > { %v2455_v30 = vpop.f32.mrb[12].mxu0  ;;  %v6022_v40 = vadd.f32 %v3825_v25, %v3472_v3  ;;  %v2800_v12 = vpop.f32.mrb[141].mxu1  ;;  %v2815_v25 = vadd.f32 %v2814_v18, %v2813_v51  ;;  %v2834_v18 = vsel %vm648_vm0, %v5920_v42, 0.0 }
 0x2d5   : > { %v3752_v16 = vadd.f32 %v2455_v30, %v1781_v20  ;;  %v2457_v23 = vpop.f32.mrb[13].mxu0  ;;  %v6027_v1 = vadd.f32 %v5939_v24, %v2800_v12  ;;  %v2818_v0 = vsel %vm648_vm0, %v6020_v33, 0.0  ;;  %v1791_v24 = vadd.f32 %v5762_v52, %v5709_v46 }
 0x2d6   : > { %v2817_v59 = vadd.f32 %v2816_v48, %v2815_v25  ;;  %v2836_v23 = vsel %vm648_vm0, %v5934_v15, 0.0  ;;  %v2840_v25 = vsel %vm648_vm0, %v5945_v39, 0.0 }
 0x2d7   : > { %v6034_v29 = vadd.f32 %v3752_v16, %v5891_v6 }
 0x2d8   : > { %v2460_v21 = vpop.f32.mrb[14].mxu0  ;;  %v2819_v49 = vadd.f32 %v2818_v0, %v2817_v59  ;;  %v2842_v0 = vsel %vm648_vm0, %v5942_v7, 0.0 }
 0x2d9   : > { %v3754_v17 = vadd.f32 %v2460_v21, %v1786_v45  ;;  %v2462_v54 = vpop.f32.mrb[15].mxu0  ;;  %v2820_v43 = vsel %vm648_vm0, %v6034_v29, 0.0  ;;  %v2838_v45 = vsel %vm648_vm0, %v5931_v27, 0.0 }
 0x2da   : > { %v2821_v60 = vadd.f32 %v2820_v43, %v2819_v49  ;;  %v2844_v54 = vsel %vm648_vm0, %v5954_v9, 0.0  ;;  %v2848_v49 = vsel %vm648_vm0, %v5965_v31, 0.0 }
 0x2db   : > { %v6043_v53 = vadd.f32 %v3754_v17, %v5886_v56  ;;  %v2826_v56 = vsel %vm648_vm0, %v5899_v11, 0.0 }
 0x2dc   : > { %v2465_v6 = vpop.f32.mrb[16].mxu0 }
 0x2dd   : > { %v2822_v61 = vsel %vm648_vm0, %v6043_v53, 0.0  ;;  %v3756_v38 = vadd.f32 %v2465_v6, %v1791_v24  ;;  %v2467_v28 = vpop.f32.mrb[17].mxu0  ;;  %v2846_v24 = vsel %vm648_vm0, %v5951_v32, 0.0 }
 0x2de   : > { %v2823_v20 = vadd.f32 %v2822_v61, %v2821_v60  ;;  %v2850_v61 = vsel %vm648_vm0, %v5962_v50, 0.0  ;;  %v2852_v28 = vsel %vm648_vm0, %v5976_v35, 0.0 }
 0x2df   : > { %v6048_v5 = vadd.f32 %v3756_v38, %v5901_v47  ;;  %v2832_v47 = vsel %vm648_vm0, %v5923_v26, 0.0 }
 0x2e1   : > { %v2824_v46 = vsel %vm648_vm0, %v6048_v5, 0.0 }
 0x2e2   : > { %v2825_v52 = vadd.f32 %v2824_v46, %v2823_v20  ;;  %v2854_v20 = vsel %vm648_vm0, %v5973_v22, 0.0 }
 0x2e4   : > { %v2827_v4 = vadd.f32 %v2826_v56, %v2825_v52  ;;  %v2856_v52 = vsel %vm648_vm0, %v5987_v63, 0.0 }
 0x2e6   : > { %v2829_v3 = vadd.f32 %v2828_v2, %v2827_v4  ;;  %v2858_v4 = vsel %vm648_vm0, %v5984_v41, 0.0 }
 0x2e8   : > { %v2831_v30 = vadd.f32 %v2830_v57, %v2829_v3  ;;  %v2860_v3 = vsel %vm648_vm0, %v5998_v58, 0.0 }
 0x2ea   : > { %v2833_v12 = vadd.f32 %v2832_v47, %v2831_v30  ;;  %v2862_v30 = vsel %vm648_vm0, %v5995_v44, 0.0 }
 0x2ec   : > { %v2835_v16 = vadd.f32 %v2834_v18, %v2833_v12  ;;  %v2864_v12 = vsel %vm648_vm0, %v6011_v36, 0.0 }
 0x2ee   : > { %v2837_v51 = vadd.f32 %v2836_v23, %v2835_v16  ;;  %v2866_v16 = vsel %vm648_vm0, %v6006_v13, 0.0 }
 0x2f0   : > { %v2839_v48 = vadd.f32 %v2838_v45, %v2837_v51  ;;  %v2868_v51 = vsel %vm648_vm0, %v6027_v1, 0.0 }
 0x2f2   : > { %v2841_v21 = vadd.f32 %v2840_v25, %v2839_v48  ;;  %v2870_v48 = vsel %vm648_vm0, %v6022_v40, 0.0 }
 0x2f4   : > { %v2843_v17 = vadd.f32 %v2842_v0, %v2841_v21 }
 0x2f6   : > { %v2845_v59 = vadd.f32 %v2844_v54, %v2843_v17 }
 0x2f8   : > { %v2847_v43 = vadd.f32 %v2846_v24, %v2845_v59 }
 0x2fa   : > { %v2849_v6 = vadd.f32 %v2848_v49, %v2847_v43  ;;  %v2956_v49 = vld [vmem:[%s6418_s5] sm:$0xff] }
 0x2fc   : > { %v2851_v38 = vadd.f32 %v2850_v61, %v2849_v6  ;;  %v2881_v6 = vld [vmem:[%s6417_s4] sm:$0x1] }
 0x2fe   : > { %v2853_v60 = vadd.f32 %v2852_v28, %v2851_v38 }
 0x300   : > { %v2855_v46 = vadd.f32 %v2854_v20, %v2853_v60  ;;  %v2957_v20 = vld [vmem:[%s6419_s6] sm:$0x1] }
 0x302   : > { %v2857_v56 = vadd.f32 %v2856_v52, %v2855_v46 }
 0x304   : > { %v2859_v2 = vadd.f32 %v2858_v4, %v2857_v56 }
 0x306   : > { %v2861_v57 = vadd.f32 %v2860_v3, %v2859_v2  ;;  %v3041_v3 = vlaneseq }
 0x308   : > { %v2863_v47 = vadd.f32 %v2862_v30, %v2861_v57  ;;  %v3042_v30 = vshrl.u32 %v3041_v3, 7 }
 0x30a   : > { %v2865_v18 = vadd.f32 %v2864_v12, %v2863_v47  ;;  %v3031_v47 = vld [vmem:[%s6420_s7] sm:$0x1] }
 0x30c   : > { %v2867_v23 = vadd.f32 %v2866_v16, %v2865_v18  ;;  %v3043_v16 = vsub.s32 0, %v3042_v30 }
 0x30e   : > { %v2869_v45 = vadd.f32 %v2868_v51, %v2867_v23 }
 0x310   : > { %v2871_v25 = vadd.f32 %v2870_v48, %v2869_v45 }
 0x312   : > { %v2872_v21 = vrot.slane %v2871_v25, 4 }
 0x314   : > { %v2873_v0 = vadd.f32 %v2872_v21, %v2871_v25 }
 0x316   : > { %v2874_v17 = vrot.slane %v2873_v0, 2 }
 0x318   : > { %v2875_v54 = vadd.f32 %v2874_v17, %v2873_v0 }
 0x31a   : > { %v2876_v59 = vrot.slane %v2875_v54, 1 }
 0x31c   : > { %v2877_v24 = vadd.f32 %v2876_v59, %v2875_v54 }
 0x31e   : > { %v2879_v43 = vmul.f32 0.00390625, %v2877_v24 }
 0x320   : > { %3476 = vmatmul.mubr.msk.f32.vlgmr.msra.gmra.mrb[142].mxu1 %vm648_vm0, %v2879_v43 }
 0x321   : > { %3480 = vmatprep.mubr.msk.f32.mxu1 %vm3935_vm3, %v3934_v8  ;;  %3479 = vmatpush3.msra.mxu1 %v2956_v49 }
 0x3f3   : > { %v2951_v61 = vpop.f32.mrb[142].mxu1 }
 0x3f4   : > { %v2952_v38 = vadd.f32 %v2951_v61, %v2881_v6  ;;  %v3477_v28 = vpop.f32.mrb[143].mxu1 }
 0x3f6   : > { %v2955_v60 = vmax.f32 %v2952_v38, 0.0 }
 0x3f8   : > { %3481 = vmatmul.mubr.msk.f32.vlgmr.msra.gmra.mrb[144].mxu1 %vm648_vm0, %v2955_v60 }
 0x4cb   : > { %v3027_v8 = vpop.f32.mrb[144].mxu1 }
 0x4cc   : > { %v3028_v46 = vadd.f32 %v3027_v8, %v2957_v20  ;;  %v3482_v52 = vpop.f32.mrb[145].mxu1 }
 0x4ce   : > { %v3337_v56 = vmul.f32 -1.442695, %v3028_v46 }
 0x4d0   : > { %3921 = vpow2.f32 %v3337_v56 }
 0x4da   : > { %v3922_v4 = vpop.eup %3921 }
 0x4db   : > { %v3035_v2 = vadd.f32 1.0, %v3922_v4 }
 0x4dd   : > { %3923 = vrcp.f32 %v3035_v2 }
 0x4e7   : > { %v3924_v57 = vpop.eup %3923 }
 0x4e8   : > { %v3038_v12 = vadd.f32 1.0, %v3924_v57 }
 0x4ea   : > { %v3039_v18 = vmul.f32 %v3038_v12, %v3031_v47 }
 0x4ec   : > { %v6114_v23 = vrot.slane %v3039_v18, %v3043_v16 }
 0x4ee   : > { %v6118_v51 = vmul.f32 %v6114_v23, %v5981_v55  ;;  %v6122_v45 = vmul.f32 %v6114_v23, %v5959_v62  ;;  %v6130_v48 = vmul.f32 %v6114_v23, %v5992_v10  ;;  %v6134_v25 = vmul.f32 %v6114_v23, %v5970_v34 }
 0x4ef   : > { %v6142_v62 = vmul.f32 %v6114_v23, %v6020_v33  ;;  %v6146_v55 = vmul.f32 %v6114_v23, %v6003_v37  ;;  %v6154_v34 = vmul.f32 %v6114_v23, %v6043_v53  ;;  %v6158_v10 = vmul.f32 %v6114_v23, %v6034_v29 }
 0x4f0   : > { %3114 = vrot.lane.b32.xlu1 %v6118_v51, %s3936_s22  ;;  %3110 = vrot.lane.b32.xlu0 %v6122_v45, %s3936_s22  ;;  %v6166_v37 = vmul.f32 %v6114_v23, %v5899_v11  ;;  %v6170_v33 = vmul.f32 %v6114_v23, %v6048_v5  ;;  %v6178_v29 = vmul.f32 %v6114_v23, %v5909_v19 }
 0x4f1   : > { %v6182_v53 = vmul.f32 %v6114_v23, %v5912_v14  ;;  %v6190_v11 = vmul.f32 %v6114_v23, %v5920_v42  ;;  %v6194_v5 = vmul.f32 %v6114_v23, %v5923_v26  ;;  %v6202_v19 = vmul.f32 %v6114_v23, %v5931_v27 }
 0x4f2   : > { %v6206_v14 = vmul.f32 %v6114_v23, %v5934_v15  ;;  %v6214_v42 = vmul.f32 %v6114_v23, %v5942_v7  ;;  %v6218_v26 = vmul.f32 %v6114_v23, %v5945_v39  ;;  %v6226_v27 = vmul.f32 %v6114_v23, %v5951_v32 }
 0x4f3   : > { %v6230_v15 = vmul.f32 %v6114_v23, %v5954_v9  ;;  %v6238_v7 = vmul.f32 %v6114_v23, %v5962_v50  ;;  %v6242_v39 = vmul.f32 %v6114_v23, %v5965_v31  ;;  %v6250_v32 = vmul.f32 %v6114_v23, %v5973_v22 }
 0x4f4   : > { %3116 = vrot.lane.b32.xlu1 %v6130_v48, %s3936_s22  ;;  %3112 = vrot.lane.b32.xlu0 %v6134_v25, %s3936_s22  ;;  %v6254_v9 = vmul.f32 %v6114_v23, %v5976_v35  ;;  %v6262_v50 = vmul.f32 %v6114_v23, %v5984_v41  ;;  %v6266_v31 = vmul.f32 %v6114_v23, %v5987_v63 }
 0x4f5   : > { %v6274_v22 = vmul.f32 %v6114_v23, %v5995_v44  ;;  %v6278_v35 = vmul.f32 %v6114_v23, %v5998_v58  ;;  %v6286_v41 = vmul.f32 %v6114_v23, %v6006_v13  ;;  %v6290_v63 = vmul.f32 %v6114_v23, %v6011_v36 }
 0x4f6   : > { %v6298_v44 = vmul.f32 %v6114_v23, %v6022_v40  ;;  %v6302_v58 = vmul.f32 %v6114_v23, %v6027_v1 }
 0x4f8   : > { %3120 = vrot.lane.b32.xlu1 %v6142_v62, %s3936_s22  ;;  %3118 = vrot.lane.b32.xlu0 %v6146_v55, %s3936_s22 }
 0x4fc   : > { %3124 = vrot.lane.b32.xlu1 %v6154_v34, %s3936_s22  ;;  %3122 = vrot.lane.b32.xlu0 %v6158_v10, %s3936_s22 }
 0x500   : > { %3128 = vrot.lane.b32.xlu1 %v6166_v37, %s3936_s22  ;;  %3126 = vrot.lane.b32.xlu0 %v6170_v33, %s3936_s22 }
 0x504   : > { %3132 = vrot.lane.b32.xlu1 %v6178_v29, %s3936_s22  ;;  %3130 = vrot.lane.b32.xlu0 %v6182_v53, %s3936_s22 }
 0x508   : > { %3136 = vrot.lane.b32.xlu1 %v6190_v11, %s3936_s22  ;;  %3134 = vrot.lane.b32.xlu0 %v6194_v5, %s3936_s22 }
 0x50c   : > { %3140 = vrot.lane.b32.xlu1 %v6202_v19, %s3936_s22  ;;  %3138 = vrot.lane.b32.xlu0 %v6206_v14, %s3936_s22 }
 0x510   : > { %3144 = vrot.lane.b32.xlu1 %v6214_v42, %s3936_s22  ;;  %3142 = vrot.lane.b32.xlu0 %v6218_v26, %s3936_s22 }
 0x514   : > { %3148 = vrot.lane.b32.xlu1 %v6226_v27, %s3936_s22  ;;  %3146 = vrot.lane.b32.xlu0 %v6230_v15, %s3936_s22 }
 0x518   : > { %3152 = vrot.lane.b32.xlu1 %v6238_v7, %s3936_s22  ;;  %3150 = vrot.lane.b32.xlu0 %v6242_v39, %s3936_s22 }
 0x51c   : > { %3156 = vrot.lane.b32.xlu1 %v6250_v32, %s3936_s22  ;;  %3154 = vrot.lane.b32.xlu0 %v6254_v9, %s3936_s22 }
 0x520   : > { %3160 = vrot.lane.b32.xlu1 %v6262_v50, %s3936_s22  ;;  %3158 = vrot.lane.b32.xlu0 %v6266_v31, %s3936_s22 }
 0x524   : > { %3164 = vrot.lane.b32.xlu1 %v6274_v22, %s3936_s22  ;;  %3162 = vrot.lane.b32.xlu0 %v6278_v35, %s3936_s22 }
 0x528   : > { %3168 = vrot.lane.b32.xlu1 %v6286_v41, %s3936_s22  ;;  %3166 = vrot.lane.b32.xlu0 %v6290_v63, %s3936_s22 }
 0x52c   : > { %3172 = vrot.lane.b32.xlu1 %v6298_v44, %s3936_s22  ;;  %3170 = vrot.lane.b32.xlu0 %v6302_v58, %s3936_s22 }
 0x562   : > { %v3115_v13 = vpop.permute.xlu1 %3114  ;;  %v3111_v40 = vpop.permute.xlu0 %3110 }
 0x563   : > { %v3208_v36 = vadd.f32 %v3115_v13, %v6118_v51  ;;  %v3206_v1 = vadd.f32 %v3111_v40, %v6122_v45 }
 0x565   : > { %3241 = vst.msk [vmem:[%s6312_s25 + $0x10] sm:$0xff] %vm3238_vm4, %v3208_v36  ;;  %3239 = vst.msk [vmem:[%s6312_s25] sm:$0xff] %vm3238_vm4, %v3206_v1 }
 0x566   : > { %v3117_v21 = vpop.permute.xlu1 %3116  ;;  %v3113_v17 = vpop.permute.xlu0 %3112 }
 0x567   : > { %v3209_v0 = vadd.f32 %v3117_v21, %v6130_v48  ;;  %v3207_v54 = vadd.f32 %v3113_v17, %v6134_v25 }
 0x569   : > { %3242 = vst.msk [vmem:[%s6312_s25 + $0x18] sm:$0xff] %vm3238_vm4, %v3209_v0  ;;  %3240 = vst.msk [vmem:[%s6312_s25 + $0x8] sm:$0xff] %vm3238_vm4, %v3207_v54 }
 0x56a   : > { %v3121_v59 = vpop.permute.xlu1 %3120  ;;  %v3119_v43 = vpop.permute.xlu0 %3118 }
 0x56b   : > { %v3211_v24 = vadd.f32 %v3121_v59, %v6142_v62  ;;  %v3210_v49 = vadd.f32 %v3119_v43, %v6146_v55 }
 0x56d   : > { %3244 = vst.msk [vmem:[%s6312_s25 + $0x28] sm:$0xff] %vm3238_vm4, %v3211_v24  ;;  %3243 = vst.msk [vmem:[%s6312_s25 + $0x20] sm:$0xff] %vm3238_vm4, %v3210_v49 }
 0x56e   : > { %v3125_v6 = vpop.permute.xlu1 %3124  ;;  %v3123_v38 = vpop.permute.xlu0 %3122 }
 0x56f   : > { %v3213_v61 = vadd.f32 %v3125_v6, %v6154_v34  ;;  %v3212_v28 = vadd.f32 %v3123_v38, %v6158_v10 }
 0x571   : > { %3246 = vst.msk [vmem:[%s6312_s25 + $0x38] sm:$0xff] %vm3238_vm4, %v3213_v61  ;;  %3245 = vst.msk [vmem:[%s6312_s25 + $0x30] sm:$0xff] %vm3238_vm4, %v3212_v28 }
 0x572   : > { %v3129_v60 = vpop.permute.xlu1 %3128  ;;  %v3127_v8 = vpop.permute.xlu0 %3126 }
 0x573   : > { %v3215_v20 = vadd.f32 %v3129_v60, %v6166_v37  ;;  %v3214_v46 = vadd.f32 %v3127_v8, %v6170_v33 }
 0x575   : > { %3248 = vst.msk [vmem:[%s6312_s25 + $0x48] sm:$0xff] %vm3238_vm4, %v3215_v20  ;;  %3247 = vst.msk [vmem:[%s6312_s25 + $0x40] sm:$0xff] %vm3238_vm4, %v3214_v46 }
 0x576   : > { %v3133_v52 = vpop.permute.xlu1 %3132  ;;  %v3131_v4 = vpop.permute.xlu0 %3130 }
 0x577   : > { %v3217_v56 = vadd.f32 %v3133_v52, %v6178_v29  ;;  %v3216_v2 = vadd.f32 %v3131_v4, %v6182_v53 }
 0x579   : > { %3250 = vst.msk [vmem:[%s6312_s25 + $0x58] sm:$0xff] %vm3238_vm4, %v3217_v56  ;;  %3249 = vst.msk [vmem:[%s6312_s25 + $0x50] sm:$0xff] %vm3238_vm4, %v3216_v2 }
 0x57a   : > { %v3137_v3 = vpop.permute.xlu1 %3136  ;;  %v3135_v30 = vpop.permute.xlu0 %3134 }
 0x57b   : > { %v3219_v57 = vadd.f32 %v3137_v3, %v6190_v11  ;;  %v3218_v47 = vadd.f32 %v3135_v30, %v6194_v5 }
 0x57d   : > { %3252 = vst.msk [vmem:[%s6312_s25 + $0x68] sm:$0xff] %vm3238_vm4, %v3219_v57  ;;  %3251 = vst.msk [vmem:[%s6312_s25 + $0x60] sm:$0xff] %vm3238_vm4, %v3218_v47 }
 0x57e   : > { %v3141_v12 = vpop.permute.xlu1 %3140  ;;  %v3139_v16 = vpop.permute.xlu0 %3138 }
 0x57f   : > { %v3221_v18 = vadd.f32 %v3141_v12, %v6202_v19  ;;  %v3220_v23 = vadd.f32 %v3139_v16, %v6206_v14 }
 0x581   : > { %3254 = vst.msk [vmem:[%s6312_s25 + $0x78] sm:$0xff] %vm3238_vm4, %v3221_v18  ;;  %3253 = vst.msk [vmem:[%s6312_s25 + $0x70] sm:$0xff] %vm3238_vm4, %v3220_v23 }
 0x582   : > { %v3145_v51 = vpop.permute.xlu1 %3144  ;;  %v3143_v48 = vpop.permute.xlu0 %3142 }
 0x583   : > { %v3223_v45 = vadd.f32 %v3145_v51, %v6214_v42  ;;  %v3222_v25 = vadd.f32 %v3143_v48, %v6218_v26 }
 0x585   : > { %3256 = vst.msk [vmem:[%s6312_s25 + $0x88] sm:$0xff] %vm3238_vm4, %v3223_v45  ;;  %3255 = vst.msk [vmem:[%s6312_s25 + $0x80] sm:$0xff] %vm3238_vm4, %v3222_v25 }
 0x586   : > { %v3149_v62 = vpop.permute.xlu1 %3148  ;;  %v3147_v34 = vpop.permute.xlu0 %3146 }
 0x587   : > { %v3225_v55 = vadd.f32 %v3149_v62, %v6226_v27  ;;  %v3224_v10 = vadd.f32 %v3147_v34, %v6230_v15 }
 0x589   : > { %3258 = vst.msk [vmem:[%s6312_s25 + $0x98] sm:$0xff] %vm3238_vm4, %v3225_v55  ;;  %3257 = vst.msk [vmem:[%s6312_s25 + $0x90] sm:$0xff] %vm3238_vm4, %v3224_v10 }
 0x58a   : > { %v3153_v37 = vpop.permute.xlu1 %3152  ;;  %v3151_v29 = vpop.permute.xlu0 %3150 }
 0x58b   : > { %v3227_v33 = vadd.f32 %v3153_v37, %v6238_v7  ;;  %v3226_v53 = vadd.f32 %v3151_v29, %v6242_v39 }
 0x58d   : > { %3260 = vst.msk [vmem:[%s6312_s25 + $0xa8] sm:$0xff] %vm3238_vm4, %v3227_v33  ;;  %3259 = vst.msk [vmem:[%s6312_s25 + $0xa0] sm:$0xff] %vm3238_vm4, %v3226_v53 }
 0x58e   : > { %v3157_v11 = vpop.permute.xlu1 %3156  ;;  %v3155_v19 = vpop.permute.xlu0 %3154 }
 0x58f   : > { %v3229_v5 = vadd.f32 %v3157_v11, %v6250_v32  ;;  %v3228_v14 = vadd.f32 %v3155_v19, %v6254_v9 }
 0x591   : > { %3262 = vst.msk [vmem:[%s6312_s25 + $0xb8] sm:$0xff] %vm3238_vm4, %v3229_v5  ;;  %3261 = vst.msk [vmem:[%s6312_s25 + $0xb0] sm:$0xff] %vm3238_vm4, %v3228_v14 }
 0x592   : > { %v3161_v42 = vpop.permute.xlu1 %3160  ;;  %v3159_v27 = vpop.permute.xlu0 %3158 }
 0x593   : > { %v3231_v26 = vadd.f32 %v3161_v42, %v6262_v50  ;;  %v3230_v15 = vadd.f32 %v3159_v27, %v6266_v31 }
 0x595   : > { %3264 = vst.msk [vmem:[%s6312_s25 + $0xc8] sm:$0xff] %vm3238_vm4, %v3231_v26  ;;  %3263 = vst.msk [vmem:[%s6312_s25 + $0xc0] sm:$0xff] %vm3238_vm4, %v3230_v15 }
 0x596   : > { %v3165_v7 = vpop.permute.xlu1 %3164  ;;  %v3163_v32 = vpop.permute.xlu0 %3162 }
 0x597   : > { %v3233_v39 = vadd.f32 %v3165_v7, %v6274_v22  ;;  %v3232_v9 = vadd.f32 %v3163_v32, %v6278_v35 }
 0x599   : > { %3266 = vst.msk [vmem:[%s6312_s25 + $0xd8] sm:$0xff] %vm3238_vm4, %v3233_v39  ;;  %3265 = vst.msk [vmem:[%s6312_s25 + $0xd0] sm:$0xff] %vm3238_vm4, %v3232_v9 }
 0x59a   : > { %v3169_v50 = vpop.permute.xlu1 %3168  ;;  %v3167_v31 = vpop.permute.xlu0 %3166 }
 0x59b   : > { %v3235_v13 = vadd.f32 %v3169_v50, %v6286_v41  ;;  %v3234_v36 = vadd.f32 %v3167_v31, %v6290_v63 }
 0x59d   : > { %3268 = vst.msk [vmem:[%s6312_s25 + $0xe8] sm:$0xff] %vm3238_vm4, %v3235_v13  ;;  %3267 = vst.msk [vmem:[%s6312_s25 + $0xe0] sm:$0xff] %vm3238_vm4, %v3234_v36 }
 0x59e   : > { %v3173_v40 = vpop.permute.xlu1 %3172  ;;  %v3171_v1 = vpop.permute.xlu0 %3170 }
 0x59f   : > { %v3237_v22 = vadd.f32 %v3173_v40, %v6298_v44  ;;  %v3236_v35 = vadd.f32 %v3171_v1, %v6302_v58 }
 0x5a1   : > { %3270 = vst.msk [vmem:[%s6312_s25 + $0xf8] sm:$0xff] %vm3238_vm4, %v3237_v22  ;;  %3269 = vst.msk [vmem:[%s6312_s25 + $0xf0] sm:$0xff] %vm3238_vm4, %v3236_v35 }
 0x5a2 PF: > { %s18_s27 = sadd.s32 1, %s3931_s27  }
 0x5a3   : > { %p15_p4 = scmp.ge.s32.totalorder %s18_s27, 4  }
 0x5a5   :  { %17 = sbr.rel (!%p15_p4) target bundleno = 1 (0x1), region = 82 }

</bundles_post_ra>
